<compile_context>
chip_gen: v7x
topology: tpu7x:2x2x1
jax: 0.10.0
libtpu: 0.0.40
codegen_flags: <defaults>
</compile_context>

<pallas_src>
import numpy as np

import jax
import jax.numpy as jnp
from jax.experimental import pallas as pl
from jax.experimental.pallas import tpu as pltpu


_NPOS1 = 240   # conv1/pool1 positions per parity class: 15 rows x 16 cols (14x14 valid)
_NPOS2 = 160   # conv2 positions: 10 rows x 16 cols (10x10 valid)
_K1 = 75       # conv1 im2col contraction:  3 in-ch * 5 * 5
_K2 = 150      # conv2 im2col contraction:  6 in-ch * 5 * 5


# ----------------------------------------------------------------------------
# The fused kernel (one grid step == one TB-image tile)
# ----------------------------------------------------------------------------
def _lenet_kernel(x_ref, w1_ref, b1_ref, w2_ref, b2_ref, s2_ref,
                  wf1_ref, bf1_ref, wf2_ref, bf2_ref, wf3_ref, bf3_ref,
                  out_ref, col1_ref, col2_ref, p2_ref):
    f32, bf16 = jnp.float32, jnp.bfloat16
    TB = x_ref.shape[0]

    def per_image(img, carry):
        # (4,3,384): four (row%2, col%2) sub-planes of the 32x32 image, rows
        # padded 16->24 and flattened with row stride 16, so every kernel
        # offset below is a contiguous lane window.  Upcast once per image;
        # the whole elementwise path stays f32 (v5e-friendly).
        planes = x_ref[img].astype(f32)                            # (4, 3, 384)

        # ---- conv1 + 2x2 maxpool: four output-parity classes side by side --
        # im2col row (kh*5+kw)*3 + c, lane block k*240 for parity class k.
        for k, (di, dj) in enumerate(((0, 0), (0, 1), (1, 0), (1, 1))):
            for idx in range(25):
                kh, kw = idx // 5, idx % 5
                p = ((di + kh) % 2) * 2 + ((dj + kw) % 2)
                off = ((di + kh) // 2) * 16 + ((dj + kw) // 2)
                col1_ref[idx * 3:(idx + 1) * 3,
                         k * _NPOS1:(k + 1) * _NPOS1] = planes[p, :, off:off + _NPOS1]
        c1 = jnp.dot(w1_ref[...], col1_ref[...].astype(bf16),
                     preferred_element_type=f32)                   # (6, 960)
        m = jnp.maximum(
            jnp.maximum(c1[:, 0:_NPOS1], c1[:, _NPOS1:2 * _NPOS1]),
            jnp.maximum(c1[:, 2 * _NPOS1:3 * _NPOS1], c1[:, 3 * _NPOS1:4 * _NPOS1]))
        # relu(max(conv) + b) == maxpool(relu(conv + b))  (both are monotone)
        p1 = jnp.maximum(m + b1_ref[...], 0.0)                     # (6, 240) f32

        # ---- conv2 + ReLU (single im2col dot) -------------------------------
        for idx in range(25):
            off = (idx // 5) * 16 + (idx % 5)
            col2_ref[idx * 6:(idx + 1) * 6, :] = p1[:, off:off + _NPOS2]
        c2 = jnp.maximum(
            jnp.dot(w2_ref[...], col2_ref[...].astype(bf16),
                    preferred_element_type=f32) + b2_ref[...], 0.0)  # (16, 160)

        # ---- 2x2 maxpool via one 0/1 selection dot + max over corner blocks -
        sel = jnp.dot(c2.astype(bf16), s2_ref[...],
                      preferred_element_type=f32)                   # (16, 128)
        pooled = jnp.maximum(jnp.maximum(sel[:, 0:32], sel[:, 32:64]),
                             jnp.maximum(sel[:, 64:96], sel[:, 96:128]))
        p2_ref[img] = pooled                                        # (16, 32) f32
        return carry

    jax.lax.fori_loop(0, TB, per_image, 0)

    # ---- batched FC stack over the TB-image tile ----------------------------
    p2 = p2_ref[...]                                                # (TB, 16, 32)
    # Flatten the (16 channels, 32-padded positions) onto lanes (c-major),
    # matching the fc1 weight layout prepared on the host -> ONE fc1 dot.
    p2_flat = jnp.concatenate([p2[:, c, :] for c in range(16)], axis=1)  # (TB, 512)
    h1 = jnp.maximum(
        jnp.dot(p2_flat.astype(bf16), wf1_ref[...],
                preferred_element_type=f32) + bf1_ref[...], 0.0)    # (TB, 120)
    h2 = jnp.maximum(
        jnp.dot(h1.astype(bf16), wf2_ref[...],
                preferred_element_type=f32) + bf2_ref[...], 0.0)    # (TB, 84)
    out_ref[...] = (jnp.dot(h2.astype(bf16), wf3_ref[...],
                            preferred_element_type=f32) + bf3_ref[...])  # (TB, 128)


# ----------------------------------------------------------------------------
# Host-side parameter / constant preparation (done once, off the hot path)
# ----------------------------------------------------------------------------
def _pool2_select():
    """(160, 128) 0/1 matrix: column block (e*2+f)*32 selects corner (e,f) of
    every 2x2 window of the 10x10 conv2 grid (flattened with row stride 16)
    and lays the 5x5 pooled result out as lanes u*5+v (lanes 25..31 zero)."""
    s = np.zeros((_NPOS2, 128), np.float32)
    for e in range(2):
        for f in range(2):
            blk = (e * 2 + f) * 32
            for u in range(5):
                for v in range(5):
                    s[(2 * u + e) * 16 + (2 * v + f), blk + u * 5 + v] = 1.0
    return jnp.asarray(s)


def prepare_params(p):
    """Rearrange PyTorch-layout params into the kernel's matmul layouts and
    cast all MXU operands to bf16 (biases stay f32 for the VPU path)."""
    f32, bf16 = jnp.float32, jnp.bfloat16
    # conv weights: column index (kh*5+kw)*in_ch + c  == im2col row order.
    w1 = p["conv1_w"].transpose(0, 2, 3, 1).reshape(6, _K1).astype(bf16)
    b1 = p["conv1_b"].reshape(6, 1).astype(f32)
    w2 = p["conv2_w"].transpose(0, 2, 3, 1).reshape(16, _K2).astype(bf16)
    b2 = p["conv2_b"].reshape(16, 1).astype(f32)
    # fc1: rows c*32 + q (q = u*5+v, rows q>=25 zero) to match the kernel's
    # lane-concatenated pooled layout -> a single (TB,512)x(512,120) dot.
    wf1 = p["fc1_w"].reshape(120, 16, 25).transpose(1, 2, 0)        # (16,25,120)
    wf1 = jnp.pad(wf1, ((0, 0), (0, 7), (0, 0))).reshape(512, 120).astype(bf16)
    bf1 = p["fc1_b"].reshape(1, 120).astype(f32)
    wf2 = p["fc2_w"].T.astype(bf16)                                 # (120, 84)
    bf2 = p["fc2_b"].reshape(1, 84).astype(f32)
    # fc3 padded 10 -> 128 output lanes for an unmasked, lane-dense store.
    wf3 = jnp.pad(p["fc3_w"].T, ((0, 0), (0, 118))).astype(bf16)    # (84, 128)
    bf3 = jnp.pad(p["fc3_b"].reshape(1, 10), ((0, 0), (0, 118))).astype(f32)
    return dict(w1=w1, b1=b1, w2=w2, b2=b2, s2=_pool2_select().astype(bf16),
                wf1=wf1, bf1=bf1, wf2=wf2, bf2=bf2, wf3=wf3, bf3=bf3)


# ----------------------------------------------------------------------------
# Forward pass: one pallas_call for the whole network
# ----------------------------------------------------------------------------
def _const_spec(shape):
    zeros = (0,) * len(shape)
    return pl.BlockSpec(shape, lambda b: zeros)


def net_forward(x, prepped, tile_b=64):
    """x: (B, 3, 32, 32) f32 NCHW -> logits (B, 10).

    Processes TB = min(tile_b, B) images per grid step.  On v7x choose tile_b
    so that B // TB is even (>=2) so both TensorCores get balanced halves;
    weights and scratch are tiny, so their per-core replication is free.
    """
    B = x.shape[0]
    TB = min(tile_b, B)
    Bp = ((B + TB - 1) // TB) * TB

    # Host-side prep (one fused pass over the input): space-to-depth by output
    # parity (four 16x16 sub-planes), pad rows 16 -> 24 (row stride 16 in the
    # flattened plane), pad the batch to a TB multiple, and cast to bf16 so
    # the HBM->VMEM input stream is half-width.
    xs = x.reshape(B, 3, 16, 2, 16, 2).transpose(0, 3, 5, 1, 2, 4)
    xs = jnp.pad(xs, ((0, Bp - B), (0, 0), (0, 0), (0, 0), (0, 8), (0, 0)))
    xs = xs.reshape(Bp, 4, 3, 384).astype(jnp.bfloat16)

    out = pl.pallas_call(
        _lenet_kernel,
        grid=(Bp // TB,),
        out_shape=jax.ShapeDtypeStruct((Bp, 128), jnp.float32),
        in_specs=[
            pl.BlockSpec((TB, 4, 3, 384), lambda b: (b, 0, 0, 0)),
            _const_spec((6, _K1)),        # conv1 weight (bf16)
            _const_spec((6, 1)),          # conv1 bias   (f32)
            _const_spec((16, _K2)),       # conv2 weight (bf16)
            _const_spec((16, 1)),         # conv2 bias   (f32)
            _const_spec((_NPOS2, 128)),   # pool2 selection matrix (bf16)
            _const_spec((512, 120)),      # fc1 weight (bf16, q-padded, c-major)
            _const_spec((1, 120)),        # fc1 bias
            _const_spec((120, 84)),       # fc2 weight (bf16)
            _const_spec((1, 84)),         # fc2 bias
            _const_spec((84, 128)),       # fc3 weight (bf16, padded to 128 lanes)
            _const_spec((1, 128)),        # fc3 bias   (padded)
        ],
        out_specs=pl.BlockSpec((TB, 128), lambda b: (b, 0)),
        scratch_shapes=[
            pltpu.VMEM((_K1, 4 * _NPOS1), jnp.float32),   # conv1 im2col (75, 960)
            pltpu.VMEM((_K2, _NPOS2), jnp.float32),       # conv2 im2col (150, 160)
            pltpu.VMEM((TB, 16, 32), jnp.float32),        # pooled conv2 per image
        ],
        compiler_params=pltpu.CompilerParams(
            dimension_semantics=("parallel",)),
    )(xs, prepped["w1"], prepped["b1"], prepped["w2"], prepped["b2"],
      prepped["s2"], prepped["wf1"], prepped["bf1"], prepped["wf2"],
      prepped["bf2"], prepped["wf3"], prepped["bf3"])
    return out[:B, :10]


# ----------------------------------------------------------------------------
# Params + pure-JAX reference for the correctness check
# ----------------------------------------------------------------------------
def init_params(key):
    """PyTorch-style uniform +/- 1/sqrt(fan_in) init, PyTorch layouts."""
    def uni(k, shape, fan_in):
        bound = 1.0 / jnp.sqrt(float(fan_in))
        return jax.random.uniform(k, shape, jnp.float32, -bound, bound)

    ks = jax.random.split(key, 10)
    return {
        "conv1_w": uni(ks[0], (6, 3, 5, 5), 3 * 5 * 5),
        "conv1_b": uni(ks[1], (6,), 3 * 5 * 5),
        "conv2_w": uni(ks[2], (16, 6, 5, 5), 6 * 5 * 5),
        "conv2_b": uni(ks[3], (16,), 6 * 5 * 5),
        "fc1_w": uni(ks[4], (120, 400), 400),
        "fc1_b": uni(ks[5], (120,), 400),
        "fc2_w": uni(ks[6], (84, 120), 120),
        "fc2_b": uni(ks[7], (84,), 120),
        "fc3_w": uni(ks[8], (10, 84), 84),
        "fc3_b": uni(ks[9], (10,), 84),
    }


def _reference_forward(x, p):
    def conv(x, w, b):
        y = jax.lax.conv_general_dilated(
            x, w, window_strides=(1, 1), padding="VALID",
            dimension_numbers=("NCHW", "OIHW", "NCHW"))
        return jax.nn.relu(y + b[None, :, None, None])

    def pool(x):
        return jax.lax.reduce_window(
            x, -jnp.inf, jax.lax.max, (1, 1, 2, 2), (1, 1, 2, 2), "VALID")

    x = pool(conv(x, p["conv1_w"], p["conv1_b"]))
    x = pool(conv(x, p["conv2_w"], p["conv2_b"]))
    x = x.reshape(x.shape[0], 400)
    x = jax.nn.relu(x @ p["fc1_w"].T + p["fc1_b"])
    x = jax.nn.relu(x @ p["fc2_w"].T + p["fc2_b"])
    return x @ p["fc3_w"].T + p["fc3_b"]


if __name__ == "__main__":
    key = jax.random.PRNGKey(0)
    kx, kp = jax.random.split(key)
    # 32x32 spatial input is required by the architecture (fc1 expects 16*5*5).
    x = jax.random.normal(kx, (2, 3, 32, 32), dtype=jnp.float32)
    params = init_params(kp)
    prepped = prepare_params(params)

    out = jax.block_until_ready(jax.jit(net_forward)(x, prepped))
    assert out.shape == (2, 10), out.shape

    ref = jax.block_until_ready(_reference_forward(x, params))
    # Tolerance is sized for bf16 MXU operands with f32 accumulation
    # (estimated logit error is a few 1e-3; an all-f32 variant of this kernel
    # matches the f32 reference at ~1e-5).
    err = float(jnp.max(jnp.abs(out - ref)))
    assert jnp.allclose(out, ref, atol=4e-2, rtol=4e-2), f"max abs err {err}"

    print("KERNEL_OK")
</pallas_src>

<mosaic_0001>
module attributes {stable_mosaic.version = 11 : i64} {
  func.func @_lenet_kernel(%arg0: i32, %arg1: memref<2x4x3x384xbf16, #tpu.memory_space<vmem>>, %arg2: memref<6x75xbf16, #tpu.memory_space<vmem>>, %arg3: memref<6x1xf32, #tpu.memory_space<vmem>>, %arg4: memref<16x150xbf16, #tpu.memory_space<vmem>>, %arg5: memref<16x1xf32, #tpu.memory_space<vmem>>, %arg6: memref<160x128xbf16, #tpu.memory_space<vmem>>, %arg7: memref<512x120xbf16, #tpu.memory_space<vmem>>, %arg8: memref<1x120xf32, #tpu.memory_space<vmem>>, %arg9: memref<120x84xbf16, #tpu.memory_space<vmem>>, %arg10: memref<1x84xf32, #tpu.memory_space<vmem>>, %arg11: memref<84x128xbf16, #tpu.memory_space<vmem>>, %arg12: memref<1x128xf32, #tpu.memory_space<vmem>>, %arg13: memref<2x128xf32, #tpu.memory_space<vmem>>, %arg14: memref<75x960xf32, #tpu.memory_space<vmem>>, %arg15: memref<150x160xf32, #tpu.memory_space<vmem>>, %arg16: memref<2x16x32xf32, #tpu.memory_space<vmem>>) attributes {dimension_semantics = [#tpu.dimension_semantics<parallel>], iteration_bounds = array<i64: 1>, scalar_prefetch = 0 : i64, scratch_operands = 3 : i64, tpu.core_type = #tpu.core_type<tc>, window_params = [{transform_indices = @transform_0, window_bounds = array<i64: 2, 4, 3, 384>}, {pipeline_mode = #tpu.pipeline_mode<synchronous>, transform_indices = @transform_1, window_bounds = array<i64: 6, 75>}, {pipeline_mode = #tpu.pipeline_mode<synchronous>, transform_indices = @transform_2, window_bounds = array<i64: 6, 1>}, {pipeline_mode = #tpu.pipeline_mode<synchronous>, transform_indices = @transform_3, window_bounds = array<i64: 16, 150>}, {pipeline_mode = #tpu.pipeline_mode<synchronous>, transform_indices = @transform_4, window_bounds = array<i64: 16, 1>}, {pipeline_mode = #tpu.pipeline_mode<synchronous>, transform_indices = @transform_5, window_bounds = array<i64: 160, 128>}, {pipeline_mode = #tpu.pipeline_mode<synchronous>, transform_indices = @transform_6, window_bounds = array<i64: 512, 120>}, {pipeline_mode = #tpu.pipeline_mode<synchronous>, transform_indices = @transform_7, window_bounds = array<i64: 1, 120>}, {pipeline_mode = #tpu.pipeline_mode<synchronous>, transform_indices = @transform_8, window_bounds = array<i64: 120, 84>}, {pipeline_mode = #tpu.pipeline_mode<synchronous>, transform_indices = @transform_9, window_bounds = array<i64: 1, 84>}, {pipeline_mode = #tpu.pipeline_mode<synchronous>, transform_indices = @transform_10, window_bounds = array<i64: 84, 128>}, {pipeline_mode = #tpu.pipeline_mode<synchronous>, transform_indices = @transform_11, window_bounds = array<i64: 1, 128>}, {transform_indices = @transform_12, window_bounds = array<i64: 2, 128>}]} {
    %c0_i32 = arith.constant 0 : i32
    %c2_i32 = arith.constant 2 : i32
    %0 = arith.addi %c0_i32, %c2_i32 : i32
    %c1_i32 = arith.constant 1 : i32
    scf.for %arg17 = %c0_i32 to %0 step %c1_i32  : i32 {
      %58 = arith.index_cast %arg17 : i32 to index
      %c0_21 = arith.constant 0 : index
      %c0_22 = arith.constant 0 : index
      %c0_23 = arith.constant 0 : index
      %59 = vector.load %arg1[%58, %c0_21, %c0_22, %c0_23] : memref<2x4x3x384xbf16, #tpu.memory_space<vmem>>, vector<1x4x3x384xbf16>
      %60 = vector.shape_cast %59 : vector<1x4x3x384xbf16> to vector<4x3x384xbf16>
      %61 = arith.extf %60 : vector<4x3x384xbf16> to vector<4x3x384xf32>
      %62 = vector.extract_strided_slice %61 {offsets = [0, 0, 0], sizes = [1, 3, 240], strides = [1, 1, 1]} : vector<4x3x384xf32> to vector<1x3x240xf32>
      %63 = vector.shape_cast %62 : vector<1x3x240xf32> to vector<3x240xf32>
      %c0_24 = arith.constant 0 : index
      %c0_25 = arith.constant 0 : index
      %64 = vector.load %arg14[%c0_24, %c0_25] : memref<75x960xf32, #tpu.memory_space<vmem>>, vector<3x240xf32>
      tpu.vector_store %arg14[%c0_24, %c0_25], %63 {strides = array<i32>} : memref<75x960xf32, #tpu.memory_space<vmem>>, vector<3x240xf32>,
      %65 = vector.extract_strided_slice %61 {offsets = [1, 0, 0], sizes = [1, 3, 240], strides = [1, 1, 1]} : vector<4x3x384xf32> to vector<1x3x240xf32>
      %66 = vector.shape_cast %65 : vector<1x3x240xf32> to vector<3x240xf32>
      %c3 = arith.constant 3 : index
      %c0_26 = arith.constant 0 : index
      %67 = vector.load %arg14[%c3, %c0_26] : memref<75x960xf32, #tpu.memory_space<vmem>>, vector<3x240xf32>
      tpu.vector_store %arg14[%c3, %c0_26], %66 {strides = array<i32>} : memref<75x960xf32, #tpu.memory_space<vmem>>, vector<3x240xf32>,
      %68 = vector.extract_strided_slice %61 {offsets = [0, 0, 1], sizes = [1, 3, 240], strides = [1, 1, 1]} : vector<4x3x384xf32> to vector<1x3x240xf32>
      %69 = vector.shape_cast %68 : vector<1x3x240xf32> to vector<3x240xf32>
      %c6 = arith.constant 6 : index
      %c0_27 = arith.constant 0 : index
      %70 = vector.load %arg14[%c6, %c0_27] : memref<75x960xf32, #tpu.memory_space<vmem>>, vector<3x240xf32>
      tpu.vector_store %arg14[%c6, %c0_27], %69 {strides = array<i32>} : memref<75x960xf32, #tpu.memory_space<vmem>>, vector<3x240xf32>,
      %71 = vector.extract_strided_slice %61 {offsets = [1, 0, 1], sizes = [1, 3, 240], strides = [1, 1, 1]} : vector<4x3x384xf32> to vector<1x3x240xf32>
      %72 = vector.shape_cast %71 : vector<1x3x240xf32> to vector<3x240xf32>
      %c9 = arith.constant 9 : index
      %c0_28 = arith.constant 0 : index
      %73 = vector.load %arg14[%c9, %c0_28] : memref<75x960xf32, #tpu.memory_space<vmem>>, vector<3x240xf32>
      tpu.vector_store %arg14[%c9, %c0_28], %72 {strides = array<i32>} : memref<75x960xf32, #tpu.memory_space<vmem>>, vector<3x240xf32>,
      %74 = vector.extract_strided_slice %61 {offsets = [0, 0, 2], sizes = [1, 3, 240], strides = [1, 1, 1]} : vector<4x3x384xf32> to vector<1x3x240xf32>
      %75 = vector.shape_cast %74 : vector<1x3x240xf32> to vector<3x240xf32>
      %c12 = arith.constant 12 : index
      %c0_29 = arith.constant 0 : index
      %76 = vector.load %arg14[%c12, %c0_29] : memref<75x960xf32, #tpu.memory_space<vmem>>, vector<3x240xf32>
      tpu.vector_store %arg14[%c12, %c0_29], %75 {strides = array<i32>} : memref<75x960xf32, #tpu.memory_space<vmem>>, vector<3x240xf32>,
      %77 = vector.extract_strided_slice %61 {offsets = [2, 0, 0], sizes = [1, 3, 240], strides = [1, 1, 1]} : vector<4x3x384xf32> to vector<1x3x240xf32>
      %78 = vector.shape_cast %77 : vector<1x3x240xf32> to vector<3x240xf32>
      %c15 = arith.constant 15 : index
      %c0_30 = arith.constant 0 : index
      %79 = vector.load %arg14[%c15, %c0_30] : memref<75x960xf32, #tpu.memory_space<vmem>>, vector<3x240xf32>
      tpu.vector_store %arg14[%c15, %c0_30], %78 {strides = array<i32>} : memref<75x960xf32, #tpu.memory_space<vmem>>, vector<3x240xf32>,
      %80 = vector.extract_strided_slice %61 {offsets = [3, 0, 0], sizes = [1, 3, 240], strides = [1, 1, 1]} : vector<4x3x384xf32> to vector<1x3x240xf32>
      %81 = vector.shape_cast %80 : vector<1x3x240xf32> to vector<3x240xf32>
      %c18 = arith.constant 18 : index
      %c0_31 = arith.constant 0 : index
      %82 = vector.load %arg14[%c18, %c0_31] : memref<75x960xf32, #tpu.memory_space<vmem>>, vector<3x240xf32>
      tpu.vector_store %arg14[%c18, %c0_31], %81 {strides = array<i32>} : memref<75x960xf32, #tpu.memory_space<vmem>>, vector<3x240xf32>,
      %83 = vector.extract_strided_slice %61 {offsets = [2, 0, 1], sizes = [1, 3, 240], strides = [1, 1, 1]} : vector<4x3x384xf32> to vector<1x3x240xf32>
      %84 = vector.shape_cast %83 : vector<1x3x240xf32> to vector<3x240xf32>
      %c21 = arith.constant 21 : index
      %c0_32 = arith.constant 0 : index
      %85 = vector.load %arg14[%c21, %c0_32] : memref<75x960xf32, #tpu.memory_space<vmem>>, vector<3x240xf32>
      tpu.vector_store %arg14[%c21, %c0_32], %84 {strides = array<i32>} : memref<75x960xf32, #tpu.memory_space<vmem>>, vector<3x240xf32>,
      %86 = vector.extract_strided_slice %61 {offsets = [3, 0, 1], sizes = [1, 3, 240], strides = [1, 1, 1]} : vector<4x3x384xf32> to vector<1x3x240xf32>
      %87 = vector.shape_cast %86 : vector<1x3x240xf32> to vector<3x240xf32>
      %c24 = arith.constant 24 : index
      %c0_33 = arith.constant 0 : index
      %88 = vector.load %arg14[%c24, %c0_33] : memref<75x960xf32, #tpu.memory_space<vmem>>, vector<3x240xf32>
      tpu.vector_store %arg14[%c24, %c0_33], %87 {strides = array<i32>} : memref<75x960xf32, #tpu.memory_space<vmem>>, vector<3x240xf32>,
      %89 = vector.extract_strided_slice %61 {offsets = [2, 0, 2], sizes = [1, 3, 240], strides = [1, 1, 1]} : vector<4x3x384xf32> to vector<1x3x240xf32>
      %90 = vector.shape_cast %89 : vector<1x3x240xf32> to vector<3x240xf32>
      %c27 = arith.constant 27 : index
      %c0_34 = arith.constant 0 : index
      %91 = vector.load %arg14[%c27, %c0_34] : memref<75x960xf32, #tpu.memory_space<vmem>>, vector<3x240xf32>
      tpu.vector_store %arg14[%c27, %c0_34], %90 {strides = array<i32>} : memref<75x960xf32, #tpu.memory_space<vmem>>, vector<3x240xf32>,
      %92 = vector.extract_strided_slice %61 {offsets = [0, 0, 16], sizes = [1, 3, 240], strides = [1, 1, 1]} : vector<4x3x384xf32> to vector<1x3x240xf32>
      %93 = vector.shape_cast %92 : vector<1x3x240xf32> to vector<3x240xf32>
      %c30 = arith.constant 30 : index
      %c0_35 = arith.constant 0 : index
      %94 = vector.load %arg14[%c30, %c0_35] : memref<75x960xf32, #tpu.memory_space<vmem>>, vector<3x240xf32>
      tpu.vector_store %arg14[%c30, %c0_35], %93 {strides = array<i32>} : memref<75x960xf32, #tpu.memory_space<vmem>>, vector<3x240xf32>,
      %95 = vector.extract_strided_slice %61 {offsets = [1, 0, 16], sizes = [1, 3, 240], strides = [1, 1, 1]} : vector<4x3x384xf32> to vector<1x3x240xf32>
      %96 = vector.shape_cast %95 : vector<1x3x240xf32> to vector<3x240xf32>
      %c33 = arith.constant 33 : index
      %c0_36 = arith.constant 0 : index
      %97 = vector.load %arg14[%c33, %c0_36] : memref<75x960xf32, #tpu.memory_space<vmem>>, vector<3x240xf32>
      tpu.vector_store %arg14[%c33, %c0_36], %96 {strides = array<i32>} : memref<75x960xf32, #tpu.memory_space<vmem>>, vector<3x240xf32>,
      %98 = vector.extract_strided_slice %61 {offsets = [0, 0, 17], sizes = [1, 3, 240], strides = [1, 1, 1]} : vector<4x3x384xf32> to vector<1x3x240xf32>
      %99 = vector.shape_cast %98 : vector<1x3x240xf32> to vector<3x240xf32>
      %c36 = arith.constant 36 : index
      %c0_37 = arith.constant 0 : index
      %100 = vector.load %arg14[%c36, %c0_37] : memref<75x960xf32, #tpu.memory_space<vmem>>, vector<3x240xf32>
      tpu.vector_store %arg14[%c36, %c0_37], %99 {strides = array<i32>} : memref<75x960xf32, #tpu.memory_space<vmem>>, vector<3x240xf32>,
      %101 = vector.extract_strided_slice %61 {offsets = [1, 0, 17], sizes = [1, 3, 240], strides = [1, 1, 1]} : vector<4x3x384xf32> to vector<1x3x240xf32>
      %102 = vector.shape_cast %101 : vector<1x3x240xf32> to vector<3x240xf32>
      %c39 = arith.constant 39 : index
      %c0_38 = arith.constant 0 : index
      %103 = vector.load %arg14[%c39, %c0_38] : memref<75x960xf32, #tpu.memory_space<vmem>>, vector<3x240xf32>
      tpu.vector_store %arg14[%c39, %c0_38], %102 {strides = array<i32>} : memref<75x960xf32, #tpu.memory_space<vmem>>, vector<3x240xf32>,
      %104 = vector.extract_strided_slice %61 {offsets = [0, 0, 18], sizes = [1, 3, 240], strides = [1, 1, 1]} : vector<4x3x384xf32> to vector<1x3x240xf32>
      %105 = vector.shape_cast %104 : vector<1x3x240xf32> to vector<3x240xf32>
      %c42 = arith.constant 42 : index
      %c0_39 = arith.constant 0 : index
      %106 = vector.load %arg14[%c42, %c0_39] : memref<75x960xf32, #tpu.memory_space<vmem>>, vector<3x240xf32>
      tpu.vector_store %arg14[%c42, %c0_39], %105 {strides = array<i32>} : memref<75x960xf32, #tpu.memory_space<vmem>>, vector<3x240xf32>,
      %107 = vector.extract_strided_slice %61 {offsets = [2, 0, 16], sizes = [1, 3, 240], strides = [1, 1, 1]} : vector<4x3x384xf32> to vector<1x3x240xf32>
      %108 = vector.shape_cast %107 : vector<1x3x240xf32> to vector<3x240xf32>
      %c45 = arith.constant 45 : index
      %c0_40 = arith.constant 0 : index
      %109 = vector.load %arg14[%c45, %c0_40] : memref<75x960xf32, #tpu.memory_space<vmem>>, vector<3x240xf32>
      tpu.vector_store %arg14[%c45, %c0_40], %108 {strides = array<i32>} : memref<75x960xf32, #tpu.memory_space<vmem>>, vector<3x240xf32>,
      %110 = vector.extract_strided_slice %61 {offsets = [3, 0, 16], sizes = [1, 3, 240], strides = [1, 1, 1]} : vector<4x3x384xf32> to vector<1x3x240xf32>
      %111 = vector.shape_cast %110 : vector<1x3x240xf32> to vector<3x240xf32>
      %c48 = arith.constant 48 : index
      %c0_41 = arith.constant 0 : index
      %112 = vector.load %arg14[%c48, %c0_41] : memref<75x960xf32, #tpu.memory_space<vmem>>, vector<3x240xf32>
      tpu.vector_store %arg14[%c48, %c0_41], %111 {strides = array<i32>} : memref<75x960xf32, #tpu.memory_space<vmem>>, vector<3x240xf32>,
      %113 = vector.extract_strided_slice %61 {offsets = [2, 0, 17], sizes = [1, 3, 240], strides = [1, 1, 1]} : vector<4x3x384xf32> to vector<1x3x240xf32>
      %114 = vector.shape_cast %113 : vector<1x3x240xf32> to vector<3x240xf32>
      %c51 = arith.constant 51 : index
      %c0_42 = arith.constant 0 : index
      %115 = vector.load %arg14[%c51, %c0_42] : memref<75x960xf32, #tpu.memory_space<vmem>>, vector<3x240xf32>
      tpu.vector_store %arg14[%c51, %c0_42], %114 {strides = array<i32>} : memref<75x960xf32, #tpu.memory_space<vmem>>, vector<3x240xf32>,
      %116 = vector.extract_strided_slice %61 {offsets = [3, 0, 17], sizes = [1, 3, 240], strides = [1, 1, 1]} : vector<4x3x384xf32> to vector<1x3x240xf32>
      %117 = vector.shape_cast %116 : vector<1x3x240xf32> to vector<3x240xf32>
      %c54 = arith.constant 54 : index
      %c0_43 = arith.constant 0 : index
      %118 = vector.load %arg14[%c54, %c0_43] : memref<75x960xf32, #tpu.memory_space<vmem>>, vector<3x240xf32>
      tpu.vector_store %arg14[%c54, %c0_43], %117 {strides = array<i32>} : memref<75x960xf32, #tpu.memory_space<vmem>>, vector<3x240xf32>,
      %119 = vector.extract_strided_slice %61 {offsets = [2, 0, 18], sizes = [1, 3, 240], strides = [1, 1, 1]} : vector<4x3x384xf32> to vector<1x3x240xf32>
      %120 = vector.shape_cast %119 : vector<1x3x240xf32> to vector<3x240xf32>
      %c57 = arith.constant 57 : index
      %c0_44 = arith.constant 0 : index
      %121 = vector.load %arg14[%c57, %c0_44] : memref<75x960xf32, #tpu.memory_space<vmem>>, vector<3x240xf32>
      tpu.vector_store %arg14[%c57, %c0_44], %120 {strides = array<i32>} : memref<75x960xf32, #tpu.memory_space<vmem>>, vector<3x240xf32>,
      %122 = vector.extract_strided_slice %61 {offsets = [0, 0, 32], sizes = [1, 3, 240], strides = [1, 1, 1]} : vector<4x3x384xf32> to vector<1x3x240xf32>
      %123 = vector.shape_cast %122 : vector<1x3x240xf32> to vector<3x240xf32>
      %c60 = arith.constant 60 : index
      %c0_45 = arith.constant 0 : index
      %124 = vector.load %arg14[%c60, %c0_45] : memref<75x960xf32, #tpu.memory_space<vmem>>, vector<3x240xf32>
      tpu.vector_store %arg14[%c60, %c0_45], %123 {strides = array<i32>} : memref<75x960xf32, #tpu.memory_space<vmem>>, vector<3x240xf32>,
      %125 = vector.extract_strided_slice %61 {offsets = [1, 0, 32], sizes = [1, 3, 240], strides = [1, 1, 1]} : vector<4x3x384xf32> to vector<1x3x240xf32>
      %126 = vector.shape_cast %125 : vector<1x3x240xf32> to vector<3x240xf32>
      %c63 = arith.constant 63 : index
      %c0_46 = arith.constant 0 : index
      %127 = vector.load %arg14[%c63, %c0_46] : memref<75x960xf32, #tpu.memory_space<vmem>>, vector<3x240xf32>
      tpu.vector_store %arg14[%c63, %c0_46], %126 {strides = array<i32>} : memref<75x960xf32, #tpu.memory_space<vmem>>, vector<3x240xf32>,
      %128 = vector.extract_strided_slice %61 {offsets = [0, 0, 33], sizes = [1, 3, 240], strides = [1, 1, 1]} : vector<4x3x384xf32> to vector<1x3x240xf32>
      %129 = vector.shape_cast %128 : vector<1x3x240xf32> to vector<3x240xf32>
      %c66 = arith.constant 66 : index
      %c0_47 = arith.constant 0 : index
      %130 = vector.load %arg14[%c66, %c0_47] : memref<75x960xf32, #tpu.memory_space<vmem>>, vector<3x240xf32>
      tpu.vector_store %arg14[%c66, %c0_47], %129 {strides = array<i32>} : memref<75x960xf32, #tpu.memory_space<vmem>>, vector<3x240xf32>,
      %131 = vector.extract_strided_slice %61 {offsets = [1, 0, 33], sizes = [1, 3, 240], strides = [1, 1, 1]} : vector<4x3x384xf32> to vector<1x3x240xf32>
      %132 = vector.shape_cast %131 : vector<1x3x240xf32> to vector<3x240xf32>
      %c69 = arith.constant 69 : index
      %c0_48 = arith.constant 0 : index
      %133 = vector.load %arg14[%c69, %c0_48] : memref<75x960xf32, #tpu.memory_space<vmem>>, vector<3x240xf32>
      tpu.vector_store %arg14[%c69, %c0_48], %132 {strides = array<i32>} : memref<75x960xf32, #tpu.memory_space<vmem>>, vector<3x240xf32>,
      %134 = vector.extract_strided_slice %61 {offsets = [0, 0, 34], sizes = [1, 3, 240], strides = [1, 1, 1]} : vector<4x3x384xf32> to vector<1x3x240xf32>
      %135 = vector.shape_cast %134 : vector<1x3x240xf32> to vector<3x240xf32>
      %c72 = arith.constant 72 : index
      %c0_49 = arith.constant 0 : index
      %136 = vector.load %arg14[%c72, %c0_49] : memref<75x960xf32, #tpu.memory_space<vmem>>, vector<3x240xf32>
      tpu.vector_store %arg14[%c72, %c0_49], %135 {strides = array<i32>} : memref<75x960xf32, #tpu.memory_space<vmem>>, vector<3x240xf32>,
      %137 = vector.extract_strided_slice %61 {offsets = [1, 0, 0], sizes = [1, 3, 240], strides = [1, 1, 1]} : vector<4x3x384xf32> to vector<1x3x240xf32>
      %138 = vector.shape_cast %137 : vector<1x3x240xf32> to vector<3x240xf32>
      %c0_50 = arith.constant 0 : index
      %c240 = arith.constant 240 : index
      %139 = vector.load %arg14[%c0_50, %c240] : memref<75x960xf32, #tpu.memory_space<vmem>>, vector<3x240xf32>
      tpu.vector_store %arg14[%c0_50, %c240], %138 {strides = array<i32>} : memref<75x960xf32, #tpu.memory_space<vmem>>, vector<3x240xf32>,
      %140 = vector.extract_strided_slice %61 {offsets = [0, 0, 1], sizes = [1, 3, 240], strides = [1, 1, 1]} : vector<4x3x384xf32> to vector<1x3x240xf32>
      %141 = vector.shape_cast %140 : vector<1x3x240xf32> to vector<3x240xf32>
      %c3_51 = arith.constant 3 : index
      %c240_52 = arith.constant 240 : index
      %142 = vector.load %arg14[%c3_51, %c240_52] : memref<75x960xf32, #tpu.memory_space<vmem>>, vector<3x240xf32>
      tpu.vector_store %arg14[%c3_51, %c240_52], %141 {strides = array<i32>} : memref<75x960xf32, #tpu.memory_space<vmem>>, vector<3x240xf32>,
      %143 = vector.extract_strided_slice %61 {offsets = [1, 0, 1], sizes = [1, 3, 240], strides = [1, 1, 1]} : vector<4x3x384xf32> to vector<1x3x240xf32>
      %144 = vector.shape_cast %143 : vector<1x3x240xf32> to vector<3x240xf32>
      %c6_53 = arith.constant 6 : index
      %c240_54 = arith.constant 240 : index
      %145 = vector.load %arg14[%c6_53, %c240_54] : memref<75x960xf32, #tpu.memory_space<vmem>>, vector<3x240xf32>
      tpu.vector_store %arg14[%c6_53, %c240_54], %144 {strides = array<i32>} : memref<75x960xf32, #tpu.memory_space<vmem>>, vector<3x240xf32>,
      %146 = vector.extract_strided_slice %61 {offsets = [0, 0, 2], sizes = [1, 3, 240], strides = [1, 1, 1]} : vector<4x3x384xf32> to vector<1x3x240xf32>
      %147 = vector.shape_cast %146 : vector<1x3x240xf32> to vector<3x240xf32>
      %c9_55 = arith.constant 9 : index
      %c240_56 = arith.constant 240 : index
      %148 = vector.load %arg14[%c9_55, %c240_56] : memref<75x960xf32, #tpu.memory_space<vmem>>, vector<3x240xf32>
      tpu.vector_store %arg14[%c9_55, %c240_56], %147 {strides = array<i32>} : memref<75x960xf32, #tpu.memory_space<vmem>>, vector<3x240xf32>,
      %149 = vector.extract_strided_slice %61 {offsets = [1, 0, 2], sizes = [1, 3, 240], strides = [1, 1, 1]} : vector<4x3x384xf32> to vector<1x3x240xf32>
      %150 = vector.shape_cast %149 : vector<1x3x240xf32> to vector<3x240xf32>
      %c12_57 = arith.constant 12 : index
      %c240_58 = arith.constant 240 : index
      %151 = vector.load %arg14[%c12_57, %c240_58] : memref<75x960xf32, #tpu.memory_space<vmem>>, vector<3x240xf32>
      tpu.vector_store %arg14[%c12_57, %c240_58], %150 {strides = array<i32>} : memref<75x960xf32, #tpu.memory_space<vmem>>, vector<3x240xf32>,
      %152 = vector.extract_strided_slice %61 {offsets = [3, 0, 0], sizes = [1, 3, 240], strides = [1, 1, 1]} : vector<4x3x384xf32> to vector<1x3x240xf32>
      %153 = vector.shape_cast %152 : vector<1x3x240xf32> to vector<3x240xf32>
      %c15_59 = arith.constant 15 : index
      %c240_60 = arith.constant 240 : index
      %154 = vector.load %arg14[%c15_59, %c240_60] : memref<75x960xf32, #tpu.memory_space<vmem>>, vector<3x240xf32>
      tpu.vector_store %arg14[%c15_59, %c240_60], %153 {strides = array<i32>} : memref<75x960xf32, #tpu.memory_space<vmem>>, vector<3x240xf32>,
      %155 = vector.extract_strided_slice %61 {offsets = [2, 0, 1], sizes = [1, 3, 240], strides = [1, 1, 1]} : vector<4x3x384xf32> to vector<1x3x240xf32>
      %156 = vector.shape_cast %155 : vector<1x3x240xf32> to vector<3x240xf32>
      %c18_61 = arith.constant 18 : index
      %c240_62 = arith.constant 240 : index
      %157 = vector.load %arg14[%c18_61, %c240_62] : memref<75x960xf32, #tpu.memory_space<vmem>>, vector<3x240xf32>
      tpu.vector_store %arg14[%c18_61, %c240_62], %156 {strides = array<i32>} : memref<75x960xf32, #tpu.memory_space<vmem>>, vector<3x240xf32>,
      %158 = vector.extract_strided_slice %61 {offsets = [3, 0, 1], sizes = [1, 3, 240], strides = [1, 1, 1]} : vector<4x3x384xf32> to vector<1x3x240xf32>
      %159 = vector.shape_cast %158 : vector<1x3x240xf32> to vector<3x240xf32>
      %c21_63 = arith.constant 21 : index
      %c240_64 = arith.constant 240 : index
      %160 = vector.load %arg14[%c21_63, %c240_64] : memref<75x960xf32, #tpu.memory_space<vmem>>, vector<3x240xf32>
      tpu.vector_store %arg14[%c21_63, %c240_64], %159 {strides = array<i32>} : memref<75x960xf32, #tpu.memory_space<vmem>>, vector<3x240xf32>,
      %161 = vector.extract_strided_slice %61 {offsets = [2, 0, 2], sizes = [1, 3, 240], strides = [1, 1, 1]} : vector<4x3x384xf32> to vector<1x3x240xf32>
      %162 = vector.shape_cast %161 : vector<1x3x240xf32> to vector<3x240xf32>
      %c24_65 = arith.constant 24 : index
      %c240_66 = arith.constant 240 : index
      %163 = vector.load %arg14[%c24_65, %c240_66] : memref<75x960xf32, #tpu.memory_space<vmem>>, vector<3x240xf32>
      tpu.vector_store %arg14[%c24_65, %c240_66], %162 {strides = array<i32>} : memref<75x960xf32, #tpu.memory_space<vmem>>, vector<3x240xf32>,
      %164 = vector.extract_strided_slice %61 {offsets = [3, 0, 2], sizes = [1, 3, 240], strides = [1, 1, 1]} : vector<4x3x384xf32> to vector<1x3x240xf32>
      %165 = vector.shape_cast %164 : vector<1x3x240xf32> to vector<3x240xf32>
      %c27_67 = arith.constant 27 : index
      %c240_68 = arith.constant 240 : index
      %166 = vector.load %arg14[%c27_67, %c240_68] : memref<75x960xf32, #tpu.memory_space<vmem>>, vector<3x240xf32>
      tpu.vector_store %arg14[%c27_67, %c240_68], %165 {strides = array<i32>} : memref<75x960xf32, #tpu.memory_space<vmem>>, vector<3x240xf32>,
      %167 = vector.extract_strided_slice %61 {offsets = [1, 0, 16], sizes = [1, 3, 240], strides = [1, 1, 1]} : vector<4x3x384xf32> to vector<1x3x240xf32>
      %168 = vector.shape_cast %167 : vector<1x3x240xf32> to vector<3x240xf32>
      %c30_69 = arith.constant 30 : index
      %c240_70 = arith.constant 240 : index
      %169 = vector.load %arg14[%c30_69, %c240_70] : memref<75x960xf32, #tpu.memory_space<vmem>>, vector<3x240xf32>
      tpu.vector_store %arg14[%c30_69, %c240_70], %168 {strides = array<i32>} : memref<75x960xf32, #tpu.memory_space<vmem>>, vector<3x240xf32>,
      %170 = vector.extract_strided_slice %61 {offsets = [0, 0, 17], sizes = [1, 3, 240], strides = [1, 1, 1]} : vector<4x3x384xf32> to vector<1x3x240xf32>
      %171 = vector.shape_cast %170 : vector<1x3x240xf32> to vector<3x240xf32>
      %c33_71 = arith.constant 33 : index
      %c240_72 = arith.constant 240 : index
      %172 = vector.load %arg14[%c33_71, %c240_72] : memref<75x960xf32, #tpu.memory_space<vmem>>, vector<3x240xf32>
      tpu.vector_store %arg14[%c33_71, %c240_72], %171 {strides = array<i32>} : memref<75x960xf32, #tpu.memory_space<vmem>>, vector<3x240xf32>,
      %173 = vector.extract_strided_slice %61 {offsets = [1, 0, 17], sizes = [1, 3, 240], strides = [1, 1, 1]} : vector<4x3x384xf32> to vector<1x3x240xf32>
      %174 = vector.shape_cast %173 : vector<1x3x240xf32> to vector<3x240xf32>
      %c36_73 = arith.constant 36 : index
      %c240_74 = arith.constant 240 : index
      %175 = vector.load %arg14[%c36_73, %c240_74] : memref<75x960xf32, #tpu.memory_space<vmem>>, vector<3x240xf32>
      tpu.vector_store %arg14[%c36_73, %c240_74], %174 {strides = array<i32>} : memref<75x960xf32, #tpu.memory_space<vmem>>, vector<3x240xf32>,
      %176 = vector.extract_strided_slice %61 {offsets = [0, 0, 18], sizes = [1, 3, 240], strides = [1, 1, 1]} : vector<4x3x384xf32> to vector<1x3x240xf32>
      %177 = vector.shape_cast %176 : vector<1x3x240xf32> to vector<3x240xf32>
      %c39_75 = arith.constant 39 : index
      %c240_76 = arith.constant 240 : index
      %178 = vector.load %arg14[%c39_75, %c240_76] : memref<75x960xf32, #tpu.memory_space<vmem>>, vector<3x240xf32>
      tpu.vector_store %arg14[%c39_75, %c240_76], %177 {strides = array<i32>} : memref<75x960xf32, #tpu.memory_space<vmem>>, vector<3x240xf32>,
      %179 = vector.extract_strided_slice %61 {offsets = [1, 0, 18], sizes = [1, 3, 240], strides = [1, 1, 1]} : vector<4x3x384xf32> to vector<1x3x240xf32>
      %180 = vector.shape_cast %179 : vector<1x3x240xf32> to vector<3x240xf32>
      %c42_77 = arith.constant 42 : index
      %c240_78 = arith.constant 240 : index
      %181 = vector.load %arg14[%c42_77, %c240_78] : memref<75x960xf32, #tpu.memory_space<vmem>>, vector<3x240xf32>
      tpu.vector_store %arg14[%c42_77, %c240_78], %180 {strides = array<i32>} : memref<75x960xf32, #tpu.memory_space<vmem>>, vector<3x240xf32>,
      %182 = vector.extract_strided_slice %61 {offsets = [3, 0, 16], sizes = [1, 3, 240], strides = [1, 1, 1]} : vector<4x3x384xf32> to vector<1x3x240xf32>
      %183 = vector.shape_cast %182 : vector<1x3x240xf32> to vector<3x240xf32>
      %c45_79 = arith.constant 45 : index
      %c240_80 = arith.constant 240 : index
      %184 = vector.load %arg14[%c45_79, %c240_80] : memref<75x960xf32, #tpu.memory_space<vmem>>, vector<3x240xf32>
      tpu.vector_store %arg14[%c45_79, %c240_80], %183 {strides = array<i32>} : memref<75x960xf32, #tpu.memory_space<vmem>>, vector<3x240xf32>,
      %185 = vector.extract_strided_slice %61 {offsets = [2, 0, 17], sizes = [1, 3, 240], strides = [1, 1, 1]} : vector<4x3x384xf32> to vector<1x3x240xf32>
      %186 = vector.shape_cast %185 : vector<1x3x240xf32> to vector<3x240xf32>
      %c48_81 = arith.constant 48 : index
      %c240_82 = arith.constant 240 : index
      %187 = vector.load %arg14[%c48_81, %c240_82] : memref<75x960xf32, #tpu.memory_space<vmem>>, vector<3x240xf32>
      tpu.vector_store %arg14[%c48_81, %c240_82], %186 {strides = array<i32>} : memref<75x960xf32, #tpu.memory_space<vmem>>, vector<3x240xf32>,
      %188 = vector.extract_strided_slice %61 {offsets = [3, 0, 17], sizes = [1, 3, 240], strides = [1, 1, 1]} : vector<4x3x384xf32> to vector<1x3x240xf32>
      %189 = vector.shape_cast %188 : vector<1x3x240xf32> to vector<3x240xf32>
      %c51_83 = arith.constant 51 : index
      %c240_84 = arith.constant 240 : index
      %190 = vector.load %arg14[%c51_83, %c240_84] : memref<75x960xf32, #tpu.memory_space<vmem>>, vector<3x240xf32>
      tpu.vector_store %arg14[%c51_83, %c240_84], %189 {strides = array<i32>} : memref<75x960xf32, #tpu.memory_space<vmem>>, vector<3x240xf32>,
      %191 = vector.extract_strided_slice %61 {offsets = [2, 0, 18], sizes = [1, 3, 240], strides = [1, 1, 1]} : vector<4x3x384xf32> to vector<1x3x240xf32>
      %192 = vector.shape_cast %191 : vector<1x3x240xf32> to vector<3x240xf32>
      %c54_85 = arith.constant 54 : index
      %c240_86 = arith.constant 240 : index
      %193 = vector.load %arg14[%c54_85, %c240_86] : memref<75x960xf32, #tpu.memory_space<vmem>>, vector<3x240xf32>
      tpu.vector_store %arg14[%c54_85, %c240_86], %192 {strides = array<i32>} : memref<75x960xf32, #tpu.memory_space<vmem>>, vector<3x240xf32>,
      %194 = vector.extract_strided_slice %61 {offsets = [3, 0, 18], sizes = [1, 3, 240], strides = [1, 1, 1]} : vector<4x3x384xf32> to vector<1x3x240xf32>
      %195 = vector.shape_cast %194 : vector<1x3x240xf32> to vector<3x240xf32>
      %c57_87 = arith.constant 57 : index
      %c240_88 = arith.constant 240 : index
      %196 = vector.load %arg14[%c57_87, %c240_88] : memref<75x960xf32, #tpu.memory_space<vmem>>, vector<3x240xf32>
      tpu.vector_store %arg14[%c57_87, %c240_88], %195 {strides = array<i32>} : memref<75x960xf32, #tpu.memory_space<vmem>>, vector<3x240xf32>,
      %197 = vector.extract_strided_slice %61 {offsets = [1, 0, 32], sizes = [1, 3, 240], strides = [1, 1, 1]} : vector<4x3x384xf32> to vector<1x3x240xf32>
      %198 = vector.shape_cast %197 : vector<1x3x240xf32> to vector<3x240xf32>
      %c60_89 = arith.constant 60 : index
      %c240_90 = arith.constant 240 : index
      %199 = vector.load %arg14[%c60_89, %c240_90] : memref<75x960xf32, #tpu.memory_space<vmem>>, vector<3x240xf32>
      tpu.vector_store %arg14[%c60_89, %c240_90], %198 {strides = array<i32>} : memref<75x960xf32, #tpu.memory_space<vmem>>, vector<3x240xf32>,
      %200 = vector.extract_strided_slice %61 {offsets = [0, 0, 33], sizes = [1, 3, 240], strides = [1, 1, 1]} : vector<4x3x384xf32> to vector<1x3x240xf32>
      %201 = vector.shape_cast %200 : vector<1x3x240xf32> to vector<3x240xf32>
      %c63_91 = arith.constant 63 : index
      %c240_92 = arith.constant 240 : index
      %202 = vector.load %arg14[%c63_91, %c240_92] : memref<75x960xf32, #tpu.memory_space<vmem>>, vector<3x240xf32>
      tpu.vector_store %arg14[%c63_91, %c240_92], %201 {strides = array<i32>} : memref<75x960xf32, #tpu.memory_space<vmem>>, vector<3x240xf32>,
      %203 = vector.extract_strided_slice %61 {offsets = [1, 0, 33], sizes = [1, 3, 240], strides = [1, 1, 1]} : vector<4x3x384xf32> to vector<1x3x240xf32>
      %204 = vector.shape_cast %203 : vector<1x3x240xf32> to vector<3x240xf32>
      %c66_93 = arith.constant 66 : index
      %c240_94 = arith.constant 240 : index
      %205 = vector.load %arg14[%c66_93, %c240_94] : memref<75x960xf32, #tpu.memory_space<vmem>>, vector<3x240xf32>
      tpu.vector_store %arg14[%c66_93, %c240_94], %204 {strides = array<i32>} : memref<75x960xf32, #tpu.memory_space<vmem>>, vector<3x240xf32>,
      %206 = vector.extract_strided_slice %61 {offsets = [0, 0, 34], sizes = [1, 3, 240], strides = [1, 1, 1]} : vector<4x3x384xf32> to vector<1x3x240xf32>
      %207 = vector.shape_cast %206 : vector<1x3x240xf32> to vector<3x240xf32>
      %c69_95 = arith.constant 69 : index
      %c240_96 = arith.constant 240 : index
      %208 = vector.load %arg14[%c69_95, %c240_96] : memref<75x960xf32, #tpu.memory_space<vmem>>, vector<3x240xf32>
      tpu.vector_store %arg14[%c69_95, %c240_96], %207 {strides = array<i32>} : memref<75x960xf32, #tpu.memory_space<vmem>>, vector<3x240xf32>,
      %209 = vector.extract_strided_slice %61 {offsets = [1, 0, 34], sizes = [1, 3, 240], strides = [1, 1, 1]} : vector<4x3x384xf32> to vector<1x3x240xf32>
      %210 = vector.shape_cast %209 : vector<1x3x240xf32> to vector<3x240xf32>
      %c72_97 = arith.constant 72 : index
      %c240_98 = arith.constant 240 : index
      %211 = vector.load %arg14[%c72_97, %c240_98] : memref<75x960xf32, #tpu.memory_space<vmem>>, vector<3x240xf32>
      tpu.vector_store %arg14[%c72_97, %c240_98], %210 {strides = array<i32>} : memref<75x960xf32, #tpu.memory_space<vmem>>, vector<3x240xf32>,
      %212 = vector.extract_strided_slice %61 {offsets = [2, 0, 0], sizes = [1, 3, 240], strides = [1, 1, 1]} : vector<4x3x384xf32> to vector<1x3x240xf32>
      %213 = vector.shape_cast %212 : vector<1x3x240xf32> to vector<3x240xf32>
      %c0_99 = arith.constant 0 : index
      %c480 = arith.constant 480 : index
      %214 = vector.load %arg14[%c0_99, %c480] : memref<75x960xf32, #tpu.memory_space<vmem>>, vector<3x240xf32>
      tpu.vector_store %arg14[%c0_99, %c480], %213 {strides = array<i32>} : memref<75x960xf32, #tpu.memory_space<vmem>>, vector<3x240xf32>,
      %215 = vector.extract_strided_slice %61 {offsets = [3, 0, 0], sizes = [1, 3, 240], strides = [1, 1, 1]} : vector<4x3x384xf32> to vector<1x3x240xf32>
      %216 = vector.shape_cast %215 : vector<1x3x240xf32> to vector<3x240xf32>
      %c3_100 = arith.constant 3 : index
      %c480_101 = arith.constant 480 : index
      %217 = vector.load %arg14[%c3_100, %c480_101] : memref<75x960xf32, #tpu.memory_space<vmem>>, vector<3x240xf32>
      tpu.vector_store %arg14[%c3_100, %c480_101], %216 {strides = array<i32>} : memref<75x960xf32, #tpu.memory_space<vmem>>, vector<3x240xf32>,
      %218 = vector.extract_strided_slice %61 {offsets = [2, 0, 1], sizes = [1, 3, 240], strides = [1, 1, 1]} : vector<4x3x384xf32> to vector<1x3x240xf32>
      %219 = vector.shape_cast %218 : vector<1x3x240xf32> to vector<3x240xf32>
      %c6_102 = arith.constant 6 : index
      %c480_103 = arith.constant 480 : index
      %220 = vector.load %arg14[%c6_102, %c480_103] : memref<75x960xf32, #tpu.memory_space<vmem>>, vector<3x240xf32>
      tpu.vector_store %arg14[%c6_102, %c480_103], %219 {strides = array<i32>} : memref<75x960xf32, #tpu.memory_space<vmem>>, vector<3x240xf32>,
      %221 = vector.extract_strided_slice %61 {offsets = [3, 0, 1], sizes = [1, 3, 240], strides = [1, 1, 1]} : vector<4x3x384xf32> to vector<1x3x240xf32>
      %222 = vector.shape_cast %221 : vector<1x3x240xf32> to vector<3x240xf32>
      %c9_104 = arith.constant 9 : index
      %c480_105 = arith.constant 480 : index
      %223 = vector.load %arg14[%c9_104, %c480_105] : memref<75x960xf32, #tpu.memory_space<vmem>>, vector<3x240xf32>
      tpu.vector_store %arg14[%c9_104, %c480_105], %222 {strides = array<i32>} : memref<75x960xf32, #tpu.memory_space<vmem>>, vector<3x240xf32>,
      %224 = vector.extract_strided_slice %61 {offsets = [2, 0, 2], sizes = [1, 3, 240], strides = [1, 1, 1]} : vector<4x3x384xf32> to vector<1x3x240xf32>
      %225 = vector.shape_cast %224 : vector<1x3x240xf32> to vector<3x240xf32>
      %c12_106 = arith.constant 12 : index
      %c480_107 = arith.constant 480 : index
      %226 = vector.load %arg14[%c12_106, %c480_107] : memref<75x960xf32, #tpu.memory_space<vmem>>, vector<3x240xf32>
      tpu.vector_store %arg14[%c12_106, %c480_107], %225 {strides = array<i32>} : memref<75x960xf32, #tpu.memory_space<vmem>>, vector<3x240xf32>,
      %227 = vector.extract_strided_slice %61 {offsets = [0, 0, 16], sizes = [1, 3, 240], strides = [1, 1, 1]} : vector<4x3x384xf32> to vector<1x3x240xf32>
      %228 = vector.shape_cast %227 : vector<1x3x240xf32> to vector<3x240xf32>
      %c15_108 = arith.constant 15 : index
      %c480_109 = arith.constant 480 : index
      %229 = vector.load %arg14[%c15_108, %c480_109] : memref<75x960xf32, #tpu.memory_space<vmem>>, vector<3x240xf32>
      tpu.vector_store %arg14[%c15_108, %c480_109], %228 {strides = array<i32>} : memref<75x960xf32, #tpu.memory_space<vmem>>, vector<3x240xf32>,
      %230 = vector.extract_strided_slice %61 {offsets = [1, 0, 16], sizes = [1, 3, 240], strides = [1, 1, 1]} : vector<4x3x384xf32> to vector<1x3x240xf32>
      %231 = vector.shape_cast %230 : vector<1x3x240xf32> to vector<3x240xf32>
      %c18_110 = arith.constant 18 : index
      %c480_111 = arith.constant 480 : index
      %232 = vector.load %arg14[%c18_110, %c480_111] : memref<75x960xf32, #tpu.memory_space<vmem>>, vector<3x240xf32>
      tpu.vector_store %arg14[%c18_110, %c480_111], %231 {strides = array<i32>} : memref<75x960xf32, #tpu.memory_space<vmem>>, vector<3x240xf32>,
      %233 = vector.extract_strided_slice %61 {offsets = [0, 0, 17], sizes = [1, 3, 240], strides = [1, 1, 1]} : vector<4x3x384xf32> to vector<1x3x240xf32>
      %234 = vector.shape_cast %233 : vector<1x3x240xf32> to vector<3x240xf32>
      %c21_112 = arith.constant 21 : index
      %c480_113 = arith.constant 480 : index
      %235 = vector.load %arg14[%c21_112, %c480_113] : memref<75x960xf32, #tpu.memory_space<vmem>>, vector<3x240xf32>
      tpu.vector_store %arg14[%c21_112, %c480_113], %234 {strides = array<i32>} : memref<75x960xf32, #tpu.memory_space<vmem>>, vector<3x240xf32>,
      %236 = vector.extract_strided_slice %61 {offsets = [1, 0, 17], sizes = [1, 3, 240], strides = [1, 1, 1]} : vector<4x3x384xf32> to vector<1x3x240xf32>
      %237 = vector.shape_cast %236 : vector<1x3x240xf32> to vector<3x240xf32>
      %c24_114 = arith.constant 24 : index
      %c480_115 = arith.constant 480 : index
      %238 = vector.load %arg14[%c24_114, %c480_115] : memref<75x960xf32, #tpu.memory_space<vmem>>, vector<3x240xf32>
      tpu.vector_store %arg14[%c24_114, %c480_115], %237 {strides = array<i32>} : memref<75x960xf32, #tpu.memory_space<vmem>>, vector<3x240xf32>,
      %239 = vector.extract_strided_slice %61 {offsets = [0, 0, 18], sizes = [1, 3, 240], strides = [1, 1, 1]} : vector<4x3x384xf32> to vector<1x3x240xf32>
      %240 = vector.shape_cast %239 : vector<1x3x240xf32> to vector<3x240xf32>
      %c27_116 = arith.constant 27 : index
      %c480_117 = arith.constant 480 : index
      %241 = vector.load %arg14[%c27_116, %c480_117] : memref<75x960xf32, #tpu.memory_space<vmem>>, vector<3x240xf32>
      tpu.vector_store %arg14[%c27_116, %c480_117], %240 {strides = array<i32>} : memref<75x960xf32, #tpu.memory_space<vmem>>, vector<3x240xf32>,
      %242 = vector.extract_strided_slice %61 {offsets = [2, 0, 16], sizes = [1, 3, 240], strides = [1, 1, 1]} : vector<4x3x384xf32> to vector<1x3x240xf32>
      %243 = vector.shape_cast %242 : vector<1x3x240xf32> to vector<3x240xf32>
      %c30_118 = arith.constant 30 : index
      %c480_119 = arith.constant 480 : index
      %244 = vector.load %arg14[%c30_118, %c480_119] : memref<75x960xf32, #tpu.memory_space<vmem>>, vector<3x240xf32>
      tpu.vector_store %arg14[%c30_118, %c480_119], %243 {strides = array<i32>} : memref<75x960xf32, #tpu.memory_space<vmem>>, vector<3x240xf32>,
      %245 = vector.extract_strided_slice %61 {offsets = [3, 0, 16], sizes = [1, 3, 240], strides = [1, 1, 1]} : vector<4x3x384xf32> to vector<1x3x240xf32>
      %246 = vector.shape_cast %245 : vector<1x3x240xf32> to vector<3x240xf32>
      %c33_120 = arith.constant 33 : index
      %c480_121 = arith.constant 480 : index
      %247 = vector.load %arg14[%c33_120, %c480_121] : memref<75x960xf32, #tpu.memory_space<vmem>>, vector<3x240xf32>
      tpu.vector_store %arg14[%c33_120, %c480_121], %246 {strides = array<i32>} : memref<75x960xf32, #tpu.memory_space<vmem>>, vector<3x240xf32>,
      %248 = vector.extract_strided_slice %61 {offsets = [2, 0, 17], sizes = [1, 3, 240], strides = [1, 1, 1]} : vector<4x3x384xf32> to vector<1x3x240xf32>
      %249 = vector.shape_cast %248 : vector<1x3x240xf32> to vector<3x240xf32>
      %c36_122 = arith.constant 36 : index
      %c480_123 = arith.constant 480 : index
      %250 = vector.load %arg14[%c36_122, %c480_123] : memref<75x960xf32, #tpu.memory_space<vmem>>, vector<3x240xf32>
      tpu.vector_store %arg14[%c36_122, %c480_123], %249 {strides = array<i32>} : memref<75x960xf32, #tpu.memory_space<vmem>>, vector<3x240xf32>,
      %251 = vector.extract_strided_slice %61 {offsets = [3, 0, 17], sizes = [1, 3, 240], strides = [1, 1, 1]} : vector<4x3x384xf32> to vector<1x3x240xf32>
      %252 = vector.shape_cast %251 : vector<1x3x240xf32> to vector<3x240xf32>
      %c39_124 = arith.constant 39 : index
      %c480_125 = arith.constant 480 : index
      %253 = vector.load %arg14[%c39_124, %c480_125] : memref<75x960xf32, #tpu.memory_space<vmem>>, vector<3x240xf32>
      tpu.vector_store %arg14[%c39_124, %c480_125], %252 {strides = array<i32>} : memref<75x960xf32, #tpu.memory_space<vmem>>, vector<3x240xf32>,
      %254 = vector.extract_strided_slice %61 {offsets = [2, 0, 18], sizes = [1, 3, 240], strides = [1, 1, 1]} : vector<4x3x384xf32> to vector<1x3x240xf32>
      %255 = vector.shape_cast %254 : vector<1x3x240xf32> to vector<3x240xf32>
      %c42_126 = arith.constant 42 : index
      %c480_127 = arith.constant 480 : index
      %256 = vector.load %arg14[%c42_126, %c480_127] : memref<75x960xf32, #tpu.memory_space<vmem>>, vector<3x240xf32>
      tpu.vector_store %arg14[%c42_126, %c480_127], %255 {strides = array<i32>} : memref<75x960xf32, #tpu.memory_space<vmem>>, vector<3x240xf32>,
      %257 = vector.extract_strided_slice %61 {offsets = [0, 0, 32], sizes = [1, 3, 240], strides = [1, 1, 1]} : vector<4x3x384xf32> to vector<1x3x240xf32>
      %258 = vector.shape_cast %257 : vector<1x3x240xf32> to vector<3x240xf32>
      %c45_128 = arith.constant 45 : index
      %c480_129 = arith.constant 480 : index
      %259 = vector.load %arg14[%c45_128, %c480_129] : memref<75x960xf32, #tpu.memory_space<vmem>>, vector<3x240xf32>
      tpu.vector_store %arg14[%c45_128, %c480_129], %258 {strides = array<i32>} : memref<75x960xf32, #tpu.memory_space<vmem>>, vector<3x240xf32>,
      %260 = vector.extract_strided_slice %61 {offsets = [1, 0, 32], sizes = [1, 3, 240], strides = [1, 1, 1]} : vector<4x3x384xf32> to vector<1x3x240xf32>
      %261 = vector.shape_cast %260 : vector<1x3x240xf32> to vector<3x240xf32>
      %c48_130 = arith.constant 48 : index
      %c480_131 = arith.constant 480 : index
      %262 = vector.load %arg14[%c48_130, %c480_131] : memref<75x960xf32, #tpu.memory_space<vmem>>, vector<3x240xf32>
      tpu.vector_store %arg14[%c48_130, %c480_131], %261 {strides = array<i32>} : memref<75x960xf32, #tpu.memory_space<vmem>>, vector<3x240xf32>,
      %263 = vector.extract_strided_slice %61 {offsets = [0, 0, 33], sizes = [1, 3, 240], strides = [1, 1, 1]} : vector<4x3x384xf32> to vector<1x3x240xf32>
      %264 = vector.shape_cast %263 : vector<1x3x240xf32> to vector<3x240xf32>
      %c51_132 = arith.constant 51 : index
      %c480_133 = arith.constant 480 : index
      %265 = vector.load %arg14[%c51_132, %c480_133] : memref<75x960xf32, #tpu.memory_space<vmem>>, vector<3x240xf32>
      tpu.vector_store %arg14[%c51_132, %c480_133], %264 {strides = array<i32>} : memref<75x960xf32, #tpu.memory_space<vmem>>, vector<3x240xf32>,
      %266 = vector.extract_strided_slice %61 {offsets = [1, 0, 33], sizes = [1, 3, 240], strides = [1, 1, 1]} : vector<4x3x384xf32> to vector<1x3x240xf32>
      %267 = vector.shape_cast %266 : vector<1x3x240xf32> to vector<3x240xf32>
      %c54_134 = arith.constant 54 : index
      %c480_135 = arith.constant 480 : index
      %268 = vector.load %arg14[%c54_134, %c480_135] : memref<75x960xf32, #tpu.memory_space<vmem>>, vector<3x240xf32>
      tpu.vector_store %arg14[%c54_134, %c480_135], %267 {strides = array<i32>} : memref<75x960xf32, #tpu.memory_space<vmem>>, vector<3x240xf32>,
      %269 = vector.extract_strided_slice %61 {offsets = [0, 0, 34], sizes = [1, 3, 240], strides = [1, 1, 1]} : vector<4x3x384xf32> to vector<1x3x240xf32>
      %270 = vector.shape_cast %269 : vector<1x3x240xf32> to vector<3x240xf32>
      %c57_136 = arith.constant 57 : index
      %c480_137 = arith.constant 480 : index
      %271 = vector.load %arg14[%c57_136, %c480_137] : memref<75x960xf32, #tpu.memory_space<vmem>>, vector<3x240xf32>
      tpu.vector_store %arg14[%c57_136, %c480_137], %270 {strides = array<i32>} : memref<75x960xf32, #tpu.memory_space<vmem>>, vector<3x240xf32>,
      %272 = vector.extract_strided_slice %61 {offsets = [2, 0, 32], sizes = [1, 3, 240], strides = [1, 1, 1]} : vector<4x3x384xf32> to vector<1x3x240xf32>
      %273 = vector.shape_cast %272 : vector<1x3x240xf32> to vector<3x240xf32>
      %c60_138 = arith.constant 60 : index
      %c480_139 = arith.constant 480 : index
      %274 = vector.load %arg14[%c60_138, %c480_139] : memref<75x960xf32, #tpu.memory_space<vmem>>, vector<3x240xf32>
      tpu.vector_store %arg14[%c60_138, %c480_139], %273 {strides = array<i32>} : memref<75x960xf32, #tpu.memory_space<vmem>>, vector<3x240xf32>,
      %275 = vector.extract_strided_slice %61 {offsets = [3, 0, 32], sizes = [1, 3, 240], strides = [1, 1, 1]} : vector<4x3x384xf32> to vector<1x3x240xf32>
      %276 = vector.shape_cast %275 : vector<1x3x240xf32> to vector<3x240xf32>
      %c63_140 = arith.constant 63 : index
      %c480_141 = arith.constant 480 : index
      %277 = vector.load %arg14[%c63_140, %c480_141] : memref<75x960xf32, #tpu.memory_space<vmem>>, vector<3x240xf32>
      tpu.vector_store %arg14[%c63_140, %c480_141], %276 {strides = array<i32>} : memref<75x960xf32, #tpu.memory_space<vmem>>, vector<3x240xf32>,
      %278 = vector.extract_strided_slice %61 {offsets = [2, 0, 33], sizes = [1, 3, 240], strides = [1, 1, 1]} : vector<4x3x384xf32> to vector<1x3x240xf32>
      %279 = vector.shape_cast %278 : vector<1x3x240xf32> to vector<3x240xf32>
      %c66_142 = arith.constant 66 : index
      %c480_143 = arith.constant 480 : index
      %280 = vector.load %arg14[%c66_142, %c480_143] : memref<75x960xf32, #tpu.memory_space<vmem>>, vector<3x240xf32>
      tpu.vector_store %arg14[%c66_142, %c480_143], %279 {strides = array<i32>} : memref<75x960xf32, #tpu.memory_space<vmem>>, vector<3x240xf32>,
      %281 = vector.extract_strided_slice %61 {offsets = [3, 0, 33], sizes = [1, 3, 240], strides = [1, 1, 1]} : vector<4x3x384xf32> to vector<1x3x240xf32>
      %282 = vector.shape_cast %281 : vector<1x3x240xf32> to vector<3x240xf32>
      %c69_144 = arith.constant 69 : index
      %c480_145 = arith.constant 480 : index
      %283 = vector.load %arg14[%c69_144, %c480_145] : memref<75x960xf32, #tpu.memory_space<vmem>>, vector<3x240xf32>
      tpu.vector_store %arg14[%c69_144, %c480_145], %282 {strides = array<i32>} : memref<75x960xf32, #tpu.memory_space<vmem>>, vector<3x240xf32>,
      %284 = vector.extract_strided_slice %61 {offsets = [2, 0, 34], sizes = [1, 3, 240], strides = [1, 1, 1]} : vector<4x3x384xf32> to vector<1x3x240xf32>
      %285 = vector.shape_cast %284 : vector<1x3x240xf32> to vector<3x240xf32>
      %c72_146 = arith.constant 72 : index
      %c480_147 = arith.constant 480 : index
      %286 = vector.load %arg14[%c72_146, %c480_147] : memref<75x960xf32, #tpu.memory_space<vmem>>, vector<3x240xf32>
      tpu.vector_store %arg14[%c72_146, %c480_147], %285 {strides = array<i32>} : memref<75x960xf32, #tpu.memory_space<vmem>>, vector<3x240xf32>,
      %287 = vector.extract_strided_slice %61 {offsets = [3, 0, 0], sizes = [1, 3, 240], strides = [1, 1, 1]} : vector<4x3x384xf32> to vector<1x3x240xf32>
      %288 = vector.shape_cast %287 : vector<1x3x240xf32> to vector<3x240xf32>
      %c0_148 = arith.constant 0 : index
      %c720 = arith.constant 720 : index
      %289 = vector.load %arg14[%c0_148, %c720] : memref<75x960xf32, #tpu.memory_space<vmem>>, vector<3x240xf32>
      tpu.vector_store %arg14[%c0_148, %c720], %288 {strides = array<i32>} : memref<75x960xf32, #tpu.memory_space<vmem>>, vector<3x240xf32>,
      %290 = vector.extract_strided_slice %61 {offsets = [2, 0, 1], sizes = [1, 3, 240], strides = [1, 1, 1]} : vector<4x3x384xf32> to vector<1x3x240xf32>
      %291 = vector.shape_cast %290 : vector<1x3x240xf32> to vector<3x240xf32>
      %c3_149 = arith.constant 3 : index
      %c720_150 = arith.constant 720 : index
      %292 = vector.load %arg14[%c3_149, %c720_150] : memref<75x960xf32, #tpu.memory_space<vmem>>, vector<3x240xf32>
      tpu.vector_store %arg14[%c3_149, %c720_150], %291 {strides = array<i32>} : memref<75x960xf32, #tpu.memory_space<vmem>>, vector<3x240xf32>,
      %293 = vector.extract_strided_slice %61 {offsets = [3, 0, 1], sizes = [1, 3, 240], strides = [1, 1, 1]} : vector<4x3x384xf32> to vector<1x3x240xf32>
      %294 = vector.shape_cast %293 : vector<1x3x240xf32> to vector<3x240xf32>
      %c6_151 = arith.constant 6 : index
      %c720_152 = arith.constant 720 : index
      %295 = vector.load %arg14[%c6_151, %c720_152] : memref<75x960xf32, #tpu.memory_space<vmem>>, vector<3x240xf32>
      tpu.vector_store %arg14[%c6_151, %c720_152], %294 {strides = array<i32>} : memref<75x960xf32, #tpu.memory_space<vmem>>, vector<3x240xf32>,
      %296 = vector.extract_strided_slice %61 {offsets = [2, 0, 2], sizes = [1, 3, 240], strides = [1, 1, 1]} : vector<4x3x384xf32> to vector<1x3x240xf32>
      %297 = vector.shape_cast %296 : vector<1x3x240xf32> to vector<3x240xf32>
      %c9_153 = arith.constant 9 : index
      %c720_154 = arith.constant 720 : index
      %298 = vector.load %arg14[%c9_153, %c720_154] : memref<75x960xf32, #tpu.memory_space<vmem>>, vector<3x240xf32>
      tpu.vector_store %arg14[%c9_153, %c720_154], %297 {strides = array<i32>} : memref<75x960xf32, #tpu.memory_space<vmem>>, vector<3x240xf32>,
      %299 = vector.extract_strided_slice %61 {offsets = [3, 0, 2], sizes = [1, 3, 240], strides = [1, 1, 1]} : vector<4x3x384xf32> to vector<1x3x240xf32>
      %300 = vector.shape_cast %299 : vector<1x3x240xf32> to vector<3x240xf32>
      %c12_155 = arith.constant 12 : index
      %c720_156 = arith.constant 720 : index
      %301 = vector.load %arg14[%c12_155, %c720_156] : memref<75x960xf32, #tpu.memory_space<vmem>>, vector<3x240xf32>
      tpu.vector_store %arg14[%c12_155, %c720_156], %300 {strides = array<i32>} : memref<75x960xf32, #tpu.memory_space<vmem>>, vector<3x240xf32>,
      %302 = vector.extract_strided_slice %61 {offsets = [1, 0, 16], sizes = [1, 3, 240], strides = [1, 1, 1]} : vector<4x3x384xf32> to vector<1x3x240xf32>
      %303 = vector.shape_cast %302 : vector<1x3x240xf32> to vector<3x240xf32>
      %c15_157 = arith.constant 15 : index
      %c720_158 = arith.constant 720 : index
      %304 = vector.load %arg14[%c15_157, %c720_158] : memref<75x960xf32, #tpu.memory_space<vmem>>, vector<3x240xf32>
      tpu.vector_store %arg14[%c15_157, %c720_158], %303 {strides = array<i32>} : memref<75x960xf32, #tpu.memory_space<vmem>>, vector<3x240xf32>,
      %305 = vector.extract_strided_slice %61 {offsets = [0, 0, 17], sizes = [1, 3, 240], strides = [1, 1, 1]} : vector<4x3x384xf32> to vector<1x3x240xf32>
      %306 = vector.shape_cast %305 : vector<1x3x240xf32> to vector<3x240xf32>
      %c18_159 = arith.constant 18 : index
      %c720_160 = arith.constant 720 : index
      %307 = vector.load %arg14[%c18_159, %c720_160] : memref<75x960xf32, #tpu.memory_space<vmem>>, vector<3x240xf32>
      tpu.vector_store %arg14[%c18_159, %c720_160], %306 {strides = array<i32>} : memref<75x960xf32, #tpu.memory_space<vmem>>, vector<3x240xf32>,
      %308 = vector.extract_strided_slice %61 {offsets = [1, 0, 17], sizes = [1, 3, 240], strides = [1, 1, 1]} : vector<4x3x384xf32> to vector<1x3x240xf32>
      %309 = vector.shape_cast %308 : vector<1x3x240xf32> to vector<3x240xf32>
      %c21_161 = arith.constant 21 : index
      %c720_162 = arith.constant 720 : index
      %310 = vector.load %arg14[%c21_161, %c720_162] : memref<75x960xf32, #tpu.memory_space<vmem>>, vector<3x240xf32>
      tpu.vector_store %arg14[%c21_161, %c720_162], %309 {strides = array<i32>} : memref<75x960xf32, #tpu.memory_space<vmem>>, vector<3x240xf32>,
      %311 = vector.extract_strided_slice %61 {offsets = [0, 0, 18], sizes = [1, 3, 240], strides = [1, 1, 1]} : vector<4x3x384xf32> to vector<1x3x240xf32>
      %312 = vector.shape_cast %311 : vector<1x3x240xf32> to vector<3x240xf32>
      %c24_163 = arith.constant 24 : index
      %c720_164 = arith.constant 720 : index
      %313 = vector.load %arg14[%c24_163, %c720_164] : memref<75x960xf32, #tpu.memory_space<vmem>>, vector<3x240xf32>
      tpu.vector_store %arg14[%c24_163, %c720_164], %312 {strides = array<i32>} : memref<75x960xf32, #tpu.memory_space<vmem>>, vector<3x240xf32>,
      %314 = vector.extract_strided_slice %61 {offsets = [1, 0, 18], sizes = [1, 3, 240], strides = [1, 1, 1]} : vector<4x3x384xf32> to vector<1x3x240xf32>
      %315 = vector.shape_cast %314 : vector<1x3x240xf32> to vector<3x240xf32>
      %c27_165 = arith.constant 27 : index
      %c720_166 = arith.constant 720 : index
      %316 = vector.load %arg14[%c27_165, %c720_166] : memref<75x960xf32, #tpu.memory_space<vmem>>, vector<3x240xf32>
      tpu.vector_store %arg14[%c27_165, %c720_166], %315 {strides = array<i32>} : memref<75x960xf32, #tpu.memory_space<vmem>>, vector<3x240xf32>,
      %317 = vector.extract_strided_slice %61 {offsets = [3, 0, 16], sizes = [1, 3, 240], strides = [1, 1, 1]} : vector<4x3x384xf32> to vector<1x3x240xf32>
      %318 = vector.shape_cast %317 : vector<1x3x240xf32> to vector<3x240xf32>
      %c30_167 = arith.constant 30 : index
      %c720_168 = arith.constant 720 : index
      %319 = vector.load %arg14[%c30_167, %c720_168] : memref<75x960xf32, #tpu.memory_space<vmem>>, vector<3x240xf32>
      tpu.vector_store %arg14[%c30_167, %c720_168], %318 {strides = array<i32>} : memref<75x960xf32, #tpu.memory_space<vmem>>, vector<3x240xf32>,
      %320 = vector.extract_strided_slice %61 {offsets = [2, 0, 17], sizes = [1, 3, 240], strides = [1, 1, 1]} : vector<4x3x384xf32> to vector<1x3x240xf32>
      %321 = vector.shape_cast %320 : vector<1x3x240xf32> to vector<3x240xf32>
      %c33_169 = arith.constant 33 : index
      %c720_170 = arith.constant 720 : index
      %322 = vector.load %arg14[%c33_169, %c720_170] : memref<75x960xf32, #tpu.memory_space<vmem>>, vector<3x240xf32>
      tpu.vector_store %arg14[%c33_169, %c720_170], %321 {strides = array<i32>} : memref<75x960xf32, #tpu.memory_space<vmem>>, vector<3x240xf32>,
      %323 = vector.extract_strided_slice %61 {offsets = [3, 0, 17], sizes = [1, 3, 240], strides = [1, 1, 1]} : vector<4x3x384xf32> to vector<1x3x240xf32>
      %324 = vector.shape_cast %323 : vector<1x3x240xf32> to vector<3x240xf32>
      %c36_171 = arith.constant 36 : index
      %c720_172 = arith.constant 720 : index
      %325 = vector.load %arg14[%c36_171, %c720_172] : memref<75x960xf32, #tpu.memory_space<vmem>>, vector<3x240xf32>
      tpu.vector_store %arg14[%c36_171, %c720_172], %324 {strides = array<i32>} : memref<75x960xf32, #tpu.memory_space<vmem>>, vector<3x240xf32>,
      %326 = vector.extract_strided_slice %61 {offsets = [2, 0, 18], sizes = [1, 3, 240], strides = [1, 1, 1]} : vector<4x3x384xf32> to vector<1x3x240xf32>
      %327 = vector.shape_cast %326 : vector<1x3x240xf32> to vector<3x240xf32>
      %c39_173 = arith.constant 39 : index
      %c720_174 = arith.constant 720 : index
      %328 = vector.load %arg14[%c39_173, %c720_174] : memref<75x960xf32, #tpu.memory_space<vmem>>, vector<3x240xf32>
      tpu.vector_store %arg14[%c39_173, %c720_174], %327 {strides = array<i32>} : memref<75x960xf32, #tpu.memory_space<vmem>>, vector<3x240xf32>,
      %329 = vector.extract_strided_slice %61 {offsets = [3, 0, 18], sizes = [1, 3, 240], strides = [1, 1, 1]} : vector<4x3x384xf32> to vector<1x3x240xf32>
      %330 = vector.shape_cast %329 : vector<1x3x240xf32> to vector<3x240xf32>
      %c42_175 = arith.constant 42 : index
      %c720_176 = arith.constant 720 : index
      %331 = vector.load %arg14[%c42_175, %c720_176] : memref<75x960xf32, #tpu.memory_space<vmem>>, vector<3x240xf32>
      tpu.vector_store %arg14[%c42_175, %c720_176], %330 {strides = array<i32>} : memref<75x960xf32, #tpu.memory_space<vmem>>, vector<3x240xf32>,
      %332 = vector.extract_strided_slice %61 {offsets = [1, 0, 32], sizes = [1, 3, 240], strides = [1, 1, 1]} : vector<4x3x384xf32> to vector<1x3x240xf32>
      %333 = vector.shape_cast %332 : vector<1x3x240xf32> to vector<3x240xf32>
      %c45_177 = arith.constant 45 : index
      %c720_178 = arith.constant 720 : index
      %334 = vector.load %arg14[%c45_177, %c720_178] : memref<75x960xf32, #tpu.memory_space<vmem>>, vector<3x240xf32>
      tpu.vector_store %arg14[%c45_177, %c720_178], %333 {strides = array<i32>} : memref<75x960xf32, #tpu.memory_space<vmem>>, vector<3x240xf32>,
      %335 = vector.extract_strided_slice %61 {offsets = [0, 0, 33], sizes = [1, 3, 240], strides = [1, 1, 1]} : vector<4x3x384xf32> to vector<1x3x240xf32>
      %336 = vector.shape_cast %335 : vector<1x3x240xf32> to vector<3x240xf32>
      %c48_179 = arith.constant 48 : index
      %c720_180 = arith.constant 720 : index
      %337 = vector.load %arg14[%c48_179, %c720_180] : memref<75x960xf32, #tpu.memory_space<vmem>>, vector<3x240xf32>
      tpu.vector_store %arg14[%c48_179, %c720_180], %336 {strides = array<i32>} : memref<75x960xf32, #tpu.memory_space<vmem>>, vector<3x240xf32>,
      %338 = vector.extract_strided_slice %61 {offsets = [1, 0, 33], sizes = [1, 3, 240], strides = [1, 1, 1]} : vector<4x3x384xf32> to vector<1x3x240xf32>
      %339 = vector.shape_cast %338 : vector<1x3x240xf32> to vector<3x240xf32>
      %c51_181 = arith.constant 51 : index
      %c720_182 = arith.constant 720 : index
      %340 = vector.load %arg14[%c51_181, %c720_182] : memref<75x960xf32, #tpu.memory_space<vmem>>, vector<3x240xf32>
      tpu.vector_store %arg14[%c51_181, %c720_182], %339 {strides = array<i32>} : memref<75x960xf32, #tpu.memory_space<vmem>>, vector<3x240xf32>,
      %341 = vector.extract_strided_slice %61 {offsets = [0, 0, 34], sizes = [1, 3, 240], strides = [1, 1, 1]} : vector<4x3x384xf32> to vector<1x3x240xf32>
      %342 = vector.shape_cast %341 : vector<1x3x240xf32> to vector<3x240xf32>
      %c54_183 = arith.constant 54 : index
      %c720_184 = arith.constant 720 : index
      %343 = vector.load %arg14[%c54_183, %c720_184] : memref<75x960xf32, #tpu.memory_space<vmem>>, vector<3x240xf32>
      tpu.vector_store %arg14[%c54_183, %c720_184], %342 {strides = array<i32>} : memref<75x960xf32, #tpu.memory_space<vmem>>, vector<3x240xf32>,
      %344 = vector.extract_strided_slice %61 {offsets = [1, 0, 34], sizes = [1, 3, 240], strides = [1, 1, 1]} : vector<4x3x384xf32> to vector<1x3x240xf32>
      %345 = vector.shape_cast %344 : vector<1x3x240xf32> to vector<3x240xf32>
      %c57_185 = arith.constant 57 : index
      %c720_186 = arith.constant 720 : index
      %346 = vector.load %arg14[%c57_185, %c720_186] : memref<75x960xf32, #tpu.memory_space<vmem>>, vector<3x240xf32>
      tpu.vector_store %arg14[%c57_185, %c720_186], %345 {strides = array<i32>} : memref<75x960xf32, #tpu.memory_space<vmem>>, vector<3x240xf32>,
      %347 = vector.extract_strided_slice %61 {offsets = [3, 0, 32], sizes = [1, 3, 240], strides = [1, 1, 1]} : vector<4x3x384xf32> to vector<1x3x240xf32>
      %348 = vector.shape_cast %347 : vector<1x3x240xf32> to vector<3x240xf32>
      %c60_187 = arith.constant 60 : index
      %c720_188 = arith.constant 720 : index
      %349 = vector.load %arg14[%c60_187, %c720_188] : memref<75x960xf32, #tpu.memory_space<vmem>>, vector<3x240xf32>
      tpu.vector_store %arg14[%c60_187, %c720_188], %348 {strides = array<i32>} : memref<75x960xf32, #tpu.memory_space<vmem>>, vector<3x240xf32>,
      %350 = vector.extract_strided_slice %61 {offsets = [2, 0, 33], sizes = [1, 3, 240], strides = [1, 1, 1]} : vector<4x3x384xf32> to vector<1x3x240xf32>
      %351 = vector.shape_cast %350 : vector<1x3x240xf32> to vector<3x240xf32>
      %c63_189 = arith.constant 63 : index
      %c720_190 = arith.constant 720 : index
      %352 = vector.load %arg14[%c63_189, %c720_190] : memref<75x960xf32, #tpu.memory_space<vmem>>, vector<3x240xf32>
      tpu.vector_store %arg14[%c63_189, %c720_190], %351 {strides = array<i32>} : memref<75x960xf32, #tpu.memory_space<vmem>>, vector<3x240xf32>,
      %353 = vector.extract_strided_slice %61 {offsets = [3, 0, 33], sizes = [1, 3, 240], strides = [1, 1, 1]} : vector<4x3x384xf32> to vector<1x3x240xf32>
      %354 = vector.shape_cast %353 : vector<1x3x240xf32> to vector<3x240xf32>
      %c66_191 = arith.constant 66 : index
      %c720_192 = arith.constant 720 : index
      %355 = vector.load %arg14[%c66_191, %c720_192] : memref<75x960xf32, #tpu.memory_space<vmem>>, vector<3x240xf32>
      tpu.vector_store %arg14[%c66_191, %c720_192], %354 {strides = array<i32>} : memref<75x960xf32, #tpu.memory_space<vmem>>, vector<3x240xf32>,
      %356 = vector.extract_strided_slice %61 {offsets = [2, 0, 34], sizes = [1, 3, 240], strides = [1, 1, 1]} : vector<4x3x384xf32> to vector<1x3x240xf32>
      %357 = vector.shape_cast %356 : vector<1x3x240xf32> to vector<3x240xf32>
      %c69_193 = arith.constant 69 : index
      %c720_194 = arith.constant 720 : index
      %358 = vector.load %arg14[%c69_193, %c720_194] : memref<75x960xf32, #tpu.memory_space<vmem>>, vector<3x240xf32>
      tpu.vector_store %arg14[%c69_193, %c720_194], %357 {strides = array<i32>} : memref<75x960xf32, #tpu.memory_space<vmem>>, vector<3x240xf32>,
      %359 = vector.extract_strided_slice %61 {offsets = [3, 0, 34], sizes = [1, 3, 240], strides = [1, 1, 1]} : vector<4x3x384xf32> to vector<1x3x240xf32>
      %360 = vector.shape_cast %359 : vector<1x3x240xf32> to vector<3x240xf32>
      %c72_195 = arith.constant 72 : index
      %c720_196 = arith.constant 720 : index
      %361 = vector.load %arg14[%c72_195, %c720_196] : memref<75x960xf32, #tpu.memory_space<vmem>>, vector<3x240xf32>
      tpu.vector_store %arg14[%c72_195, %c720_196], %360 {strides = array<i32>} : memref<75x960xf32, #tpu.memory_space<vmem>>, vector<3x240xf32>,
      %c0_197 = arith.constant 0 : index
      %c0_198 = arith.constant 0 : index
      %362 = vector.load %arg2[%c0_197, %c0_198] : memref<6x75xbf16, #tpu.memory_space<vmem>>, vector<6x75xbf16>
      %c0_199 = arith.constant 0 : index
      %c0_200 = arith.constant 0 : index
      %363 = vector.load %arg14[%c0_199, %c0_200] : memref<75x960xf32, #tpu.memory_space<vmem>>, vector<75x960xf32>
      %364 = arith.truncf %363 : vector<75x960xf32> to vector<75x960xbf16>
      %cst_201 = arith.constant dense<0.000000e+00> : vector<6x960xf32>
      %365 = tpu.matmul %362, %364, %cst_201 {dimension_numbers = #tpu.dot_dimension_numbers<[1], [0], [0], [1], [0, 0, 1, 1], [], []>} : vector<6x75xbf16>, vector<75x960xbf16>, vector<6x960xf32> -> vector<6x960xf32>
      %366 = vector.extract_strided_slice %365 {offsets = [0, 0], sizes = [6, 240], strides = [1, 1]} : vector<6x960xf32> to vector<6x240xf32>
      %367 = vector.extract_strided_slice %365 {offsets = [0, 240], sizes = [6, 240], strides = [1, 1]} : vector<6x960xf32> to vector<6x240xf32>
      %368 = arith.maximumf %366, %367 : vector<6x240xf32>
      %369 = vector.extract_strided_slice %365 {offsets = [0, 480], sizes = [6, 240], strides = [1, 1]} : vector<6x960xf32> to vector<6x240xf32>
      %370 = vector.extract_strided_slice %365 {offsets = [0, 720], sizes = [6, 240], strides = [1, 1]} : vector<6x960xf32> to vector<6x240xf32>
      %371 = arith.maximumf %369, %370 : vector<6x240xf32>
      %372 = arith.maximumf %368, %371 : vector<6x240xf32>
      %c0_202 = arith.constant 0 : index
      %c0_203 = arith.constant 0 : index
      %373 = vector.load %arg3[%c0_202, %c0_203] : memref<6x1xf32, #tpu.memory_space<vmem>>, vector<6x1xf32>
      %374 = vector.broadcast %373 : vector<6x1xf32> to vector<6x240xf32>
      %375 = arith.addf %372, %374 : vector<6x240xf32>
      %cst_204 = arith.constant 0.000000e+00 : f32
      %376 = vector.broadcast %cst_204 : f32 to vector<6x240xf32>
      %377 = arith.maximumf %375, %376 : vector<6x240xf32>
      %378 = vector.extract_strided_slice %377 {offsets = [0, 0], sizes = [6, 160], strides = [1, 1]} : vector<6x240xf32> to vector<6x160xf32>
      %c0_205 = arith.constant 0 : index
      %c0_206 = arith.constant 0 : index
      %379 = vector.load %arg15[%c0_205, %c0_206] : memref<150x160xf32, #tpu.memory_space<vmem>>, vector<6x160xf32>
      tpu.vector_store %arg15[%c0_205, %c0_206], %378 {strides = array<i32>} : memref<150x160xf32, #tpu.memory_space<vmem>>, vector<6x160xf32>,
      %380 = vector.extract_strided_slice %377 {offsets = [0, 1], sizes = [6, 160], strides = [1, 1]} : vector<6x240xf32> to vector<6x160xf32>
      %c6_207 = arith.constant 6 : index
      %c0_208 = arith.constant 0 : index
      %381 = vector.load %arg15[%c6_207, %c0_208] : memref<150x160xf32, #tpu.memory_space<vmem>>, vector<6x160xf32>
      tpu.vector_store %arg15[%c6_207, %c0_208], %380 {strides = array<i32>} : memref<150x160xf32, #tpu.memory_space<vmem>>, vector<6x160xf32>,
      %382 = vector.extract_strided_slice %377 {offsets = [0, 2], sizes = [6, 160], strides = [1, 1]} : vector<6x240xf32> to vector<6x160xf32>
      %c12_209 = arith.constant 12 : index
      %c0_210 = arith.constant 0 : index
      %383 = vector.load %arg15[%c12_209, %c0_210] : memref<150x160xf32, #tpu.memory_space<vmem>>, vector<6x160xf32>
      tpu.vector_store %arg15[%c12_209, %c0_210], %382 {strides = array<i32>} : memref<150x160xf32, #tpu.memory_space<vmem>>, vector<6x160xf32>,
      %384 = vector.extract_strided_slice %377 {offsets = [0, 3], sizes = [6, 160], strides = [1, 1]} : vector<6x240xf32> to vector<6x160xf32>
      %c18_211 = arith.constant 18 : index
      %c0_212 = arith.constant 0 : index
      %385 = vector.load %arg15[%c18_211, %c0_212] : memref<150x160xf32, #tpu.memory_space<vmem>>, vector<6x160xf32>
      tpu.vector_store %arg15[%c18_211, %c0_212], %384 {strides = array<i32>} : memref<150x160xf32, #tpu.memory_space<vmem>>, vector<6x160xf32>,
      %386 = vector.extract_strided_slice %377 {offsets = [0, 4], sizes = [6, 160], strides = [1, 1]} : vector<6x240xf32> to vector<6x160xf32>
      %c24_213 = arith.constant 24 : index
      %c0_214 = arith.constant 0 : index
      %387 = vector.load %arg15[%c24_213, %c0_214] : memref<150x160xf32, #tpu.memory_space<vmem>>, vector<6x160xf32>
      tpu.vector_store %arg15[%c24_213, %c0_214], %386 {strides = array<i32>} : memref<150x160xf32, #tpu.memory_space<vmem>>, vector<6x160xf32>,
      %388 = vector.extract_strided_slice %377 {offsets = [0, 16], sizes = [6, 160], strides = [1, 1]} : vector<6x240xf32> to vector<6x160xf32>
      %c30_215 = arith.constant 30 : index
      %c0_216 = arith.constant 0 : index
      %389 = vector.load %arg15[%c30_215, %c0_216] : memref<150x160xf32, #tpu.memory_space<vmem>>, vector<6x160xf32>
      tpu.vector_store %arg15[%c30_215, %c0_216], %388 {strides = array<i32>} : memref<150x160xf32, #tpu.memory_space<vmem>>, vector<6x160xf32>,
      %390 = vector.extract_strided_slice %377 {offsets = [0, 17], sizes = [6, 160], strides = [1, 1]} : vector<6x240xf32> to vector<6x160xf32>
      %c36_217 = arith.constant 36 : index
      %c0_218 = arith.constant 0 : index
      %391 = vector.load %arg15[%c36_217, %c0_218] : memref<150x160xf32, #tpu.memory_space<vmem>>, vector<6x160xf32>
      tpu.vector_store %arg15[%c36_217, %c0_218], %390 {strides = array<i32>} : memref<150x160xf32, #tpu.memory_space<vmem>>, vector<6x160xf32>,
      %392 = vector.extract_strided_slice %377 {offsets = [0, 18], sizes = [6, 160], strides = [1, 1]} : vector<6x240xf32> to vector<6x160xf32>
      %c42_219 = arith.constant 42 : index
      %c0_220 = arith.constant 0 : index
      %393 = vector.load %arg15[%c42_219, %c0_220] : memref<150x160xf32, #tpu.memory_space<vmem>>, vector<6x160xf32>
      tpu.vector_store %arg15[%c42_219, %c0_220], %392 {strides = array<i32>} : memref<150x160xf32, #tpu.memory_space<vmem>>, vector<6x160xf32>,
      %394 = vector.extract_strided_slice %377 {offsets = [0, 19], sizes = [6, 160], strides = [1, 1]} : vector<6x240xf32> to vector<6x160xf32>
      %c48_221 = arith.constant 48 : index
      %c0_222 = arith.constant 0 : index
      %395 = vector.load %arg15[%c48_221, %c0_222] : memref<150x160xf32, #tpu.memory_space<vmem>>, vector<6x160xf32>
      tpu.vector_store %arg15[%c48_221, %c0_222], %394 {strides = array<i32>} : memref<150x160xf32, #tpu.memory_space<vmem>>, vector<6x160xf32>,
      %396 = vector.extract_strided_slice %377 {offsets = [0, 20], sizes = [6, 160], strides = [1, 1]} : vector<6x240xf32> to vector<6x160xf32>
      %c54_223 = arith.constant 54 : index
      %c0_224 = arith.constant 0 : index
      %397 = vector.load %arg15[%c54_223, %c0_224] : memref<150x160xf32, #tpu.memory_space<vmem>>, vector<6x160xf32>
      tpu.vector_store %arg15[%c54_223, %c0_224], %396 {strides = array<i32>} : memref<150x160xf32, #tpu.memory_space<vmem>>, vector<6x160xf32>,
      %398 = vector.extract_strided_slice %377 {offsets = [0, 32], sizes = [6, 160], strides = [1, 1]} : vector<6x240xf32> to vector<6x160xf32>
      %c60_225 = arith.constant 60 : index
      %c0_226 = arith.constant 0 : index
      %399 = vector.load %arg15[%c60_225, %c0_226] : memref<150x160xf32, #tpu.memory_space<vmem>>, vector<6x160xf32>
      tpu.vector_store %arg15[%c60_225, %c0_226], %398 {strides = array<i32>} : memref<150x160xf32, #tpu.memory_space<vmem>>, vector<6x160xf32>,
      %400 = vector.extract_strided_slice %377 {offsets = [0, 33], sizes = [6, 160], strides = [1, 1]} : vector<6x240xf32> to vector<6x160xf32>
      %c66_227 = arith.constant 66 : index
      %c0_228 = arith.constant 0 : index
      %401 = vector.load %arg15[%c66_227, %c0_228] : memref<150x160xf32, #tpu.memory_space<vmem>>, vector<6x160xf32>
      tpu.vector_store %arg15[%c66_227, %c0_228], %400 {strides = array<i32>} : memref<150x160xf32, #tpu.memory_space<vmem>>, vector<6x160xf32>,
      %402 = vector.extract_strided_slice %377 {offsets = [0, 34], sizes = [6, 160], strides = [1, 1]} : vector<6x240xf32> to vector<6x160xf32>
      %c72_229 = arith.constant 72 : index
      %c0_230 = arith.constant 0 : index
      %403 = vector.load %arg15[%c72_229, %c0_230] : memref<150x160xf32, #tpu.memory_space<vmem>>, vector<6x160xf32>
      tpu.vector_store %arg15[%c72_229, %c0_230], %402 {strides = array<i32>} : memref<150x160xf32, #tpu.memory_space<vmem>>, vector<6x160xf32>,
      %404 = vector.extract_strided_slice %377 {offsets = [0, 35], sizes = [6, 160], strides = [1, 1]} : vector<6x240xf32> to vector<6x160xf32>
      %c78 = arith.constant 78 : index
      %c0_231 = arith.constant 0 : index
      %405 = vector.load %arg15[%c78, %c0_231] : memref<150x160xf32, #tpu.memory_space<vmem>>, vector<6x160xf32>
      tpu.vector_store %arg15[%c78, %c0_231], %404 {strides = array<i32>} : memref<150x160xf32, #tpu.memory_space<vmem>>, vector<6x160xf32>,
      %406 = vector.extract_strided_slice %377 {offsets = [0, 36], sizes = [6, 160], strides = [1, 1]} : vector<6x240xf32> to vector<6x160xf32>
      %c84 = arith.constant 84 : index
      %c0_232 = arith.constant 0 : index
      %407 = vector.load %arg15[%c84, %c0_232] : memref<150x160xf32, #tpu.memory_space<vmem>>, vector<6x160xf32>
      tpu.vector_store %arg15[%c84, %c0_232], %406 {strides = array<i32>} : memref<150x160xf32, #tpu.memory_space<vmem>>, vector<6x160xf32>,
      %408 = vector.extract_strided_slice %377 {offsets = [0, 48], sizes = [6, 160], strides = [1, 1]} : vector<6x240xf32> to vector<6x160xf32>
      %c90 = arith.constant 90 : index
      %c0_233 = arith.constant 0 : index
      %409 = vector.load %arg15[%c90, %c0_233] : memref<150x160xf32, #tpu.memory_space<vmem>>, vector<6x160xf32>
      tpu.vector_store %arg15[%c90, %c0_233], %408 {strides = array<i32>} : memref<150x160xf32, #tpu.memory_space<vmem>>, vector<6x160xf32>,
      %410 = vector.extract_strided_slice %377 {offsets = [0, 49], sizes = [6, 160], strides = [1, 1]} : vector<6x240xf32> to vector<6x160xf32>
      %c96 = arith.constant 96 : index
      %c0_234 = arith.constant 0 : index
      %411 = vector.load %arg15[%c96, %c0_234] : memref<150x160xf32, #tpu.memory_space<vmem>>, vector<6x160xf32>
      tpu.vector_store %arg15[%c96, %c0_234], %410 {strides = array<i32>} : memref<150x160xf32, #tpu.memory_space<vmem>>, vector<6x160xf32>,
      %412 = vector.extract_strided_slice %377 {offsets = [0, 50], sizes = [6, 160], strides = [1, 1]} : vector<6x240xf32> to vector<6x160xf32>
      %c102 = arith.constant 102 : index
      %c0_235 = arith.constant 0 : index
      %413 = vector.load %arg15[%c102, %c0_235] : memref<150x160xf32, #tpu.memory_space<vmem>>, vector<6x160xf32>
      tpu.vector_store %arg15[%c102, %c0_235], %412 {strides = array<i32>} : memref<150x160xf32, #tpu.memory_space<vmem>>, vector<6x160xf32>,
      %414 = vector.extract_strided_slice %377 {offsets = [0, 51], sizes = [6, 160], strides = [1, 1]} : vector<6x240xf32> to vector<6x160xf32>
      %c108 = arith.constant 108 : index
      %c0_236 = arith.constant 0 : index
      %415 = vector.load %arg15[%c108, %c0_236] : memref<150x160xf32, #tpu.memory_space<vmem>>, vector<6x160xf32>
      tpu.vector_store %arg15[%c108, %c0_236], %414 {strides = array<i32>} : memref<150x160xf32, #tpu.memory_space<vmem>>, vector<6x160xf32>,
      %416 = vector.extract_strided_slice %377 {offsets = [0, 52], sizes = [6, 160], strides = [1, 1]} : vector<6x240xf32> to vector<6x160xf32>
      %c114 = arith.constant 114 : index
      %c0_237 = arith.constant 0 : index
      %417 = vector.load %arg15[%c114, %c0_237] : memref<150x160xf32, #tpu.memory_space<vmem>>, vector<6x160xf32>
      tpu.vector_store %arg15[%c114, %c0_237], %416 {strides = array<i32>} : memref<150x160xf32, #tpu.memory_space<vmem>>, vector<6x160xf32>,
      %418 = vector.extract_strided_slice %377 {offsets = [0, 64], sizes = [6, 160], strides = [1, 1]} : vector<6x240xf32> to vector<6x160xf32>
      %c120 = arith.constant 120 : index
      %c0_238 = arith.constant 0 : index
      %419 = vector.load %arg15[%c120, %c0_238] : memref<150x160xf32, #tpu.memory_space<vmem>>, vector<6x160xf32>
      tpu.vector_store %arg15[%c120, %c0_238], %418 {strides = array<i32>} : memref<150x160xf32, #tpu.memory_space<vmem>>, vector<6x160xf32>,
      %420 = vector.extract_strided_slice %377 {offsets = [0, 65], sizes = [6, 160], strides = [1, 1]} : vector<6x240xf32> to vector<6x160xf32>
      %c126 = arith.constant 126 : index
      %c0_239 = arith.constant 0 : index
      %421 = vector.load %arg15[%c126, %c0_239] : memref<150x160xf32, #tpu.memory_space<vmem>>, vector<6x160xf32>
      tpu.vector_store %arg15[%c126, %c0_239], %420 {strides = array<i32>} : memref<150x160xf32, #tpu.memory_space<vmem>>, vector<6x160xf32>,
      %422 = vector.extract_strided_slice %377 {offsets = [0, 66], sizes = [6, 160], strides = [1, 1]} : vector<6x240xf32> to vector<6x160xf32>
      %c132 = arith.constant 132 : index
      %c0_240 = arith.constant 0 : index
      %423 = vector.load %arg15[%c132, %c0_240] : memref<150x160xf32, #tpu.memory_space<vmem>>, vector<6x160xf32>
      tpu.vector_store %arg15[%c132, %c0_240], %422 {strides = array<i32>} : memref<150x160xf32, #tpu.memory_space<vmem>>, vector<6x160xf32>,
      %424 = vector.extract_strided_slice %377 {offsets = [0, 67], sizes = [6, 160], strides = [1, 1]} : vector<6x240xf32> to vector<6x160xf32>
      %c138 = arith.constant 138 : index
      %c0_241 = arith.constant 0 : index
      %425 = vector.load %arg15[%c138, %c0_241] : memref<150x160xf32, #tpu.memory_space<vmem>>, vector<6x160xf32>
      tpu.vector_store %arg15[%c138, %c0_241], %424 {strides = array<i32>} : memref<150x160xf32, #tpu.memory_space<vmem>>, vector<6x160xf32>,
      %426 = vector.extract_strided_slice %377 {offsets = [0, 68], sizes = [6, 160], strides = [1, 1]} : vector<6x240xf32> to vector<6x160xf32>
      %c144 = arith.constant 144 : index
      %c0_242 = arith.constant 0 : index
      %427 = vector.load %arg15[%c144, %c0_242] : memref<150x160xf32, #tpu.memory_space<vmem>>, vector<6x160xf32>
      tpu.vector_store %arg15[%c144, %c0_242], %426 {strides = array<i32>} : memref<150x160xf32, #tpu.memory_space<vmem>>, vector<6x160xf32>,
      %c0_243 = arith.constant 0 : index
      %c0_244 = arith.constant 0 : index
      %428 = vector.load %arg4[%c0_243, %c0_244] : memref<16x150xbf16, #tpu.memory_space<vmem>>, vector<16x150xbf16>
      %c0_245 = arith.constant 0 : index
      %c0_246 = arith.constant 0 : index
      %429 = vector.load %arg15[%c0_245, %c0_246] : memref<150x160xf32, #tpu.memory_space<vmem>>, vector<150x160xf32>
      %430 = arith.truncf %429 : vector<150x160xf32> to vector<150x160xbf16>
      %cst_247 = arith.constant dense<0.000000e+00> : vector<16x160xf32>
      %431 = tpu.matmul %428, %430, %cst_247 {dimension_numbers = #tpu.dot_dimension_numbers<[1], [0], [0], [1], [0, 0, 1, 1], [], []>} : vector<16x150xbf16>, vector<150x160xbf16>, vector<16x160xf32> -> vector<16x160xf32>
      %c0_248 = arith.constant 0 : index
      %c0_249 = arith.constant 0 : index
      %432 = vector.load %arg5[%c0_248, %c0_249] : memref<16x1xf32, #tpu.memory_space<vmem>>, vector<16x1xf32>
      %433 = vector.broadcast %432 : vector<16x1xf32> to vector<16x160xf32>
      %434 = arith.addf %431, %433 : vector<16x160xf32>
      %cst_250 = arith.constant 0.000000e+00 : f32
      %435 = vector.broadcast %cst_250 : f32 to vector<16x160xf32>
      %436 = arith.maximumf %434, %435 : vector<16x160xf32>
      %437 = arith.truncf %436 : vector<16x160xf32> to vector<16x160xbf16>
      %c0_251 = arith.constant 0 : index
      %c0_252 = arith.constant 0 : index
      %438 = vector.load %arg6[%c0_251, %c0_252] : memref<160x128xbf16, #tpu.memory_space<vmem>>, vector<160x128xbf16>
      %cst_253 = arith.constant dense<0.000000e+00> : vector<16x128xf32>
      %439 = tpu.matmul %437, %438, %cst_253 {dimension_numbers = #tpu.dot_dimension_numbers<[1], [0], [0], [1], [0, 0, 1, 1], [], []>} : vector<16x160xbf16>, vector<160x128xbf16>, vector<16x128xf32> -> vector<16x128xf32>
      %440 = vector.extract_strided_slice %439 {offsets = [0, 0], sizes = [16, 32], strides = [1, 1]} : vector<16x128xf32> to vector<16x32xf32>
      %441 = vector.extract_strided_slice %439 {offsets = [0, 32], sizes = [16, 32], strides = [1, 1]} : vector<16x128xf32> to vector<16x32xf32>
      %442 = arith.maximumf %440, %441 : vector<16x32xf32>
      %443 = vector.extract_strided_slice %439 {offsets = [0, 64], sizes = [16, 32], strides = [1, 1]} : vector<16x128xf32> to vector<16x32xf32>
      %444 = vector.extract_strided_slice %439 {offsets = [0, 96], sizes = [16, 32], strides = [1, 1]} : vector<16x128xf32> to vector<16x32xf32>
      %445 = arith.maximumf %443, %444 : vector<16x32xf32>
      %446 = arith.maximumf %442, %445 : vector<16x32xf32>
      %447 = arith.index_cast %arg17 : i32 to index
      %c0_254 = arith.constant 0 : index
      %c0_255 = arith.constant 0 : index
      %448 = vector.load %arg16[%447, %c0_254, %c0_255] : memref<2x16x32xf32, #tpu.memory_space<vmem>>, vector<1x16x32xf32>
      %449 = vector.shape_cast %448 : vector<1x16x32xf32> to vector<16x32xf32>
      %450 = vector.shape_cast %446 : vector<16x32xf32> to vector<1x16x32xf32>
      tpu.vector_store %arg16[%447, %c0_254, %c0_255], %450 {strides = array<i32>} : memref<2x16x32xf32, #tpu.memory_space<vmem>>, vector<1x16x32xf32>,
    }
    %c2_i32_0 = arith.constant 2 : i32
    %c0 = arith.constant 0 : index
    %c0_1 = arith.constant 0 : index
    %c0_2 = arith.constant 0 : index
    %1 = vector.load %arg16[%c0, %c0_1, %c0_2] : memref<2x16x32xf32, #tpu.memory_space<vmem>>, vector<2x16x32xf32>
    %2 = vector.extract_strided_slice %1 {offsets = [0, 0, 0], sizes = [2, 1, 32], strides = [1, 1, 1]} : vector<2x16x32xf32> to vector<2x1x32xf32>
    %3 = vector.shape_cast %2 : vector<2x1x32xf32> to vector<2x32xf32>
    %4 = vector.extract_strided_slice %1 {offsets = [0, 1, 0], sizes = [2, 1, 32], strides = [1, 1, 1]} : vector<2x16x32xf32> to vector<2x1x32xf32>
    %5 = vector.shape_cast %4 : vector<2x1x32xf32> to vector<2x32xf32>
    %6 = vector.extract_strided_slice %1 {offsets = [0, 2, 0], sizes = [2, 1, 32], strides = [1, 1, 1]} : vector<2x16x32xf32> to vector<2x1x32xf32>
    %7 = vector.shape_cast %6 : vector<2x1x32xf32> to vector<2x32xf32>
    %8 = vector.extract_strided_slice %1 {offsets = [0, 3, 0], sizes = [2, 1, 32], strides = [1, 1, 1]} : vector<2x16x32xf32> to vector<2x1x32xf32>
    %9 = vector.shape_cast %8 : vector<2x1x32xf32> to vector<2x32xf32>
    %10 = vector.extract_strided_slice %1 {offsets = [0, 4, 0], sizes = [2, 1, 32], strides = [1, 1, 1]} : vector<2x16x32xf32> to vector<2x1x32xf32>
    %11 = vector.shape_cast %10 : vector<2x1x32xf32> to vector<2x32xf32>
    %12 = vector.extract_strided_slice %1 {offsets = [0, 5, 0], sizes = [2, 1, 32], strides = [1, 1, 1]} : vector<2x16x32xf32> to vector<2x1x32xf32>
    %13 = vector.shape_cast %12 : vector<2x1x32xf32> to vector<2x32xf32>
    %14 = vector.extract_strided_slice %1 {offsets = [0, 6, 0], sizes = [2, 1, 32], strides = [1, 1, 1]} : vector<2x16x32xf32> to vector<2x1x32xf32>
    %15 = vector.shape_cast %14 : vector<2x1x32xf32> to vector<2x32xf32>
    %16 = vector.extract_strided_slice %1 {offsets = [0, 7, 0], sizes = [2, 1, 32], strides = [1, 1, 1]} : vector<2x16x32xf32> to vector<2x1x32xf32>
    %17 = vector.shape_cast %16 : vector<2x1x32xf32> to vector<2x32xf32>
    %18 = vector.extract_strided_slice %1 {offsets = [0, 8, 0], sizes = [2, 1, 32], strides = [1, 1, 1]} : vector<2x16x32xf32> to vector<2x1x32xf32>
    %19 = vector.shape_cast %18 : vector<2x1x32xf32> to vector<2x32xf32>
    %20 = vector.extract_strided_slice %1 {offsets = [0, 9, 0], sizes = [2, 1, 32], strides = [1, 1, 1]} : vector<2x16x32xf32> to vector<2x1x32xf32>
    %21 = vector.shape_cast %20 : vector<2x1x32xf32> to vector<2x32xf32>
    %22 = vector.extract_strided_slice %1 {offsets = [0, 10, 0], sizes = [2, 1, 32], strides = [1, 1, 1]} : vector<2x16x32xf32> to vector<2x1x32xf32>
    %23 = vector.shape_cast %22 : vector<2x1x32xf32> to vector<2x32xf32>
    %24 = vector.extract_strided_slice %1 {offsets = [0, 11, 0], sizes = [2, 1, 32], strides = [1, 1, 1]} : vector<2x16x32xf32> to vector<2x1x32xf32>
    %25 = vector.shape_cast %24 : vector<2x1x32xf32> to vector<2x32xf32>
    %26 = vector.extract_strided_slice %1 {offsets = [0, 12, 0], sizes = [2, 1, 32], strides = [1, 1, 1]} : vector<2x16x32xf32> to vector<2x1x32xf32>
    %27 = vector.shape_cast %26 : vector<2x1x32xf32> to vector<2x32xf32>
    %28 = vector.extract_strided_slice %1 {offsets = [0, 13, 0], sizes = [2, 1, 32], strides = [1, 1, 1]} : vector<2x16x32xf32> to vector<2x1x32xf32>
    %29 = vector.shape_cast %28 : vector<2x1x32xf32> to vector<2x32xf32>
    %30 = vector.extract_strided_slice %1 {offsets = [0, 14, 0], sizes = [2, 1, 32], strides = [1, 1, 1]} : vector<2x16x32xf32> to vector<2x1x32xf32>
    %31 = vector.shape_cast %30 : vector<2x1x32xf32> to vector<2x32xf32>
    %32 = vector.extract_strided_slice %1 {offsets = [0, 15, 0], sizes = [2, 1, 32], strides = [1, 1, 1]} : vector<2x16x32xf32> to vector<2x1x32xf32>
    %33 = vector.shape_cast %32 : vector<2x1x32xf32> to vector<2x32xf32>
    %34 = tpu.concatenate %3, %5, %7, %9, %11, %13, %15, %17, %19, %21, %23, %25, %27, %29, %31, %33 in 1 : vector<2x32xf32>, vector<2x32xf32>, vector<2x32xf32>, vector<2x32xf32>, vector<2x32xf32>, vector<2x32xf32>, vector<2x32xf32>, vector<2x32xf32>, vector<2x32xf32>, vector<2x32xf32>, vector<2x32xf32>, vector<2x32xf32>, vector<2x32xf32>, vector<2x32xf32>, vector<2x32xf32>, vector<2x32xf32> -> vector<2x512xf32>
    %35 = arith.truncf %34 : vector<2x512xf32> to vector<2x512xbf16>
    %c0_3 = arith.constant 0 : index
    %c0_4 = arith.constant 0 : index
    %36 = vector.load %arg7[%c0_3, %c0_4] : memref<512x120xbf16, #tpu.memory_space<vmem>>, vector<512x120xbf16>
    %cst = arith.constant dense<0.000000e+00> : vector<2x120xf32>
    %37 = tpu.matmul %35, %36, %cst {dimension_numbers = #tpu.dot_dimension_numbers<[1], [0], [0], [1], [0, 0, 1, 1], [], []>} : vector<2x512xbf16>, vector<512x120xbf16>, vector<2x120xf32> -> vector<2x120xf32>
    %c0_5 = arith.constant 0 : index
    %c0_6 = arith.constant 0 : index
    %38 = vector.load %arg8[%c0_5, %c0_6] : memref<1x120xf32, #tpu.memory_space<vmem>>, vector<1x120xf32>
    %39 = vector.broadcast %38 : vector<1x120xf32> to vector<2x120xf32>
    %40 = arith.addf %37, %39 : vector<2x120xf32>
    %cst_7 = arith.constant 0.000000e+00 : f32
    %41 = vector.broadcast %cst_7 : f32 to vector<2x120xf32>
    %42 = arith.maximumf %40, %41 : vector<2x120xf32>
    %43 = arith.truncf %42 : vector<2x120xf32> to vector<2x120xbf16>
    %c0_8 = arith.constant 0 : index
    %c0_9 = arith.constant 0 : index
    %44 = vector.load %arg9[%c0_8, %c0_9] : memref<120x84xbf16, #tpu.memory_space<vmem>>, vector<120x84xbf16>
    %cst_10 = arith.constant dense<0.000000e+00> : vector<2x84xf32>
    %45 = tpu.matmul %43, %44, %cst_10 {dimension_numbers = #tpu.dot_dimension_numbers<[1], [0], [0], [1], [0, 0, 1, 1], [], []>} : vector<2x120xbf16>, vector<120x84xbf16>, vector<2x84xf32> -> vector<2x84xf32>
    %c0_11 = arith.constant 0 : index
    %c0_12 = arith.constant 0 : index
    %46 = vector.load %arg10[%c0_11, %c0_12] : memref<1x84xf32, #tpu.memory_space<vmem>>, vector<1x84xf32>
    %47 = vector.broadcast %46 : vector<1x84xf32> to vector<2x84xf32>
    %48 = arith.addf %45, %47 : vector<2x84xf32>
    %cst_13 = arith.constant 0.000000e+00 : f32
    %49 = vector.broadcast %cst_13 : f32 to vector<2x84xf32>
    %50 = arith.maximumf %48, %49 : vector<2x84xf32>
    %51 = arith.truncf %50 : vector<2x84xf32> to vector<2x84xbf16>
    %c0_14 = arith.constant 0 : index
    %c0_15 = arith.constant 0 : index
    %52 = vector.load %arg11[%c0_14, %c0_15] : memref<84x128xbf16, #tpu.memory_space<vmem>>, vector<84x128xbf16>
    %cst_16 = arith.constant dense<0.000000e+00> : vector<2x128xf32>
    %53 = tpu.matmul %51, %52, %cst_16 {dimension_numbers = #tpu.dot_dimension_numbers<[1], [0], [0], [1], [0, 0, 1, 1], [], []>} : vector<2x84xbf16>, vector<84x128xbf16>, vector<2x128xf32> -> vector<2x128xf32>
    %c0_17 = arith.constant 0 : index
    %c0_18 = arith.constant 0 : index
    %54 = vector.load %arg12[%c0_17, %c0_18] : memref<1x128xf32, #tpu.memory_space<vmem>>, vector<1x128xf32>
    %55 = vector.broadcast %54 : vector<1x128xf32> to vector<2x128xf32>
    %56 = arith.addf %53, %55 : vector<2x128xf32>
    %c0_19 = arith.constant 0 : index
    %c0_20 = arith.constant 0 : index
    %57 = vector.load %arg13[%c0_19, %c0_20] : memref<2x128xf32, #tpu.memory_space<vmem>>, vector<2x128xf32>
    tpu.vector_store %arg13[%c0_19, %c0_20], %56 {strides = array<i32>} : memref<2x128xf32, #tpu.memory_space<vmem>>, vector<2x128xf32>,
    return
  }
  func.func @transform_0(%arg0: i32) -> (i32, i32, i32, i32) {
    %c0_i32 = arith.constant 0 : i32
    %c0_i32_0 = arith.constant 0 : i32
    %c0_i32_1 = arith.constant 0 : i32
    %c0_i32_2 = arith.constant 0 : i32
    return %arg0, %c0_i32, %c0_i32_0, %c0_i32_1 : i32, i32, i32, i32
  }
  func.func @transform_1(%arg0: i32) -> (i32, i32) {
    %c0_i32 = arith.constant 0 : i32
    %c0_i32_0 = arith.constant 0 : i32
    %c0_i32_1 = arith.constant 0 : i32
    return %c0_i32, %c0_i32_0 : i32, i32
  }
  func.func @transform_2(%arg0: i32) -> (i32, i32) {
    %c0_i32 = arith.constant 0 : i32
    %c0_i32_0 = arith.constant 0 : i32
    %c0_i32_1 = arith.constant 0 : i32
    return %c0_i32, %c0_i32_0 : i32, i32
  }
  func.func @transform_3(%arg0: i32) -> (i32, i32) {
    %c0_i32 = arith.constant 0 : i32
    %c0_i32_0 = arith.constant 0 : i32
    %c0_i32_1 = arith.constant 0 : i32
    return %c0_i32, %c0_i32_0 : i32, i32
  }
  func.func @transform_4(%arg0: i32) -> (i32, i32) {
    %c0_i32 = arith.constant 0 : i32
    %c0_i32_0 = arith.constant 0 : i32
    %c0_i32_1 = arith.constant 0 : i32
    return %c0_i32, %c0_i32_0 : i32, i32
  }
  func.func @transform_5(%arg0: i32) -> (i32, i32) {
    %c0_i32 = arith.constant 0 : i32
    %c0_i32_0 = arith.constant 0 : i32
    %c0_i32_1 = arith.constant 0 : i32
    return %c0_i32, %c0_i32_0 : i32, i32
  }
  func.func @transform_6(%arg0: i32) -> (i32, i32) {
    %c0_i32 = arith.constant 0 : i32
    %c0_i32_0 = arith.constant 0 : i32
    %c0_i32_1 = arith.constant 0 : i32
    return %c0_i32, %c0_i32_0 : i32, i32
  }
  func.func @transform_7(%arg0: i32) -> (i32, i32) {
    %c0_i32 = arith.constant 0 : i32
    %c0_i32_0 = arith.constant 0 : i32
    %c0_i32_1 = arith.constant 0 : i32
    return %c0_i32, %c0_i32_0 : i32, i32
  }
  func.func @transform_8(%arg0: i32) -> (i32, i32) {
    %c0_i32 = arith.constant 0 : i32
    %c0_i32_0 = arith.constant 0 : i32
    %c0_i32_1 = arith.constant 0 : i32
    return %c0_i32, %c0_i32_0 : i32, i32
  }
  func.func @transform_9(%arg0: i32) -> (i32, i32) {
    %c0_i32 = arith.constant 0 : i32
    %c0_i32_0 = arith.constant 0 : i32
    %c0_i32_1 = arith.constant 0 : i32
    return %c0_i32, %c0_i32_0 : i32, i32
  }
  func.func @transform_10(%arg0: i32) -> (i32, i32) {
    %c0_i32 = arith.constant 0 : i32
    %c0_i32_0 = arith.constant 0 : i32
    %c0_i32_1 = arith.constant 0 : i32
    return %c0_i32, %c0_i32_0 : i32, i32
  }
  func.func @transform_11(%arg0: i32) -> (i32, i32) {
    %c0_i32 = arith.constant 0 : i32
    %c0_i32_0 = arith.constant 0 : i32
    %c0_i32_1 = arith.constant 0 : i32
    return %c0_i32, %c0_i32_0 : i32, i32
  }
  func.func @transform_12(%arg0: i32) -> (i32, i32) {
    %c0_i32 = arith.constant 0 : i32
    %c0_i32_0 = arith.constant 0 : i32
    return %arg0, %c0_i32 : i32, i32
  }
}

</mosaic_0001>

<bundles_post_ra>
// kernel: net_forward.1
= control target key start
LH: loop header
LB: loop body
LE: loop exit
PB: predicated region body
PF: predicated region fallthrough
CT: control target
= control target key end

     0   :  { %17 = vsyncpa [#allocation6], 0  ;;  %s4199_s21 = smov 0   ;;  %s6025_s0 = inlined_call_operand.vmem [shape: bf16[2,4,3,384], index: 0, kind: input, shape index: {}]   ;;  %s6026_s1 = inlined_call_operand.vmem [shape: bf16[6,75], index: 1, kind: input, shape index: {}]   ;;  %s6027_s2 = inlined_call_operand.vmem [shape: f32[6,1], index: 2, kind: input, shape index: {}]   ;;  %s6028_s3 = inlined_call_operand.vmem [shape: bf16[16,150], index: 3, kind: input, shape index: {}]   ;;  %s6029_s4 = inlined_call_operand.vmem [shape: f32[16,1], index: 4, kind: input, shape index: {}]   ;;  %s6030_s5 = inlined_call_operand.vmem [shape: bf16[160,128], index: 5, kind: input, shape index: {}]   ;;  %s6031_s6 = inlined_call_operand.vmem [shape: bf16[512,120], index: 6, kind: input, shape index: {}]   ;;  %s6032_s7 = inlined_call_operand.vmem [shape: f32[1,120], index: 7, kind: input, shape index: {}]   ;;  %s6033_s8 = inlined_call_operand.vmem [shape: bf16[120,84], index: 8, kind: input, shape index: {}]   ;;  %s6034_s9 = inlined_call_operand.vmem [shape: f32[1,84], index: 9, kind: input, shape index: {}]   ;;  %s6035_s10 = inlined_call_operand.vmem [shape: bf16[84,128], index: 10, kind: input, shape index: {}]   ;;  %s6036_s11 = inlined_call_operand.vmem [shape: f32[1,128], index: 11, kind: input, shape index: {}]   ;;  %s6037_s12 = inlined_call_operand.hbm [shape: f32[2,128], index: 12, kind: output, shape index: {}]  }
   0x1 LB: > { %s3212_s22 = smul.u32 24, %s4095_s21  ;;  %vm6078_vm0 = vcmask 911360   ;;  %s4097_s26 = smov 126   ;;  %vm6052_vm1 = vcmask 916487   ;;  %vm6051_vm2 = vcmask 910336   ;;  %vm6055_vm3 = vcmask 914435   ;;  %s4095_s21 = sphi %s4199_s21, %s48_s21  }
   0x2   : > { %s4098_s27 = smov 127   ;;  %s4099_s28 = smov 112   ;;  %vm6053_vm4 = vcmask 913410   ;;  %vm6084_vm5 = vcmask 1031168   ;;  %vm6054_vm6 = vcmask 915460   ;;  %vm6061_vm7 = vcmask 1043328  }
   0x3   : > { %s4208_s25 = scalar_lea.vmem %s6025_s0, %s3212_s22  ;;  %s4100_s29 = smov 111   ;;  %vm6057_vm8 = vcmask 1048455   ;;  %vm6056_vm9 = vcmask 1042304   ;;  %vm6060_vm10 = vcmask 1046403   ;;  %vm6089_vm11 = vcmask 916480  }
   0x4   : > { %v4211_v0 = vld [vmem:[%s4208_s25] sm:$0x3f]  ;;  %v4214_v1 = vld [vmem:[%s4208_s25 + $0x6] sm:$0x3f]  ;;  %v4217_v2 = vld [vmem:[%s4208_s25 + $0x12] sm:$0x3f] }
   0x5   : > { %v4220_v3 = vunpack.c.l.bf16 %v4211_v0  ;;  %v4223_v4 = vunpack.c.l.bf16 %v4214_v1  ;;  %v4226_v5 = vunpack.c.l.bf16 %v4217_v2  ;;  %v4290_v27 = vld [vmem:[%s4208_s25 + $0xc] sm:$0x3f]  ;;  %s4101_s30 = smov 110   ;;  %s4102_s13 = smov 96   ;;  %v4381_v57 = vunpack.c.h.bf16 %v4214_v1 }
   0x6   : > { %v4293_v28 = vunpack.c.l.bf16 %v4290_v27  ;;  %s4103_s14 = smov 94   ;;  %s4104_s15 = smov 95   ;;  %vm6085_vm12 = vcmask 780288   ;;  %vm6059_vm13 = vcmask 785415   ;;  %vm6058_vm14 = vcmask 779264  }
   0x7   : > { %v107_v6 = vcombine.low %v4220_v3, %v4220_v3  ;;  %67 = vst [vmem:[#allocation2] sm:$0x7] %v4220_v3  ;;  %v79_v7 = vrot.slane %v4220_v3, 2  ;;  %v95_v8 = vrot.slane %v4223_v4, 7  ;;  %v452_v9 = vrot.slane %v4226_v5, 1  ;;  %s4105_s16 = smov 80  }
   0x8   : > { %v388_v10 = vrot.slane %v4220_v3, 5  ;;  %v403_v11 = vrot.slane %v4223_v4, 2  ;;  %v4238_v12 = vcombine.high %v4223_v4, %v4223_v4  ;;  %v4242_v13 = vcombine.high %v4226_v5, %v4226_v5  ;;  %s4106_s17 = smov 78   ;;  %s4107_s18 = smov 79  }
   0x9   : > { %v3354_v14 = vpack.i.bf16 %v107_v6, %v4220_v3  ;;  %v4249_v15 = vpack.i.bf16 %v95_v8, %v79_v7  ;;  %v4253_v16 = vcombine.high %v4220_v3, %v4220_v3  ;;  %v3364_v17 = vpack.i.bf16 %v452_v9, %v4223_v4  ;;  %s4108_s19 = smov 64   ;;  %s4109_s20 = smov 63  }
   0xa   : > { %v4265_v18 = vpack.i.bf16 %v403_v11, %v388_v10  ;;  %v6039_v19 = vrot.slane %v4242_v13, 1  ;;  %v4272_v21 = vrot.slane %v4238_v12, 7  ;;  %v4277_v22 = vrot.slane %v4238_v12, 2  ;;  %s6145_s22 = smov 62   ;;  %s4112_s23 = smov 48  }
   0xb   : > { %3355 = vrot.lane.b32.xlu0 %v3354_v14, %s4097_s26  ;;  %3360 = vrot.lane.b32.xlu1 %v4249_v15, %s4098_s27  ;;  %v4269_v20 = vrot.slane %v4253_v16, 2  ;;  %69 = vst.msk [vmem:[#allocation2 + $0x8] sm:$0x7] %vm6078_vm0, %v4253_v16  ;;  %v6043_v25 = vrot.slane %v4253_v16, 5  ;;  %v424_v26 = vrot.slane %v4253_v16, 7  ;;  %v513_v29 = vrot.slane %v4226_v5, 5 }
   0xc   : > { %v3379_v23 = vpack.i.bf16 %v6039_v19, %v4238_v12  ;;  %v6044_v30 = vrot.slane %v4220_v3, 7  ;;  %v4299_v31 = vcombine.low %v4223_v4, %v4223_v4  ;;  %v4318_v36 = vrot.slane %v4253_v16, 1  ;;  %s4113_s24 = smov 47   ;;  %s4114_s25 = smov 46  }
   0xd   : > { %v3374_v24 = vpack.i.bf16 %v4272_v21, %v4269_v20  ;;  %v3384_v32 = vpack.i.bf16 %v4277_v22, %v6043_v25  ;;  %v3389_v33 = vpack.i.bf16 %v4223_v4, %v424_v26  ;;  %v4310_v34 = vpack.i.bf16 %v513_v29, %v4293_v28 }
   0xe   : > { %v4315_v35 = vpack.i.bf16 %v4299_v31, %v6044_v30  ;;  %v820_v37 = vcombine.low %v4293_v28, %v4293_v28  ;;  %v6046_v38 = vrot.slane %v4293_v28, 2  ;;  %v6045_v39 = vrot.slane %v4226_v5, 7 }
   0xf   : > { %3365 = vrot.lane.b32.xlu0 %v3364_v17, %s4099_s28  ;;  %3370 = vrot.lane.b32.xlu1 %v4265_v18, %s4100_s29  ;;  %v4328_v40 = vcombine.high %v4293_v28, %v4293_v28  ;;  %v4331_v41 = vrot.slane %v4220_v3, 1  ;;  %v209_v42 = vrot.slane %v4223_v4, 1  ;;  %v4349_v46 = vrot.slane %v4223_v4, 6 }
  0x10   : > { %v3409_v43 = vpack.i.bf16 %v4318_v36, %v820_v37  ;;  %v4343_v44 = vpack.i.bf16 %v6045_v39, %v6046_v38  ;;  %v4363_v50 = vrot.slane %v4293_v28, 5  ;;  %v3429_v52 = vpack.i.bf16 %v79_v7, %v4269_v20 }
  0x11   : > { %v4346_v45 = vrot.slane %v4328_v40, 3  ;;  %v4353_v47 = vpack.i.bf16 %v209_v42, %v107_v6  ;;  %v3414_v49 = vpack.i.bf16 %v4349_v46, %v4331_v41  ;;  %v4366_v51 = vrot.slane %v4328_v40, 5 }
  0x12   : > { %v6048_v53 = vrot.slane %v4242_v13, 5  ;;  %v6040_v55 = vrot.slane %v4328_v40, 6  ;;  %v4378_v56 = vrot.slane %v4242_v13, 3  ;;  %v4384_v58 = vrot.slane %v4328_v40, 1 }
  0x13   : > { %3380 = vrot.lane.b32.xlu1 %v3379_v23, %s4099_s28  ;;  %3375 = vrot.lane.b32.xlu0 %v3374_v24, %s4098_s27  ;;  %v3419_v48 = vpack.i.bf16 %v4242_v13, %v4346_v45  ;;  %v3424_v54 = vpack.i.bf16 %v4363_v50, %v4366_v51  ;;  %v6050_v62 = vrot.slane %v4293_v28, 3  ;;  %v592_v63 = vrot.slane %v4381_v57, 6 }
  0x14   : > { %v4393_v60 = vpack.i.bf16 %v6048_v53, %v4328_v40  ;;  %v3434_v61 = vpack.i.bf16 %v4378_v56, %v6040_v55  ;;  %127 = vst.msk [vmem:[#allocation2 + $0x48] sm:$0x80] %vm6052_vm1, %v4384_v58  ;;  %v3444_v6 = vpack.i.bf16 %v403_v11, %v4277_v22  ;;  %v472_v14 = vrot.slane %v4293_v28, 6 }
  0x15   : > { %130 = vst.msk [vmem:[#allocation2 + $0x88] sm:$0x3] %vm6051_vm2, %v4384_v58  ;;  %v4407_v1 = vpack.i.bf16 %v4349_v46, %v592_v63  ;;  %v4418_v7 = vpack.i.bf16 %v4226_v5, %v6050_v62  ;;  %v487_v17 = vrot.slane %v4226_v5, 3  ;;  %v731_v23 = vrot.slane %v4220_v3, 3 }
  0x16   : > { %v4425_v24 = vpack.i.bf16 %v452_v9, %v820_v37  ;;  %v4428_v11 = vunpack.c.h.bf16 %v4211_v0  ;;  %v6049_v29 = vrot.slane %v4220_v3, 6  ;;  %v4443_v0 = vrot.slane %v4328_v40, 7 }
  0x17   : > { %3385 = vrot.lane.b32.xlu1 %v3384_v32, %s4100_s29  ;;  %3390 = vrot.lane.b32.xlu0 %v3389_v33, %s4101_s30  ;;  %v4432_v32 = vpack.i.bf16 %v4223_v4, %v731_v23  ;;  %v6038_v33 = vrot.slane %v4223_v4, 3  ;;  %v4440_v9 = vpack.i.bf16 %v487_v17, %v472_v14  ;;  %v4446_v37 = vrot.slane %v4293_v28, 7 }
  0x18   : > { %v4485_v19 = vrot.slane %v4242_v13, 6  ;;  %v227_v55 = vrot.slane %v4253_v16, 6  ;;  %v4500_v23 = vrot.slane %v4226_v5, 6  ;;  %v211_v30 = vrot.slane %v4381_v57, 1 }
  0x19   : > { %v276_v25 = vrot.slane %v4242_v13, 2  ;;  %v6047_v59 = vrot.slane %v4226_v5, 2  ;;  %v3509_v39 = vpack.i.bf16 %v4331_v41, %v592_v63  ;;  %v3519_v53 = vpack.i.bf16 %v487_v17, %v4378_v56 }
  0x1a   : > { %139 = vst.msk [vmem:[#allocation2 + $0x88] sm:$0x1c] %vm6053_vm4, %v4485_v19  ;;  %137 = vst [vmem:[#allocation2 + $0x80] sm:$0x1c] %v4500_v23  ;;  %v3514_v63 = vpack.i.bf16 %v4346_v45, %v4272_v21  ;;  %v348_v17 = vrot.slane %v4238_v12, 3  ;;  %vm6066_vm15 = vcmask 1039360  }
  0x1b   : > { %3400 = vrot.lane.b32.xlu1 %v4310_v34, %s4102_s13  ;;  %3395 = vrot.lane.b32.xlu0 %v4315_v35, %s4101_s30  ;;  %vm6088_vm2 = vcmask 916486   ;;  %vm6087_vm1 = vcmask 909312   ;;  %vm6062_vm4 = vcmask 912385  }
  0x1f   : > { %3410 = vrot.lane.b32.xlu1 %v3409_v43, %s4103_s14  ;;  %3405 = vrot.lane.b32.xlu0 %v4343_v44, %s4104_s15  ;;  %v4452_v43 = vpack.i.bf16 %v6038_v33, %v6049_v29  ;;  %v4481_v33 = vrot.slane %v4328_v40, 2 }
  0x23   : > { %3420 = vrot.lane.b32.xlu1 %v3419_v48, %s4098_s27  ;;  %3415 = vrot.lane.b32.xlu0 %v3414_v49, %s4105_s16  ;;  %v6042_v48 = vrot.slane %v4238_v12, 5  ;;  %v6041_v49 = vrot.slane %v4223_v4, 5 }
  0x25   : > { %78 = vst.msk [vmem:[#allocation2 + $0x8] sm:$0x38] %vm6055_vm3, %v6042_v48  ;;  %76 = vst [vmem:[#allocation2] sm:$0x38] %v6041_v49  ;;  %v228_v49 = vrot.slane %v4428_v11, 6  ;;  %vm6063_vm3 = vcmask 1041280  }
  0x27   : > { %3430 = vrot.lane.b32.xlu1 %v3429_v52, %s4099_s28  ;;  %3425 = vrot.lane.b32.xlu0 %v3424_v54, %s4097_s26  ;;  %v3469_v52 = vpack.i.bf16 %v472_v14, %v388_v10  ;;  %v194_v54 = vcombine.low %v4428_v11, %v4428_v11  ;;  %v4478_v14 = vrot.slane %v4238_v12, 6  ;;  %v4497_v10 = vpack.i.bf16 %v228_v49, %v227_v55 }
  0x28   : > { %v555_v49 = vcombine.low %v4381_v57, %v4381_v57 }
  0x2b   : > { %3440 = vrot.lane.b32.xlu1 %v4393_v60, %s4101_s30  ;;  %3435 = vrot.lane.b32.xlu0 %v3434_v61, %s4100_s29  ;;  %v4461_v61 = vrot.slane %v4293_v28, 1 }
  0x2d   : > { %125 = vst [vmem:[#allocation2 + $0x80] ss:$-60 sps:$4 sm:$0x83] %v4461_v61  }
  0x2f   : > { %3450 = vrot.lane.b32.xlu1 %v4418_v7, %s4098_s27  ;;  %3445 = vrot.lane.b32.xlu0 %v3444_v6, %s4102_s13  ;;  %v210_v6 = vrot.slane %v4238_v12, 1 }
  0x31   : > { %v4491_v48 = vpack.i.bf16 %v210_v6, %v209_v42  ;;  %v3479_v42 = vpack.i.bf16 %v194_v54, %v4220_v3  ;;  %v3484_v55 = vpack.i.bf16 %v211_v30, %v210_v6  ;;  %v4518_v54 = vpack.i.bf16 %v276_v25, %v6047_v59 }
  0x32   : > { %v3499_v30 = vpack.i.bf16 %v555_v49, %v4223_v4  ;;  %v572_v6 = vrot.slane %v4428_v11, 1  ;;  %v732_v59 = vrot.slane %v4253_v16, 3  ;;  %v733_v49 = vrot.slane %v4428_v11, 3 }
  0x33   : > { %3460 = vrot.lane.b32.xlu1 %v4310_v34, %s4101_s30  ;;  %3455 = vrot.lane.b32.xlu0 %v4440_v9, %s4100_s29 }
  0x34   : > { %v3504_v38 = vpack.i.bf16 %v4478_v14, %v572_v6 }
  0x37   : > { %3470 = vrot.lane.b32.xlu1 %v3469_v52, %s4106_s17  ;;  %3465 = vrot.lane.b32.xlu0 %v4432_v32, %s4107_s18  ;;  %v540_v52 = vrot.slane %v4428_v11, 7 }
  0x3b   : > { %3480 = vrot.lane.b32.xlu1 %v3479_v42, %s4100_s29  ;;  %3475 = vrot.lane.b32.xlu0 %v4343_v44, %s4105_s16  ;;  %v4526_v44 = vpack.i.bf16 %v540_v52, %v424_v26  ;;  %v4539_v26 = vunpack.c.h.bf16 %v4290_v27  ;;  %v4541_v52 = vpack.i.bf16 %v733_v49, %v732_v59  ;;  %v6147_v27 = vrot.slane %v4293_v28, 3 }
  0x3d   : > { %v294_v29 = vrot.slane %v4539_v26, 7 }
  0x3f   : > { %3490 = vrot.lane.b32.xlu1 %v4497_v10, %s4101_s30  ;;  %3485 = vrot.lane.b32.xlu0 %v3484_v55, %s4100_s29  ;;  %v4552_v62 = vpack.i.bf16 %v294_v29, %v4443_v0 }
  0x43   : > { %3500 = vrot.lane.b32.xlu1 %v3499_v30, %s4104_s15  ;;  %3495 = vrot.lane.b32.xlu0 %v4526_v44, %s4104_s15 }
  0x47   : > { %3510 = vrot.lane.b32.xlu1 %v3509_v39, %s4103_s14  ;;  %3505 = vrot.lane.b32.xlu0 %v3504_v38, %s4103_s14  ;;  %v3524_v38 = vpack.i.bf16 %v6147_v27, %v95_v8  ;;  %v6148_v39 = vrot.slane %v4220_v3, 6  ;;  %v3544_v8 = vpack.i.bf16 %v4481_v33, %v4349_v46  ;;  %v4577_v27 = vunpack.c.h.bf16 %v4217_v2 }
  0x49   : > { %v3534_v59 = vpack.i.bf16 %v4443_v0, %v6148_v39  ;;  %v277_v39 = vrot.slane %v4577_v27, 2  ;;  %v632_v2 = vrot.slane %v4577_v27, 5 }
  0x4b   : > { %3520 = vrot.lane.b32.xlu1 %v3519_v53, %s4102_s13  ;;  %3515 = vrot.lane.b32.xlu0 %v3514_v63, %s4099_s28  ;;  %v349_v53 = vrot.slane %v4381_v57, 3  ;;  %v261_v63 = vrot.slane %v4539_v26, 5  ;;  %v3564_v46 = vpack.i.bf16 %v277_v39, %v276_v25  ;;  %v649_v25 = vrot.slane %v4539_v26, 2 }
  0x4d   : > { %v4568_v49 = vpack.i.bf16 %v349_v53, %v348_v17  ;;  %v6149_v17 = vrot.slane %v4242_v13, 5 }
  0x4f   : > { %3530 = vrot.lane.b32.xlu1 %v4353_v47, %s4100_s29  ;;  %3525 = vrot.lane.b32.xlu0 %v3524_v38, %s4099_s28  ;;  %v3559_v38 = vpack.i.bf16 %v261_v63, %v4366_v51  ;;  %v3589_v53 = vpack.i.bf16 %v632_v2, %v6149_v17 }
  0x53   : > { %3540 = vrot.lane.b32.xlu1 %v4315_v35, %s4104_s15  ;;  %3535 = vrot.lane.b32.xlu0 %v3534_v59, %s4101_s30  ;;  %v3569_v35 = vpack.i.bf16 %v4446_v37, %v294_v29  ;;  %v4593_v59 = vpack.i.bf16 %v4539_v26, %v4328_v40  ;;  %v669_v29 = vrot.slane %v4577_v27, 7 }
  0x55   : > { %v3599_v63 = vpack.i.bf16 %v4253_v16, %v669_v29 }
  0x57   : > { %3550 = vrot.lane.b32.xlu1 %v4425_v24, %s4107_s18  ;;  %3545 = vrot.lane.b32.xlu0 %v3544_v8, %s4103_s14  ;;  %v4602_v8 = vrot.slane %v4242_v13, 7 }
  0x5b   : > { %3560 = vrot.lane.b32.xlu1 %v3559_v38, %s4100_s29  ;;  %3555 = vrot.lane.b32.xlu0 %v4432_v32, %s4108_s19  ;;  %v6150_v38 = vrot.slane %v4226_v5, 2 }
  0x5d   : > { %v3619_v39 = vpack.i.bf16 %v6150_v38, %v4363_v50 }
  0x5f   : > { %3570 = vrot.lane.b32.xlu1 %v3569_v35, %s4101_s30  ;;  %3565 = vrot.lane.b32.xlu0 %v3564_v46, %s4100_s29  ;;  %v3614_v35 = vpack.i.bf16 %v4226_v5, %v4242_v13  ;;  %v6152_v46 = vrot.slane %v4226_v5, 7 }
  0x61   : > { %v3649_v2 = vpack.i.bf16 %v4220_v3, %v6152_v46 }
  0x63   : > { %3580 = vrot.lane.b32.xlu1 %v3484_v55, %s4102_s13  ;;  %3575 = vrot.lane.b32.xlu0 %v3479_v42, %s4102_s13  ;;  %v3594_v55 = vpack.i.bf16 %v4602_v8, %v649_v25  ;;  %v3609_v42 = vpack.i.bf16 %v572_v6, %v4318_v36 }
  0x67   : > { %3590 = vrot.lane.b32.xlu1 %v3589_v53, %s4104_s15  ;;  %3585 = vrot.lane.b32.xlu0 %v4593_v59, %s4104_s15 }
  0x6b   : > { %3600 = vrot.lane.b32.xlu1 %v3599_v63, %s4103_s14  ;;  %3595 = vrot.lane.b32.xlu0 %v3594_v55, %s4103_s14 }
  0x6f   : > { %3610 = vrot.lane.b32.xlu1 %v3609_v42, %s4107_s18  ;;  %3605 = vrot.lane.b32.xlu0 %v3499_v30, %s4105_s16  ;;  %v6151_v30 = vrot.slane %v4293_v28, 2 }
  0x71   : > { %v3639_v6 = vpack.i.bf16 %v6151_v30, %v4428_v11 }
  0x73   : > { %3620 = vrot.lane.b32.xlu1 %v3619_v39, %s4100_s29  ;;  %3615 = vrot.lane.b32.xlu0 %v3614_v35, %s4099_s28 }
  0x77   : > { %3630 = vrot.lane.b32.xlu1 %v4497_v10, %s4104_s15  ;;  %3625 = vrot.lane.b32.xlu0 %v4353_v47, %s4102_s13  ;;  %v3659_v47 = vpack.i.bf16 %v4478_v14, %v4331_v41 }
  0x7b   : > { %3640 = vrot.lane.b32.xlu1 %v3639_v6, %s4103_s14  ;;  %3635 = vrot.lane.b32.xlu0 %v4568_v49, %s4104_s15 }
  0x7d   : > { %v3356_v17 = vpop.permute.xlu0 %3355  ;;  %v3361_v53 = vpop.permute.xlu1 %3360 }
  0x7e   : > { %v3358_v29 = vunpack.i.h.bf16 %v3356_v17  ;;  %v3357_v25 = vunpack.i.l.bf16 %v3356_v17  ;;  %v3363_v41 = vunpack.i.h.bf16 %v3361_v53 }
  0x7f   : > { %3650 = vrot.lane.b32.xlu1 %v3649_v2, %s4103_s14  ;;  %3645 = vrot.lane.b32.xlu0 %v4310_v34, %s4104_s15  ;;  %v6153_v34 = vpack.i.bf16 %v4318_v36, %v4299_v31  ;;  %v3362_v31 = vunpack.i.l.bf16 %v3361_v53  ;;  %v4662_v53 = vpack.i.bf16 %v4381_v57, %v4238_v12 }
  0x80   : > { %v113_v63 = vsel %vm6084_vm5, %v3358_v29, %v3357_v25  ;;  %118 = vst.msk [vmem:[#allocation2 + $0x48] sm:$0x70] %vm6054_vm6, %v3357_v25  ;;  %vm6064_vm6 = vcmask 1048454  }
  0x81   : > { %116 = vst [vmem:[#allocation2 + $0x40] sm:$0x70] %v113_v63  ;;  %v3366_v55 = vpop.permute.xlu0 %3365  ;;  %v4641_v42 = vpop.permute.xlu1 %3370 }
  0x82   : > { %v3368_v38 = vunpack.i.h.bf16 %v3366_v55  ;;  %v3367_v39 = vunpack.i.l.bf16 %v3366_v55  ;;  %v3372_v35 = vunpack.i.l.bf16 %v4641_v42  ;;  %v3373_v29 = vunpack.i.h.bf16 %v4641_v42 }
  0x83   : > { %3660 = vrot.lane.b32.xlu1 %v3659_v47, %s4107_s18  ;;  %3655 = vrot.lane.b32.xlu0 %v6153_v34, %s4105_s16 }
  0x84   : > { %463 = vst.msk [vmem:[#allocation2 + $0x48] sm:$0x80] %vm6057_vm8, %v3368_v38  ;;  %vm6086_vm8 = vcmask 783363  }
  0x85   : > { %468 = vst.msk [vmem:[#allocation2 + $0x88] sm:$0x3] %vm6056_vm9, %v3368_v38  ;;  %v3381_v36 = vpop.permute.xlu1 %3380  ;;  %v3376_v30 = vpop.permute.xlu0 %3375  ;;  %vm6069_vm9 = vcmask 908288  }
  0x86   : > { %384 = vst.msk [vmem:[#allocation2 + $0x8] sm:$0x7] %vm6061_vm7, %v3367_v39  ;;  %v3383_v6 = vunpack.i.h.bf16 %v3381_v36  ;;  %v3382_v46 = vunpack.i.l.bf16 %v3381_v36  ;;  %v3378_v2 = vunpack.i.h.bf16 %v3376_v30  ;;  %v3377_v17 = vunpack.i.l.bf16 %v3376_v30 }
  0x87   : > { %399 = vst.msk [vmem:[#allocation2 + $0x8] sm:$0x38] %vm6060_vm10, %v3372_v35  ;;  %3670 = vrot.lane.b32.xlu1 %v4541_v52, %s4106_s17  ;;  %3665 = vrot.lane.b32.xlu0 %v4407_v1, %s4107_s18  ;;  %vm6067_vm10 = vcmask 781313   ;;  %vm6068_vm7 = vcmask 784388   ;;  %v6154_v36 = vrot.slane %v4220_v3, 7 }
  0x88   : > { %v458_v25 = vsel %vm6089_vm11, %v3368_v38, %v3383_v6  ;;  %466 = vst.msk [vmem:[#allocation2 + $0x58] sm:$0x80] %vm6059_vm13, %v3383_v6  ;;  %v379_v47 = vsel %vm6089_vm11, %v3367_v39, %v3382_v46  ;;  %v101_v63 = vsel %vm6066_vm15, %v3363_v41, %v3378_v2  ;;  %v86_v1 = vsel %vm6066_vm15, %v3362_v31, %v3377_v17 }
  0x89   : > { %471 = vst.msk [vmem:[#allocation2 + $0x98] sm:$0x3] %vm6058_vm14, %v3383_v6  ;;  %464 = vst [vmem:[#allocation2 + $0x90] ss:$-60 sps:$4 sm:$0x83] %v458_v25   ;;  %vm6065_vm14 = vcmask 785414   ;;  %v3386_v55 = vpop.permute.xlu1 %3385  ;;  %v3391_v38 = vpop.permute.xlu0 %3390  ;;  %v3684_v30 = vpack.i.bf16 %v4293_v28, %v6154_v36 }
  0x8a   : > { %387 = vst.msk [vmem:[#allocation2 + $0x18] sm:$0x7] %vm6085_vm12, %v3382_v46  ;;  %385 = vst [vmem:[#allocation2 + $0x10] sm:$0x7] %v379_v47  ;;  %vm421_vm13 = vcmask 778240   ;;  %v3388_v39 = vunpack.i.h.bf16 %v3386_v55  ;;  %v3387_v34 = vunpack.i.l.bf16 %v3386_v55  ;;  %v3393_v41 = vunpack.i.h.bf16 %v3391_v38 }
  0x8b   : > { %106 = vst.msk [vmem:[#allocation2 + $0x48] sm:$0xe] %vm6062_vm4, %v3378_v2  ;;  %104 = vst [vmem:[#allocation2 + $0x40] sm:$0xe] %v101_v63  ;;  %v3392_v31 = vunpack.i.l.bf16 %v3391_v38  ;;  %3680 = vrot.lane.b32.xlu1 %v4265_v18, %s4109_s20  ;;  %3675 = vrot.lane.b32.xlu0 %v4662_v53, %s4106_s17  ;;  %vm6070_vm4 = vcmask 1043200   ;;  %vm6071_vm15 = vcmask 1047428  }
  0x8c   : > { %91 = vst.msk [vmem:[#allocation2 + $0x8] sm:$0xc0] %vm6088_vm2, %v3377_v17  ;;  %89 = vst [vmem:[#allocation2 + $0x40] ss:$-60 sps:$4 sm:$0xc1] %v86_v1   ;;  %v409_v6 = vsel %vm6069_vm9, %v3373_v29, %v3388_v39  ;;  %v394_v46 = vsel %vm6069_vm9, %v3372_v35, %v3387_v34  ;;  %vm6093_vm9 = vcmask 1041152  }
  0x8d   : > { %94 = vst.msk [vmem:[#allocation2 + $0x48] sm:$0x1] %vm6087_vm1, %v3377_v17  ;;  %415 = vst [vmem:[#allocation2 + $0x50] ss:$-60 sps:$4 sm:$0xc1] %v409_v6   ;;  %v4692_v18 = vpop.permute.xlu1 %3400  ;;  %v3396_v2 = vpop.permute.xlu0 %3395 }
  0x8e   : > { %414 = vst.msk [vmem:[#allocation2 + $0x8] sm:$0xc0] %vm6064_vm6, %v3373_v29  ;;  %400 = vst [vmem:[#allocation2 + $0x10] sm:$0x38] %v394_v46  ;;  %vm6113_vm6 = vcmask 900096   ;;  %v6077_v42 = vunpack.i.h.bf16 %v4692_v18  ;;  %v6076_v35 = vunpack.i.l.bf16 %v4692_v18  ;;  %v3398_v17 = vunpack.i.h.bf16 %v3396_v2 }
  0x8f   : > { %419 = vst.msk [vmem:[#allocation2 + $0x48] sm:$0x1] %vm6063_vm3, %v3373_v29  ;;  %vm6073_vm3 = vcmask 1046275   ;;  %v3397_v29 = vunpack.i.l.bf16 %v3396_v2  ;;  %3690 = vrot.lane.b32.xlu1 %v4425_v24, %s4108_s19  ;;  %3685 = vrot.lane.b32.xlu0 %v3684_v30, %s6145_s22  ;;  %v3714_v2 = vpack.i.bf16 %v4602_v8, %v4481_v33 }
  0x90   : > { %417 = vst.msk [vmem:[#allocation2 + $0x18] sm:$0xc0] %vm6065_vm14, %v3388_v39  ;;  %vm6072_vm14 = vcmask 1044353   ;;  %v443_v47 = vsel %vm6113_vm6, %v3398_v17, %v3393_v41 }
  0x91   : > { %422 = vst.msk [vmem:[#allocation2 + $0x58] sm:$0x1] %vm421_vm13, %v3388_v39  ;;  %v429_v25 = vsel %vm6113_vm6, %v3397_v29, %v3392_v31  ;;  %449 = vst [vmem:[#allocation2 + $0x50] sm:$0x70] %v443_v47  ;;  %v4709_v24 = vpop.permute.xlu1 %3410  ;;  %v4711_v63 = vpop.permute.xlu0 %3405 }
  0x92   : > { %402 = vst.msk [vmem:[#allocation2 + $0x18] sm:$0x38] %vm6086_vm8, %v3387_v34  ;;  %435 = vst [vmem:[#allocation2 + $0x50] sm:$0xe] %v429_v25  ;;  %v6075_v1 = vunpack.i.l.bf16 %v4709_v24  ;;  %v6074_v55 = vunpack.i.h.bf16 %v4711_v63  ;;  %v4716_v38 = vunpack.i.l.bf16 %v4711_v63 }
  0x93   : > { %451 = vst.msk [vmem:[#allocation2 + $0x58] sm:$0x70] %vm6068_vm7, %v3393_v41  ;;  %vm6094_vm7 = vcmask 1048326   ;;  %3700 = vrot.lane.b32.xlu1 %v4432_v32, %s4106_s17  ;;  %3695 = vrot.lane.b32.xlu0 %v4452_v43, %s4104_s15  ;;  %v1513_v36 = vld [vmem:[#allocation2] sm:$0xff] }
  0x94   : > { %437 = vst.msk [vmem:[#allocation2 + $0x58] sm:$0xe] %vm6067_vm10, %v3392_v31  ;;  %vm6081_vm10 = vcmask 1047300   ;;  %v1521_v30 = vld [vmem:[#allocation2 + $0x40] sm:$0xff] }
  0x95   : > { %772 = vst.msk [vmem:[#allocation2 + $0x18] sm:$0x7] %vm6070_vm4, %v6076_v35  ;;  %vm6106_vm4 = vcmask 1044225   ;;  %v4732_v39 = vpop.permute.xlu1 %3420  ;;  %v4734_v32 = vpop.permute.xlu0 %3415  ;;  %v1514_v6 = vld [vmem:[#allocation2 + $0x8] sm:$0xff]  ;;  %v3719_v35 = vpack.i.bf16 %v4242_v13, %v4226_v5 }
  0x96   : > { %785 = vst.msk [vmem:[#allocation2 + $0x18] sm:$0x38] %vm6073_vm3, %v6077_v42  ;;  %vm6079_vm3 = vcmask 1042176   ;;  %6155 = vst [vmem:[#allocation8_spill] sm:$0xff] %v4734_v32  ;;  %v6083_v34 = vunpack.i.h.bf16 %v4732_v39  ;;  %v6082_v41 = vunpack.i.l.bf16 %v4732_v39  ;;  %v4739_v31 = vunpack.i.l.bf16 %v4734_v32 }
  0x97   : > { %448 = vst.msk [vmem:[#allocation2 + $0x48] sm:$0x70] %vm6071_vm15, %v3398_v17  ;;  %vm150_vm15 = vcmask 916485   ;;  %3710 = vrot.lane.b32.xlu1 %v4393_v60, %s4102_s13  ;;  %3705 = vrot.lane.b32.xlu0 %v4440_v9, %s4109_s20 }
  0x98   : > { %434 = vst.msk [vmem:[#allocation2 + $0x48] sm:$0xe] %vm6072_vm14, %v3397_v29  ;;  %vm6080_vm14 = vcmask 1048327   ;;  %v1593_v29 = vpack.c.bf16 %v1521_v30, %v1513_v36 }
  0x99   : > { %830 = vst.msk [vmem:[#allocation2 + $0x58] sm:$0x70] %vm6081_vm10, %v6075_v1  ;;  %v3431_v9 = vpop.permute.xlu1 %3430  ;;  %v3426_v17 = vpop.permute.xlu0 %3425  ;;  %vm860_vm10 = vcmask 1045250  }
  0x9a   : > { %798 = vst.msk [vmem:[#allocation2 + $0x18] sm:$0xc0] %vm6094_vm7, %v4716_v38  ;;  %v3433_v25 = vunpack.i.h.bf16 %v3431_v9  ;;  %v3432_v47 = vunpack.i.l.bf16 %v3431_v9  ;;  %v3427_v1 = vunpack.i.l.bf16 %v3426_v17 }
  0x9b   : > { %803 = vst.msk [vmem:[#allocation2 + $0x58] sm:$0x1] %vm6093_vm9, %v4716_v38  ;;  %823 = vrot.lane.b32.xlu1 %v4293_v28, %s4103_s14  ;;  %3715 = vrot.lane.b32.xlu0 %v3714_v2, %s4104_s15 }
  0x9c   : > { %816 = vst.msk [vmem:[#allocation2 + $0x58] sm:$0xe] %vm6106_vm4, %v6074_v55  ;;  %v3428_v55 = vunpack.i.h.bf16 %v3426_v17  ;;  %v177_v42 = vsel %vm6089_vm11, %v3433_v25, %v3432_v47  ;;  %v1523_v17 = vld [vmem:[#allocation2 + $0x50] sm:$0xff]  ;;  %v6091_v25 = vunpack.i.h.bf16 %v4734_v32  ;;  %vm497_vm11 = vcmask 1048453  }
  0x9d   : > { %160 = vst.msk [vmem:[#allocation2 + $0xc8] sm:$0x7] %vm6078_vm0, %v6083_v34  ;;  %vm6156_vm0 = vcmask 914435   ;;  %180 = vst [vmem:[#allocation2 + $0x100] ss:$-60 sps:$4 sm:$0xc1] %v177_v42   ;;  %v3441_v30 = vpop.permute.xlu1 %3440  ;;  %v6158_v34 = vpack.i.bf16 %v4443_v0, %v4446_v37  ;;  %v3413_v32 = vunpack.i.h.bf16 %v4709_v24 }
  0x9e   : > { %151 = vst.msk [vmem:[#allocation2 + $0x88] sm:$0xe0] %vm150_vm15, %v6082_v41  ;;  %v167_v36 = vsel %vm6084_vm5, %v3428_v55, %v3427_v1  ;;  %v3442_v2 = vunpack.i.l.bf16 %v3441_v30  ;;  %v6157_v55 = vpack.i.bf16 %v4366_v51, %v4363_v50  ;;  %vm6160_vm5 = vcmask 1039360  }
  0x9f   : > { %v1522_v46 = vld [vmem:[#allocation2 + $0x48] sm:$0xff]  ;;  %843 = vst.msk [vmem:[#allocation2 + $0x58] sm:$0x80] %vm6080_vm14, %v4739_v31  ;;  %170 = vst [vmem:[#allocation2 + $0xc0] sm:$0x38] %v167_v36  ;;  %vm500_vm14 = vcmask 785413   ;;  %3720 = vrot.lane.b32.xlu0 %v3719_v35, %s4105_s16 }
  0xa0   : > { %848 = vst.msk [vmem:[#allocation2 + $0x98] sm:$0x3] %vm6079_vm3, %v4739_v31  ;;  %v1594_v60 = vpack.c.bf16 %v1522_v46, %v1514_v6  ;;  %vm485_vm3 = vcmask 782338   ;;  %v3436_v6 = vpop.permute.xlu0 %3435  ;;  %v3443_v46 = vunpack.i.h.bf16 %v3441_v30  ;;  %3725 = vrot.lane.b32.xlu1 %v6157_v55, %s4107_s18  ;;  %v1515_v36 = vld [vmem:[#allocation2 + $0x10] sm:$0xff] }
  0xa1   : > { %181 = vst.msk [vmem:[#allocation2 + $0xc8] sm:$0xc0] %vm6088_vm2, %v3432_v47  ;;  %v3437_v9 = vunpack.i.l.bf16 %v3436_v6  ;;  %v1516_v42 = vld [vmem:[#allocation2 + $0x18] sm:$0xff]  ;;  %v3451_v50 = vpop.permute.xlu1 %3450  ;;  %v1595_v35 = vpack.c.bf16 %v1523_v17, %v1515_v36  ;;  %v6161_v36 = vunpack.i.l.bf16 %v4732_v39  ;;  %vm6165_vm2 = vcmask 785414  }
  0xa2   : > { %1665 = vmatprep.subr.bf16.mxu0 %v1594_v60  ;;  %183 = vst.msk [vmem:[#allocation2 + $0x108] sm:$0x1] %vm6087_vm1, %v3432_v47  ;;  %v3438_v60 = vunpack.i.h.bf16 %v3436_v6  ;;  %v3453_v30 = vunpack.i.h.bf16 %v3451_v50  ;;  %v3452_v6 = vunpack.i.l.bf16 %v3451_v50  ;;  %vm6164_vm1 = vcmask 1041280  }
  0xa3   : > { %171 = vst.msk [vmem:[#allocation2 + $0xc8] sm:$0x38] %vm6156_vm0, %v3427_v1  ;;  %1666 = vmatpush1.bf16.msra.mxu0 %v1593_v29  ;;  %v4775_v29 = vcombine.low %v4226_v5, %v4226_v5  ;;  %vm6115_vm0 = vcmask 785408   ;;  %3730 = vrot.lane.b32.xlu0 %v4518_v54, %s4107_s18 }
  0xa4   : > { %525 = vst.msk [vmem:[#allocation2 + $0xd8] sm:$0x38] %vm6086_vm8, %v3443_v46  ;;  %v3446_v51 = vpop.permute.xlu0 %3445  ;;  %3735 = vrot.lane.b32.xlu1 %v6158_v34, %s4106_s17  ;;  %vm6163_vm8 = vcmask 1048454  }
  0xa5   : > { %512 = vst.msk [vmem:[#allocation2 + $0xd8] sm:$0x7] %vm6085_vm12, %v3442_v2  ;;  %v3448_v55 = vunpack.i.h.bf16 %v3446_v51  ;;  %v3447_v41 = vunpack.i.l.bf16 %v3446_v51  ;;  %vm6162_vm12 = vmmov %vm6160_vm5  ;;  %v3461_v34 = vpop.permute.xlu1 %3460 }
  0xa6   : > { %v1524_v1 = vld [vmem:[#allocation2 + $0x58] sm:$0xff]  ;;  %501 = vst.msk [vmem:[#allocation2 + $0x98] sm:$0xe0] %vm500_vm14, %v3438_v60  ;;  %v146_v50 = vsel %vm6162_vm12, %v3452_v6, %v6161_v36  ;;  %v3462_v51 = vunpack.i.l.bf16 %v3461_v34  ;;  %v6171_v36 = vrot.slane %v4253_v16, 5 }
  0xa7   : > { %486 = vst.msk [vmem:[#allocation2 + $0x98] sm:$0x1c] %vm485_vm3, %v3437_v9  ;;  %v1596_v47 = vpack.c.bf16 %v1524_v1, %v1516_v42  ;;  %v3739_v42 = vpack.i.bf16 %v4226_v5, %v4775_v29  ;;  %v6159_v1 = vunpack.i.h.bf16 %v4732_v39  ;;  %v530_v0 = vsel %vm6115_vm0, %v3448_v55, %v3447_v41  ;;  %149 = vst [vmem:[#allocation2 + $0x80] sm:$0xe0] %v146_v50 }
  0xa8   : > { %861 = vst.msk [vmem:[#allocation2 + $0x98] sm:$0x1c] %vm860_vm10, %v6091_v25  ;;  %535 = vst [vmem:[#allocation2 + $0x110] ss:$-60 sps:$4 sm:$0xc1] %v530_v0   ;;  %v3456_v39 = vpop.permute.xlu0 %3455  ;;  %3745 = vrot.lane.b32.xlu1 %v4491_v48, %s4108_s19 }
  0xa9   : > { %1706 = vmatprep.subr.bf16.mxu1 %v1596_v47  ;;  %v156_v17 = vsel %vm6160_vm5, %v3453_v30, %v6159_v1  ;;  %534 = vst.msk [vmem:[#allocation2 + $0xc8] sm:$0xc0] %vm6163_vm8, %v3448_v55  ;;  %vm482_vm5 = vcmask 1045378   ;;  %v3463_v47 = vunpack.i.h.bf16 %v3461_v34  ;;  %v3458_v30 = vunpack.i.h.bf16 %v3456_v39  ;;  %3740 = vrot.lane.b32.xlu0 %v3739_v42, %s4106_s17 }
  0xaa   : > { %537 = vst.msk [vmem:[#allocation2 + $0x108] sm:$0x1] %vm6164_vm1, %v3448_v55  ;;  %1707 = vmatpush1.bf16.msra.mxu1 %v1595_v35  ;;  %159 = vst [vmem:[#allocation2 + $0xc0] sm:$0x7] %v156_v17  ;;  %v3457_v6 = vunpack.i.l.bf16 %v3456_v39  ;;  %v895_v55 = vrot.slane %v4428_v11, 5  ;;  %vm6166_vm1 = vcmask 1043328  }
  0xab   : > { %536 = vst.msk [vmem:[#allocation2 + $0xd8] sm:$0xc0] %vm6165_vm2, %v3447_v41  ;;  %v519_v35 = vsel %vm6113_vm6, %v3463_v47, %v3443_v46  ;;  %vm6167_vm2 = vcmask 1046403   ;;  %vm6168_vm8 = vcmask 908288   ;;  %v6096_v17 = vmov 0  }
  0xac   : > { %539 = vst.msk [vmem:[#allocation2 + $0x118] sm:$0x1] %vm421_vm13, %v3447_v41  ;;  %v506_v41 = vsel %vm6113_vm6, %v3462_v51, %v3442_v2  ;;  %v478_v1 = vsel %vm6168_vm8, %v3457_v6, %v3437_v9  ;;  %vm6169_vm12 = vmmov %vm6168_vm8  ;;  %1697 = vmatprep.mubr.bf16.mxu0 %v6096_v17  ;;  %v4816_v2 = vpop.permute.xlu1 %3470  ;;  %v4818_v46 = vpop.permute.xlu0 %3465  ;;  %1738 = vmatprep.mubr.bf16.mxu1 %v6096_v17  ;;  %vm6173_vm8 = vcmask 1043200  }
  0xad   : > { %510 = vst.msk [vmem:[#allocation2 + $0xc8] sm:$0x7] %vm6166_vm1, %v3462_v51  ;;  %v493_v48 = vsel %vm6169_vm12, %v3458_v30, %v3438_v60  ;;  %511 = vst [vmem:[#allocation2 + $0xd0] sm:$0x7] %v506_v41  ;;  %vm876_vm1 = vcmask 1048325   ;;  %3974 = vset.pattern.permute.xlu1 %v6096_v17  ;;  %v6090_v9 = vunpack.i.l.bf16 %v4816_v2  ;;  %v6095_v60 = vunpack.i.h.bf16 %v4818_v46  ;;  %3975 = vset.pattern.permute.xlu0 %v6096_v17 }
  0xae   : > { %523 = vst.msk [vmem:[#allocation2 + $0xc8] sm:$0x38] %vm6167_vm2, %v3463_v47  ;;  %524 = vst [vmem:[#allocation2 + $0xd0] sm:$0x38] %v519_v35  ;;  %v6092_v42 = vunpack.i.l.bf16 %v4818_v46  ;;  %3755 = vrot.lane.b32.xlu1 %v4662_v53, %s4107_s18  ;;  %3750 = vrot.lane.b32.xlu0 %v4541_v52, %s4107_s18  ;;  %v4832_v50 = vpack.i.bf16 %v895_v55, %v6171_v36  ;;  %vm6172_vm2 = vcmask 1046275   ;;  %v6176_v55 = vpack.i.bf16 %v4481_v33, %v4478_v14 }
  0xaf   : > { %498 = vst.msk [vmem:[#allocation2 + $0x88] sm:$0xe0] %vm497_vm11, %v3458_v30  ;;  %484 = vst [vmem:[#allocation2 + $0x90] sm:$0x1c] %v478_v1  ;;  %v1529_v30 = vld [vmem:[#allocation2 + $0x80] sm:$0xff]  ;;  %v1269_v1 = vrot.slane %v4381_v57, 5  ;;  %v935_v17 = vcombine.low %v4539_v26, %v4539_v26 }
  0xb0   : > { %483 = vst.msk [vmem:[#allocation2 + $0x88] sm:$0x1c] %vm482_vm5, %v3457_v6  ;;  %499 = vst [vmem:[#allocation2 + $0x90] sm:$0xe0] %v493_v48  ;;  %v4843_v0 = vpop.permute.xlu1 %3480  ;;  %v4845_v34 = vpop.permute.xlu0 %3475 }
  0xb1   : > { %6170 = vst [vmem:[#allocation9_spill] sm:$0xff] %v4818_v46  ;;  %907 = vst.msk [vmem:[#allocation2 + $0xd8] sm:$0x38] %vm6172_vm2, %v6090_v9  ;;  %v3483_v39 = vunpack.i.h.bf16 %v4843_v0  ;;  %v6100_v47 = vunpack.i.l.bf16 %v4843_v0  ;;  %v4850_v51 = vunpack.i.l.bf16 %v4845_v34  ;;  %v1537_v6 = vld [vmem:[#allocation2 + $0xc0] sm:$0xff]  ;;  %vm6177_vm2 = vcmask 915460  }
  0xb2   : > { %892 = vst.msk [vmem:[#allocation2 + $0xd8] sm:$0x7] %vm6173_vm8, %v6095_v60  ;;  %6174 = vst [vmem:[#allocation10_spill] sm:$0xff] %v4845_v34  ;;  %3765 = vrot.lane.b32.xlu1 %v6176_v55, %s4105_s16  ;;  %3760 = vrot.lane.b32.xlu0 %v4832_v50, %s4106_s17  ;;  %v1601_v55 = vpack.c.bf16 %v1537_v6, %v1529_v30  ;;  %v4885_v30 = vpack.i.bf16 %v4428_v11, %v4253_v16  ;;  %v6186_v46 = vunpack.i.h.bf16 %v4845_v34 }
  0xb3   : > { %877 = vst.msk [vmem:[#allocation2 + $0x98] sm:$0xe0] %vm876_vm1, %v6092_v42  ;;  %6175 = vst [vmem:[#allocation11_spill] sm:$0xff] %v4850_v51  ;;  %v203_v48 = vsel %vm6169_vm12, %v6100_v47, %v3483_v39 }
  0xb4   : > { %918 = vst.msk [vmem:[#allocation2 + $0xd8] sm:$0xc0] %vm6094_vm7, %v4850_v51  ;;  %v4867_v33 = vpop.permute.xlu1 %3490  ;;  %v4869_v14 = vpop.permute.xlu0 %3485  ;;  %vm6179_vm8 = vmmov %vm6169_vm12  ;;  %vm6180_vm12 = vcmask 913410   ;;  %vm6118_vm7 = vcmask 777216  }
  0xb5   : > { %v1538_v35 = vld [vmem:[#allocation2 + $0xc8] sm:$0xff]  ;;  %921 = vst.msk [vmem:[#allocation2 + $0x118] sm:$0x1] %vm6093_vm9, %v4850_v51  ;;  %v3493_v9 = vunpack.i.h.bf16 %v4867_v33  ;;  %v6098_v25 = vunpack.i.l.bf16 %v4867_v33  ;;  %v3488_v39 = vunpack.i.h.bf16 %v4869_v14  ;;  %v6099_v42 = vunpack.i.l.bf16 %v4869_v14 }
  0xb6   : > { %207 = vst.msk [vmem:[#allocation2 + $0x108] sm:$0x70] %vm6177_vm2, %v203_v48  ;;  %3775 = vrot.lane.b32.xlu1 %v4568_v49, %s4109_s20  ;;  %3770 = vrot.lane.b32.xlu0 %v4497_v10, %s4109_s20  ;;  %vm6181_vm2 = vcmask 916487   ;;  %vm6182_vm9 = vcmask 910336  }
  0xb7   : > { %v1530_v41 = vld [vmem:[#allocation2 + $0x88] sm:$0xff]  ;;  %v237_v6 = vsel %vm6113_vm6, %v6098_v25, %v3493_v9  ;;  %v219_v48 = vsel %vm6179_vm8, %v6099_v42, %v3488_v39  ;;  %v1539_v39 = vld [vmem:[#allocation2 + $0xd0] sm:$0xff]  ;;  %vm6185_vm8 = vcmask 781313  }
  0xb8   : > { %v1602_v36 = vpack.c.bf16 %v1538_v35, %v1530_v41  ;;  %v6178_v41 = vrot.slane %v4238_v12, 5  ;;  %241 = vst.msk [vmem:[#allocation2 + $0x148] sm:$0x1c] %vm6180_vm12, %v237_v6  ;;  %v4896_v12 = vpop.permute.xlu1 %3500  ;;  %v4898_v16 = vpop.permute.xlu0 %3495  ;;  %vm6116_vm12 = vcmask 769024  }
  0xb9   : > { %223 = vst.msk [vmem:[#allocation2 + $0x108] sm:$0x80] %vm6181_vm2, %v219_v48  ;;  %v3503_v10 = vunpack.i.h.bf16 %v4896_v12  ;;  %v6105_v9 = vunpack.i.l.bf16 %v4896_v12  ;;  %vm6187_vm2 = vcmask 1048455  }
  0xba   : > { %1667 = vmatprep.subr.bf16.mxu0 %v1602_v36  ;;  %v4881_v35 = vpack.i.bf16 %v1269_v1, %v6178_v41  ;;  %225 = vst.msk [vmem:[#allocation2 + $0x148] sm:$0x3] %vm6182_vm9, %v219_v48  ;;  %v3498_v1 = vunpack.i.h.bf16 %v4898_v16  ;;  %v6109_v36 = vunpack.i.l.bf16 %v4898_v16  ;;  %3780 = vrot.lane.b32.xlu0 %v4885_v30, %s6145_s22  ;;  %v1532_v41 = vld [vmem:[#allocation2 + $0x98] sm:$0xff]  ;;  %v6183_v48 = vrot.slane %v4223_v4, 5 }
  0xbb   : > { %1668 = vmatpush1.bf16.msra.mxu0 %v1601_v55  ;;  %v1531_v55 = vld [vmem:[#allocation2 + $0x90] sm:$0xff]  ;;  %v1540_v6 = vld [vmem:[#allocation2 + $0xd8] sm:$0xff]  ;;  %v563_v42 = vsel %vm6118_vm7, %v6105_v9, %v3503_v10  ;;  %vm6184_vm9 = vcmask 784388  }
  0xbc   : > { %3785 = vrot.lane.b32.xlu1 %v4881_v35, %s6145_s22  ;;  %v4911_v60 = vpack.i.bf16 %v6183_v48, %v4220_v3  ;;  %v548_v47 = vsel %vm6118_vm7, %v6109_v36, %v3498_v1  ;;  %v1604_v51 = vpack.c.bf16 %v1540_v6, %v1532_v41  ;;  %569 = vst.msk [vmem:[#allocation2 + $0x118] sm:$0x70] %vm6184_vm9, %v563_v42  ;;  %v3511_v3 = vpop.permute.xlu1 %3510  ;;  %v4925_v48 = vpop.permute.xlu0 %3505  ;;  %vm6188_vm9 = vcmask 1042304  }
  0xbd   : > { %554 = vst.msk [vmem:[#allocation2 + $0x118] sm:$0xe] %vm6185_vm8, %v548_v47  ;;  %v1603_v25 = vpack.c.bf16 %v1539_v39, %v1531_v55  ;;  %v3513_v10 = vunpack.i.h.bf16 %v3511_v3  ;;  %v3512_v9 = vunpack.i.l.bf16 %v3511_v3  ;;  %v6108_v1 = vunpack.i.h.bf16 %v4925_v48 }
  0xbe   : > { %932 = vst.msk [vmem:[#allocation2 + $0x118] sm:$0xe] %vm6106_vm4, %v6186_v46  ;;  %v3507_v41 = vunpack.i.l.bf16 %v4925_v48  ;;  %1708 = vmatprep.subr.bf16.mxu1 %v1604_v51  ;;  %3790 = vrot.lane.b32.xlu0 %v4452_v43, %s4109_s20  ;;  %v4937_v42 = vpack.i.bf16 %v935_v17, %v4293_v28  ;;  %v968_v47 = vrot.slane %v4539_v26, 6  ;;  %v950_v46 = vrot.slane %v4577_v27, 1 }
  0xbf   : > { %v6107_v55 = vunpack.i.h.bf16 %v4816_v2  ;;  %v579_v39 = vsel %vm6116_vm12, %v3513_v10, %v3413_v32  ;;  %584 = vst.msk [vmem:[#allocation2 + $0x108] sm:$0x80] %vm6187_vm2, %v3513_v10  ;;  %v600_v51 = vsel %vm6116_vm12, %v6108_v1, %v3512_v9  ;;  %1709 = vmatpush1.bf16.msra.mxu1 %v1603_v25  ;;  %vm6189_vm8 = vcmask 785415  }
  0xc0   : > { %3795 = vrot.lane.b32.xlu1 %v4911_v60, %s6145_s22  ;;  %587 = vst.msk [vmem:[#allocation2 + $0x148] sm:$0x3] %vm6188_vm9, %v3513_v10  ;;  %v580_v43 = vsel %vm6116_vm12, %v3413_v32, %v3507_v41  ;;  %585 = vst [vmem:[#allocation2 + $0x150] ss:$-60 sps:$4 sm:$0x83] %v579_v39   ;;  %vm6190_vm4 = vcmask 779264   ;;  %v3521_v28 = vpop.permute.xlu1 %3520  ;;  %v3516_v17 = vpop.permute.xlu0 %3515 }
  0xc1   : > { %606 = vst.msk [vmem:[#allocation2 + $0x158] sm:$0x1c] %vm485_vm3, %v600_v51  ;;  %v3523_v6 = vunpack.i.h.bf16 %v3521_v28  ;;  %v3522_v3 = vunpack.i.l.bf16 %v3521_v28  ;;  %v3518_v10 = vunpack.i.h.bf16 %v3516_v17  ;;  %v3517_v9 = vunpack.i.l.bf16 %v3516_v17 }
  0xc2   : > { %586 = vst.msk [vmem:[#allocation2 + $0x118] sm:$0x80] %vm6189_vm8, %v580_v43  ;;  %3800 = vrot.lane.b32.xlu0 %v4518_v54, %s4108_s19  ;;  %v6191_v32 = vrot.slane %v4328_v40, 6  ;;  %v6192_v41 = vrot.slane %v4242_v13, 1  ;;  %vm6195_vm2 = vcmask 908288   ;;  %vm6198_vm8 = vcmask 916480  }
  0xc3   : > { %589 = vst.msk [vmem:[#allocation2 + $0x158] sm:$0x3] %vm6190_vm4, %v580_v43  ;;  %v611_v51 = vsel %vm6115_vm0, %v3523_v6, %v3522_v3  ;;  %vm6193_vm4 = vcmask 912385   ;;  %vm6197_vm9 = vmmov %vm6195_vm2 }
  0xc4   : > { %980 = vst.msk [vmem:[#allocation2 + $0x158] sm:$0x1c] %vm860_vm10, %v6107_v55  ;;  %3805 = vrot.lane.b32.xlu1 %v4937_v42, %s4107_s18  ;;  %v4961_v25 = vpack.i.bf16 %v968_v47, %v6191_v32  ;;  %v4965_v39 = vpack.i.bf16 %v950_v46, %v6192_v41  ;;  %616 = vst [vmem:[#allocation2 + $0x150] sm:$0xe0] %v611_v51  ;;  %v3531_v54 = vpop.permute.xlu1 %3530  ;;  %v3526_v43 = vpop.permute.xlu0 %3525  ;;  %v4978_v46 = vcombine.low %v4577_v27, %v4577_v27 }
  0xc5   : > { %617 = vst.msk [vmem:[#allocation2 + $0x158] sm:$0xe0] %vm500_vm14, %v3522_v3  ;;  %v3533_v40 = vunpack.i.h.bf16 %v3531_v54  ;;  %v3532_v47 = vunpack.i.l.bf16 %v3531_v54  ;;  %v3528_v28 = vunpack.i.h.bf16 %v3526_v43  ;;  %v3527_v17 = vunpack.i.l.bf16 %v3526_v43 }
  0xc6   : > { %250 = vst.msk [vmem:[#allocation2 + $0x148] sm:$0xe0] %vm150_vm15, %v3518_v10  ;;  %3810 = vrot.lane.b32.xlu0 %v4965_v39, %s4107_s18  ;;  %v6194_v3 = vunpack.i.l.bf16 %v4843_v0  ;;  %v6196_v32 = vunpack.i.l.bf16 %v4869_v14  ;;  %v3829_v0 = vpack.i.bf16 %v4978_v46, %v4226_v5  ;;  %v1345_v14 = vrot.slane %v4577_v27, 6 }
  0xc7   : > { %192 = vst.msk [vmem:[#allocation2 + $0x108] sm:$0xe] %vm6193_vm4, %v3517_v9  ;;  %v188_v51 = vsel %vm6198_vm8, %v3527_v17, %v3517_v9  ;;  %vm6199_vm4 = vmmov %vm6198_vm8  ;;  %v6200_v9 = vunpack.i.l.bf16 %v4898_v16  ;;  %vm6205_vm8 = vcmask 1047300  }
  0xc8   : > { %615 = vst.msk [vmem:[#allocation2 + $0x148] sm:$0xe0] %vm497_vm11, %v3523_v6  ;;  %3815 = vrot.lane.b32.xlu1 %v4961_v25, %s4106_s17  ;;  %v202_v6 = vsel %vm6195_vm2, %v3532_v47, %v6194_v3  ;;  %v218_v41 = vsel %vm6197_vm9, %v3533_v40, %v6196_v32  ;;  %v246_v54 = vsel %vm6199_vm4, %v3528_v28, %v3518_v10  ;;  %191 = vst [vmem:[#allocation2 + $0x100] sm:$0xe] %v188_v51  ;;  %v3541_v43 = vpop.permute.xlu1 %3540  ;;  %v3536_v55 = vpop.permute.xlu0 %3535  ;;  %vm6201_vm2 = vcmask 1044353  }
  0xc9   : > { %206 = vst [vmem:[#allocation2 + $0x100] sm:$0x70] %v202_v6  ;;  %222 = vst [vmem:[#allocation2 + $0x140] ss:$-60 sps:$4 sm:$0x83] %v218_v41   ;;  %v3543_v1 = vunpack.i.h.bf16 %v3541_v43  ;;  %v3542_v36 = vunpack.i.l.bf16 %v3541_v43  ;;  %v3537_v34 = vunpack.i.l.bf16 %v3536_v55  ;;  %v1327_v10 = vrot.slane %v4539_v26, 1 }
  0xca   : > { %249 = vst [vmem:[#allocation2 + $0x140] sm:$0xe0] %v246_v54  ;;  %3820 = vrot.lane.b32.xlu0 %v4541_v52, %s4108_s19  ;;  %v6202_v47 = vunpack.i.l.bf16 %v4896_v12  ;;  %vm6203_vm9 = vcmask 1047428   ;;  %v6204_v52 = vunpack.i.l.bf16 %v4867_v33  ;;  %vm6206_vm4 = vcmask 1048327  }
  0xcb   : > { %v547_v40 = vsel %vm6118_vm7, %v3542_v36, %v6200_v9  ;;  %552 = vst.msk [vmem:[#allocation2 + $0x108] sm:$0xe] %vm6201_vm2, %v3542_v36  ;;  %v5023_v33 = vpack.i.bf16 %v1327_v10, %v4384_v58  ;;  %vm6207_vm2 = vcmask 1042176   ;;  %v3538_v43 = vunpack.i.h.bf16 %v3536_v55 }
  0xcc   : > { %926 = vrot.lane.b32.xlu1 %v4602_v8, %s4105_s16  ;;  %v562_v8 = vsel %vm6118_vm7, %v3543_v1, %v6202_v47  ;;  %567 = vst.msk [vmem:[#allocation2 + $0x108] sm:$0x70] %vm6203_vm9, %v3543_v1  ;;  %v236_v28 = vsel %vm6113_vm6, %v3537_v34, %v6204_v52  ;;  %553 = vst [vmem:[#allocation2 + $0x110] sm:$0xe] %v547_v40  ;;  %v5007_v17 = vpop.permute.xlu1 %3550  ;;  %v5009_v16 = vpop.permute.xlu0 %3545  ;;  %v3839_v34 = vpack.i.bf16 %v1345_v14, %v4485_v19  ;;  %vm6209_vm9 = vcmask 908288  }
  0xcd   : > { %568 = vst [vmem:[#allocation2 + $0x110] sm:$0x70] %v562_v8  ;;  %240 = vst [vmem:[#allocation2 + $0x140] sm:$0x1c] %v236_v28  ;;  %v5012_v3 = vunpack.i.h.bf16 %v5007_v17  ;;  %v3552_v12 = vunpack.i.l.bf16 %v5007_v17  ;;  %v3547_v36 = vunpack.i.l.bf16 %v5009_v16  ;;  %v6208_v1 = vunpack.i.h.bf16 %v4925_v48 }
  0xce   : > { %3825 = vrot.lane.b32.xlu0 %v4552_v62, %s4109_s20  ;;  %v3849_v48 = vpack.i.bf16 %v4775_v29, %v4446_v37  ;;  %v6211_v28 = vrot.slane %v4223_v4, 3 }
  0xcf   : > { %947 = vst.msk [vmem:[#allocation2 + $0x118] sm:$0x70] %vm6205_vm8, %v3552_v12  ;;  %v599_v62 = vsel %vm6116_vm12, %v3547_v36, %v6208_v1  ;;  %vm6210_vm8 = vcmask 914435  }
  0xd0   : > { %3830 = vrot.lane.b32.xlu1 %v3829_v0, %s4109_s20  ;;  %962 = vst.msk [vmem:[#allocation2 + $0x118] sm:$0x80] %vm6206_vm4, %v5012_v3  ;;  %605 = vst [vmem:[#allocation2 + $0x150] sm:$0x1c] %v599_v62  ;;  %v5036_v6 = vpop.permute.xlu1 %3560  ;;  %v5038_v58 = vpop.permute.xlu0 %3555 }
  0xd1   : > { %965 = vst.msk [vmem:[#allocation2 + $0x158] sm:$0x3] %vm6207_vm2, %v5012_v3  ;;  %v3563_v32 = vunpack.i.h.bf16 %v5036_v6  ;;  %v3562_v41 = vunpack.i.l.bf16 %v5036_v6  ;;  %v6112_v51 = vunpack.i.l.bf16 %v5038_v58  ;;  %vm6212_vm4 = vmmov %vm6209_vm9  ;;  %vm6213_vm2 = vcmask 912385  }
  0xd2   : > { %604 = vst.msk [vmem:[#allocation2 + $0x148] sm:$0x1c] %vm482_vm5, %v3547_v36  ;;  %3835 = vrot.lane.b32.xlu0 %v5023_v33, %s6145_s22  ;;  %v3859_v36 = vpack.i.bf16 %v4226_v5, %v6211_v28  ;;  %v1027_v28 = vrot.slane %v4381_v57, 2 }
  0xd3   : > { %v269_v54 = vsel %vm6209_vm9, %v3562_v41, %v3563_v32  ;;  %995 = vst.msk [vmem:[#allocation2 + $0x158] sm:$0xe0] %vm876_vm1, %v6112_v51  ;;  %v1546_v52 = vld [vmem:[#allocation2 + $0x108] sm:$0xff]  ;;  %vm6214_vm9 = vcmask 916486  }
  0xd4   : > { %3840 = vrot.lane.b32.xlu1 %v3839_v34, %s6145_s22  ;;  %273 = vst.msk [vmem:[#allocation2 + $0x188] sm:$0x38] %vm6210_vm8, %v269_v54  ;;  %v3571_v0 = vpop.permute.xlu1 %3570  ;;  %v5055_v10 = vpop.permute.xlu0 %3565  ;;  %v1553_v8 = vld [vmem:[#allocation2 + $0x140] sm:$0xff]  ;;  %v3854_v34 = vpack.i.bf16 %v4500_v23, %v4461_v61  ;;  %vm6215_vm8 = vcmask 909312  }
  0xd5   : > { %v3573_v9 = vunpack.i.h.bf16 %v3571_v0  ;;  %v3572_v40 = vunpack.i.l.bf16 %v3571_v0  ;;  %v3568_v47 = vunpack.i.h.bf16 %v5055_v10  ;;  %v3567_v37 = vunpack.i.l.bf16 %v5055_v10  ;;  %v1545_v54 = vld [vmem:[#allocation2 + $0x100] sm:$0xff] }
  0xd6   : > { %3845 = vrot.lane.b32.xlu0 %v4568_v49, %s4112_s23  ;;  %v1609_v49 = vpack.c.bf16 %v1553_v8, %v1545_v54  ;;  %v1105_v10 = vrot.slane %v4577_v27, 3 }
  0xd7   : > { %v301_v1 = vsel %vm6113_vm6, %v3573_v9, %v3538_v43  ;;  %v302_v62 = vsel %vm6113_vm6, %v3538_v43, %v3572_v40  ;;  %v285_v32 = vsel %vm6212_vm4, %v3567_v37, %v3568_v47  ;;  %v1555_v47 = vld [vmem:[#allocation2 + $0x150] sm:$0xff]  ;;  %vm6216_vm4 = vcmask 916487  }
  0xd8   : > { %3850 = vrot.lane.b32.xlu1 %v3849_v48, %s4109_s20  ;;  %305 = vst [vmem:[#allocation2 + $0x1c0] sm:$0xe] %v301_v1  ;;  %306 = vst.msk [vmem:[#allocation2 + $0x1c8] sm:$0xe] %vm6213_vm2, %v302_v62  ;;  %v5075_v4 = vpop.permute.xlu1 %3580  ;;  %v5077_v5 = vpop.permute.xlu0 %3575  ;;  %vm6217_vm2 = vcmask 910336   ;;  %vm6230_vm6 = vcmask 911360  }
  0xd9   : > { %v1554_v55 = vld [vmem:[#allocation2 + $0x148] sm:$0xff]  ;;  %289 = vst.msk [vmem:[#allocation2 + $0x188] sm:$0xc0] %vm6214_vm9, %v285_v32  ;;  %v3583_v43 = vunpack.i.h.bf16 %v5075_v4  ;;  %v3582_v0 = vunpack.i.l.bf16 %v5075_v4  ;;  %v3578_v9 = vunpack.i.h.bf16 %v5077_v5  ;;  %v3577_v40 = vunpack.i.l.bf16 %v5077_v5 }
  0xda   : > { %v1610_v48 = vpack.c.bf16 %v1554_v55, %v1546_v52  ;;  %291 = vst.msk [vmem:[#allocation2 + $0x1c8] sm:$0x1] %vm6215_vm8, %v285_v32  ;;  %3855 = vrot.lane.b32.xlu0 %v3854_v34, %s6145_s22  ;;  %v1548_v52 = vld [vmem:[#allocation2 + $0x118] sm:$0xff]  ;;  %v1547_v32 = vld [vmem:[#allocation2 + $0x110] sm:$0xff]  ;;  %vm6218_vm9 = vcmask 915460   ;;  %vm6219_vm8 = vcmask 783363   ;;  %v3929_v5 = vpack.i.bf16 %v1105_v10, %v4378_v56 }
  0xdb   : > { %v1556_v55 = vld [vmem:[#allocation2 + $0x158] sm:$0xff]  ;;  %v327_v8 = vsel %vm6115_vm0, %v3582_v0, %v3583_v43  ;;  %v315_v1 = vsel %vm6115_vm0, %v3577_v40, %v3578_v9 }
  0xdc   : > { %1669 = vmatprep.subr.bf16.mxu0 %v1610_v48  ;;  %3860 = vrot.lane.b32.xlu1 %v3859_v36, %s4112_s23  ;;  %v1612_v62 = vpack.c.bf16 %v1556_v55, %v1548_v52  ;;  %331 = vst.msk [vmem:[#allocation2 + $0x1c8] sm:$0x80] %vm6216_vm4, %v327_v8  ;;  %v5095_v36 = vpop.permute.xlu1 %3590  ;;  %v5097_v34 = vpop.permute.xlu0 %3585  ;;  %v1611_v48 = vpack.c.bf16 %v1555_v47, %v1547_v32  ;;  %v6111_v55 = vunpack.i.h.bf16 %v5038_v58  ;;  %vm6220_vm4 = vcmask 780288  }
  0xdd   : > { %1670 = vmatpush1.bf16.msra.mxu0 %v1609_v49  ;;  %333 = vst.msk [vmem:[#allocation2 + $0x208] sm:$0x3] %vm6217_vm2, %v327_v8  ;;  %v3593_v54 = vunpack.i.h.bf16 %v5095_v36  ;;  %v3592_v43 = vunpack.i.l.bf16 %v5095_v36  ;;  %v3588_v9 = vunpack.i.h.bf16 %v5097_v34  ;;  %v3587_v49 = vunpack.i.l.bf16 %v5097_v34 }
  0xde   : > { %319 = vst.msk [vmem:[#allocation2 + $0x1c8] sm:$0x70] %vm6218_vm9, %v315_v1  ;;  %1710 = vmatprep.subr.bf16.mxu1 %v1612_v62  ;;  %3865 = vrot.lane.b32.xlu0 %v4662_v53, %s4108_s19  ;;  %v3874_v52 = vpack.i.bf16 %v1027_v28, %v4277_v22  ;;  %v3548_v22 = vunpack.i.h.bf16 %v5009_v16  ;;  %vm6221_vm2 = vcmask 1043200   ;;  %vm6222_vm9 = vcmask 781313  }
  0xdf   : > { %v640_v47 = vsel %vm6118_vm7, %v3592_v43, %v3593_v54  ;;  %v625_v8 = vsel %vm6118_vm7, %v3587_v49, %v3588_v9  ;;  %1711 = vmatpush1.bf16.msra.mxu1 %v1611_v48  ;;  %v3949_v34 = vpack.i.bf16 %v4485_v19, %v4461_v61 }
  0xe0   : > { %3870 = vrot.lane.b32.xlu1 %v4832_v50, %s4109_s20  ;;  %646 = vst.msk [vmem:[#allocation2 + $0x198] sm:$0x38] %vm6219_vm8, %v640_v47  ;;  %v5117_v50 = vpop.permute.xlu1 %3600  ;;  %v5119_v53 = vpop.permute.xlu0 %3595  ;;  %vm6223_vm8 = vcmask 785414  }
  0xe1   : > { %631 = vst.msk [vmem:[#allocation2 + $0x198] sm:$0x7] %vm6220_vm4, %v625_v8  ;;  %v3602_v28 = vunpack.i.l.bf16 %v5117_v50  ;;  %v3598_v1 = vunpack.i.h.bf16 %v5119_v53  ;;  %v3597_v62 = vunpack.i.l.bf16 %v5119_v53  ;;  %vm6143_vm4 = vcmask 646144  }
  0xe2   : > { %1009 = vst.msk [vmem:[#allocation2 + $0x198] sm:$0x7] %vm6221_vm2, %v6111_v55  ;;  %3875 = vrot.lane.b32.xlu0 %v3874_v52, %s4109_s20  ;;  %vm6127_vm2 = vcmask 654336  }
  0xe3   : > { %v677_v32 = vsel %vm6116_vm12, %v3598_v1, %v3602_v28  ;;  %v657_v48 = vsel %vm6116_vm12, %v3548_v22, %v3597_v62  ;;  %v1423_v28 = vrot.slane %v4381_v57, 7  ;;  %v1404_v62 = vrot.slane %v4428_v11, 2 }
  0xe4   : > { %3880 = vrot.lane.b32.xlu1 %v4526_v44, %s6145_s22  ;;  %683 = vst.msk [vmem:[#allocation2 + $0x1d8] sm:$0xe] %vm6222_vm9, %v677_v32  ;;  %v5140_v54 = vpop.permute.xlu1 %3610  ;;  %v5142_v44 = vpop.permute.xlu0 %3605  ;;  %vm6225_vm9 = vcmask 779264  }
  0xe5   : > { %663 = vst.msk [vmem:[#allocation2 + $0x198] sm:$0xc0] %vm6223_vm8, %v657_v48  ;;  %v3613_v9 = vunpack.i.h.bf16 %v5140_v54  ;;  %v3612_v52 = vunpack.i.l.bf16 %v5140_v54  ;;  %v3608_v47 = vunpack.i.h.bf16 %v5142_v44  ;;  %v3607_v8 = vunpack.i.l.bf16 %v5142_v44 }
  0xe6   : > { %666 = vst.msk [vmem:[#allocation2 + $0x1d8] sm:$0x1] %vm421_vm13, %v657_v48  ;;  %3885 = vrot.lane.b32.xlu0 %v4937_v42, %s4108_s19  ;;  %vm6224_vm13 = vcmask 785415   ;;  %vm6226_vm8 = vcmask 784388  }
  0xe7   : > { %v707_v32 = vsel %vm6143_vm4, %v3612_v52, %v3613_v9  ;;  %v692_v48 = vsel %vm6127_vm2, %v3607_v8, %v3608_v47  ;;  %v3909_v9 = vpack.i.bf16 %v1423_v28, %v4272_v21  ;;  %v3904_v47 = vpack.i.bf16 %v1404_v62, %v4269_v20 }
  0xe8   : > { %3890 = vrot.lane.b32.xlu1 %v4965_v39, %s4108_s19  ;;  %713 = vst.msk [vmem:[#allocation2 + $0x1d8] sm:$0x80] %vm6224_vm13, %v707_v32  ;;  %v3621_v39 = vpop.permute.xlu1 %3620  ;;  %v3616_v42 = vpop.permute.xlu0 %3615  ;;  %vm6227_vm13 = vcmask 908288   ;;  %v3603_v62 = vunpack.i.h.bf16 %v5117_v50 }
  0xe9   : > { %716 = vst.msk [vmem:[#allocation2 + $0x218] sm:$0x3] %vm6225_vm9, %v707_v32  ;;  %v3623_v55 = vunpack.i.h.bf16 %v3621_v39  ;;  %v3622_v57 = vunpack.i.l.bf16 %v3621_v39  ;;  %v3618_v51 = vunpack.i.h.bf16 %v3616_v42  ;;  %v3617_v11 = vunpack.i.l.bf16 %v3616_v42  ;;  %vm6228_vm9 = vmmov %vm6227_vm13 }
  0xea   : > { %698 = vst.msk [vmem:[#allocation2 + $0x1d8] sm:$0x70] %vm6226_vm8, %v692_v48  ;;  %3895 = vrot.lane.b32.xlu0 %v4885_v30, %s4113_s24  ;;  %vm6229_vm8 = vcmask 916480  }
  0xeb   : > { %v268_v32 = vsel %vm6227_vm13, %v3622_v57, %v3562_v41  ;;  %v284_v48 = vsel %vm6228_vm9, %v3623_v55, %v3567_v37  ;;  %v255_v39 = vsel %vm6229_vm8, %v3618_v51, %v3617_v11  ;;  %259 = vst.msk [vmem:[#allocation2 + $0x188] sm:$0x7] %vm6230_vm6, %v3617_v11  ;;  %v3914_v51 = vpack.i.bf16 %v4775_v29, %v4978_v46 }
  0xec   : > { %3900 = vrot.lane.b32.xlu1 %v4881_v35, %s4113_s24  ;;  %272 = vst [vmem:[#allocation2 + $0x180] sm:$0x38] %v268_v32  ;;  %288 = vst [vmem:[#allocation2 + $0x1c0] ss:$-60 sps:$4 sm:$0xc1] %v284_v48   ;;  %v5177_v35 = vpop.permute.xlu1 %3630  ;;  %v3626_v21 = vpop.permute.xlu0 %3625  ;;  %vm6231_vm6 = vcmask 913410  }
  0xed   : > { %258 = vst [vmem:[#allocation2 + $0x180] sm:$0x7] %v255_v39  ;;  %v3633_v20 = vunpack.i.h.bf16 %v5177_v35  ;;  %v3632_v30 = vunpack.i.l.bf16 %v5177_v35  ;;  %v3628_v6 = vunpack.i.h.bf16 %v3626_v21  ;;  %v3627_v41 = vunpack.i.l.bf16 %v3626_v21 }
  0xee   : > { %3905 = vrot.lane.b32.xlu0 %v3904_v47, %s4114_s25  ;;  %vm6232_vm13 = vcmask 1048454   ;;  %vm6233_vm9 = vcmask 1041280   ;;  %vm6234_vm8 = vcmask 911360  }
  0xef   : > { %v342_v37 = vsel %vm6118_vm7, %v3632_v30, %v3633_v20  ;;  %v326_v55 = vsel %vm6115_vm0, %v3628_v6, %v3582_v0  ;;  %v314_v28 = vsel %vm6115_vm0, %v3627_v41, %v3577_v40 }
  0xf0   : > { %3910 = vrot.lane.b32.xlu1 %v3909_v9, %s4114_s25  ;;  %346 = vst.msk [vmem:[#allocation2 + $0x208] sm:$0x1c] %vm6231_vm6, %v342_v37  ;;  %330 = vst [vmem:[#allocation2 + $0x200] ss:$-60 sps:$4 sm:$0x83] %v326_v55   ;;  %v3641_v29 = vpop.permute.xlu1 %3640  ;;  %v5197_v46 = vpop.permute.xlu0 %3635  ;;  %vm6235_vm6 = vcmask 1044353  }
  0xf1   : > { %318 = vst [vmem:[#allocation2 + $0x1c0] sm:$0x70] %v314_v28  ;;  %v3643_v42 = vunpack.i.h.bf16 %v3641_v29  ;;  %v3642_v57 = vunpack.i.l.bf16 %v3641_v29  ;;  %v3638_v11 = vunpack.i.h.bf16 %v5197_v46  ;;  %v3637_v4 = vunpack.i.l.bf16 %v5197_v46 }
  0xf2   : > { %3915 = vrot.lane.b32.xlu0 %v3914_v51, %s4112_s23 }
  0xf3   : > { %v370_v0 = vsel %vm6116_vm12, %v3603_v62, %v3642_v57  ;;  %v656_v40 = vsel %vm6116_vm12, %v3643_v42, %v3548_v22  ;;  %661 = vst.msk [vmem:[#allocation2 + $0x188] sm:$0xc0] %vm6232_vm13, %v3643_v42  ;;  %v357_v50 = vsel %vm6118_vm7, %v3637_v4, %v3638_v11  ;;  %vm6237_vm13 = vcmask 1043328  }
  0xf4   : > { %3920 = vrot.lane.b32.xlu1 %v5023_v33, %s4113_s24  ;;  %664 = vst.msk [vmem:[#allocation2 + $0x1c8] sm:$0x1] %vm6233_vm9, %v3643_v42  ;;  %662 = vst [vmem:[#allocation2 + $0x1d0] ss:$-60 sps:$4 sm:$0xc1] %v656_v40   ;;  %v3651_v56 = vpop.permute.xlu1 %3650  ;;  %v3646_v33 = vpop.permute.xlu0 %3645  ;;  %vm6119_vm9 = vcmask 654343   ;;  %v3964_v42 = vpack.i.bf16 %v4577_v27, %v4242_v13 }
  0xf5   : > { %374 = vst.msk [vmem:[#allocation2 + $0x248] sm:$0x7] %vm6234_vm8, %v370_v0  ;;  %v3653_v9 = vunpack.i.h.bf16 %v3651_v56  ;;  %v3652_v47 = vunpack.i.l.bf16 %v3651_v56  ;;  %v3648_v16 = vunpack.i.h.bf16 %v3646_v33  ;;  %v3647_v32 = vunpack.i.l.bf16 %v3646_v33 }
  0xf6   : > { %361 = vst.msk [vmem:[#allocation2 + $0x208] sm:$0xe0] %vm150_vm15, %v357_v50  ;;  %3925 = vrot.lane.b32.xlu0 %v4961_v25, %s4109_s20  ;;  %vm6236_vm15 = vcmask 1046403   ;;  %vm6114_vm8 = vcmask 648192  }
  0xf7   : > { %v369_v22 = vsel %vm6116_vm12, %v3653_v9, %v3603_v62  ;;  %v676_v48 = vsel %vm6116_vm12, %v3652_v47, %v3598_v1  ;;  %681 = vst.msk [vmem:[#allocation2 + $0x1c8] sm:$0xe] %vm6235_vm6, %v3652_v47  ;;  %v639_v39 = vsel %vm6118_vm7, %v3648_v16, %v3592_v43  ;;  %v624_v21 = vsel %vm6118_vm7, %v3647_v32, %v3587_v49 }
  0xf8   : > { %3930 = vrot.lane.b32.xlu1 %v3929_v5, %s4109_s20  ;;  %644 = vst.msk [vmem:[#allocation2 + $0x188] sm:$0x38] %vm6236_vm15, %v3648_v16  ;;  %373 = vst [vmem:[#allocation2 + $0x240] sm:$0x7] %v369_v22  ;;  %v3661_v25 = vpop.permute.xlu1 %3660  ;;  %v3656_v53 = vpop.permute.xlu0 %3655  ;;  %v1483_v43 = vrot.slane %v4539_v26, 3  ;;  %vm6238_vm6 = vcmask 1048455  }
  0xf9   : > { %629 = vst.msk [vmem:[#allocation2 + $0x188] sm:$0x7] %vm6237_vm13, %v3647_v32  ;;  %682 = vst [vmem:[#allocation2 + $0x1d0] sm:$0xe] %v676_v48  ;;  %v3662_v1 = vunpack.i.l.bf16 %v3661_v25  ;;  %v3658_v36 = vunpack.i.h.bf16 %v3656_v53  ;;  %v3657_v20 = vunpack.i.l.bf16 %v3656_v53  ;;  %vm6239_vm15 = vcmask 1042304   ;;  %v1569_v28 = vld [vmem:[#allocation2 + $0x1c0] sm:$0xff] }
  0xfa   : > { %645 = vst [vmem:[#allocation2 + $0x190] sm:$0x38] %v639_v39  ;;  %630 = vst [vmem:[#allocation2 + $0x190] sm:$0x7] %v624_v21  ;;  %3935 = vrot.lane.b32.xlu0 %v4593_v59, %s6145_s22  ;;  %vm6240_vm13 = vcmask 1047428   ;;  %v3663_v61 = vunpack.i.h.bf16 %v3661_v25  ;;  %v3959_v44 = vpack.i.bf16 %v1483_v43, %v4346_v45  ;;  %v1561_v5 = vld [vmem:[#allocation2 + $0x180] sm:$0xff]  ;;  %v6251_v43 = vunpack.i.h.bf16 %v4692_v18 }
  0xfb   : > { %v706_v49 = vsel %vm6143_vm4, %v3662_v1, %v3612_v52  ;;  %711 = vst.msk [vmem:[#allocation2 + $0x1c8] sm:$0x80] %vm6238_vm6, %v3662_v1  ;;  %v691_v59 = vsel %vm6127_vm2, %v3657_v20, %v3607_v8  ;;  %v838_v19 = vsel %vm6127_vm2, %v4739_v31, %v3658_v36  ;;  %vm6142_vm6 = vcmask 637952   ;;  %s4117_s22 = smov 32  }
  0xfc   : > { %3940 = vrot.lane.b32.xlu1 %v4911_v60, %s4113_s24  ;;  %714 = vst.msk [vmem:[#allocation2 + $0x208] sm:$0x3] %vm6239_vm15, %v3662_v1  ;;  %712 = vst [vmem:[#allocation2 + $0x210] ss:$-60 sps:$4 sm:$0x83] %v706_v49   ;;  %v3671_v26 = vpop.permute.xlu1 %3670  ;;  %v3666_v60 = vpop.permute.xlu0 %3665  ;;  %v3954_v31 = vpack.i.bf16 %v4500_v23, %v1345_v14  ;;  %vm6244_vm15 = vcmask 780288   ;;  %v1617_v13 = vpack.c.bf16 %v1569_v28, %v1561_v5 }
  0xfd   : > { %846 = vst.msk [vmem:[#allocation2 + $0x68] sm:$0x80] %vm6119_vm9, %v3658_v36  ;;  %697 = vst [vmem:[#allocation2 + $0x1d0] sm:$0x70] %v691_v59  ;;  %v3673_v54 = vunpack.i.h.bf16 %v3671_v26  ;;  %v3672_v52 = vunpack.i.l.bf16 %v3671_v26  ;;  %v3668_v6 = vunpack.i.h.bf16 %v3666_v60  ;;  %v3667_v41 = vunpack.i.l.bf16 %v3666_v60 }
  0xfe   : > { %851 = vst.msk [vmem:[#allocation2 + $0xa8] sm:$0x3] %vm6114_vm8, %v3658_v36  ;;  %844 = vst [vmem:[#allocation2 + $0xa0] ss:$-60 sps:$4 sm:$0x83] %v838_v19   ;;  %3945 = vrot.lane.b32.xlu0 %v4249_v15, %s4114_s25  ;;  %v6252_v59 = vunpack.i.l.bf16 %v4692_v18  ;;  %vm6117_vm8 = vcmask 650241  }
  0xff   : > { %696 = vst.msk [vmem:[#allocation2 + $0x1c8] sm:$0x70] %vm6240_vm13, %v3657_v20  ;;  %v742_v8 = vsel %vm6142_vm6, %v3672_v52, %v3673_v54  ;;  %v723_v51 = vsel %vm6143_vm4, %v3668_v6, %v3663_v61  ;;  %v724_v10 = vsel %vm6143_vm4, %v3663_v61, %v3667_v41  ;;  %vm6245_vm13 = vcmask 1047300  }
 0x100   : > { %3950 = vrot.lane.b32.xlu1 %v3949_v34, %s4113_s24  ;;  %728 = vst.msk [vmem:[#allocation2 + $0x208] sm:$0x1c] %vm482_vm5, %v3668_v6  ;;  %729 = vst [vmem:[#allocation2 + $0x210] sm:$0x1c] %v723_v51  ;;  %v5265_v15 = vpop.permute.xlu1 %3680  ;;  %v3676_v45 = vpop.permute.xlu0 %3675  ;;  %v1562_v62 = vld [vmem:[#allocation2 + $0x188] sm:$0xff]  ;;  %vm6243_vm5 = vcmask 1041152   ;;  %v6253_v41 = vunpack.i.l.bf16 %v4709_v24  ;;  %v6254_v24 = vunpack.i.h.bf16 %v4711_v63 }
 0x101   : > { %748 = vst.msk [vmem:[#allocation2 + $0x218] sm:$0xe0] %vm500_vm14, %v742_v8  ;;  %v5268_v37 = vunpack.i.h.bf16 %v5265_v15  ;;  %v3682_v23 = vunpack.i.l.bf16 %v5265_v15  ;;  %v3678_v14 = vunpack.i.h.bf16 %v3676_v45  ;;  %v3677_v55 = vunpack.i.l.bf16 %v3676_v45  ;;  %v1563_v26 = vld [vmem:[#allocation2 + $0x190] sm:$0xff] }
 0x102   : > { %730 = vst.msk [vmem:[#allocation2 + $0x218] sm:$0x1c] %vm485_vm3, %v724_v10  ;;  %3955 = vrot.lane.b32.xlu0 %v3954_v31, %s4113_s24  ;;  %vm6241_vm3 = vcmask 1046275   ;;  %vm6242_vm14 = vcmask 1048326   ;;  %vm1171_vm9 = vcmask 523270  }
 0x103   : > { %1024 = vst.msk [vmem:[#allocation2 + $0x198] sm:$0x38] %vm6241_vm3, %v3682_v23  ;;  %v756_v57 = vsel %vm6142_vm6, %v3677_v55, %v3678_v14  ;;  %vm6246_vm3 = vcmask 1048327  }
 0x104   : > { %3960 = vrot.lane.b32.xlu1 %v3959_v44, %s4114_s25  ;;  %1039 = vst.msk [vmem:[#allocation2 + $0x198] sm:$0xc0] %vm6242_vm14, %v5268_v37  ;;  %v5284_v0 = vpop.permute.xlu1 %3690  ;;  %v5286_v40 = vpop.permute.xlu0 %3685  ;;  %vm6247_vm14 = vcmask 1042176   ;;  %v1571_v34 = vld [vmem:[#allocation2 + $0x1d0] sm:$0xff] }
 0x105   : > { %1042 = vst.msk [vmem:[#allocation2 + $0x1d8] sm:$0x1] %vm6243_vm5, %v5268_v37  ;;  %v5289_v27 = vunpack.i.h.bf16 %v5284_v0  ;;  %v3692_v50 = vunpack.i.l.bf16 %v5284_v0  ;;  %v3688_v56 = vunpack.i.h.bf16 %v5286_v40  ;;  %v3687_v33 = vunpack.i.l.bf16 %v5286_v40 }
 0x106   : > { %v1570_v29 = vld [vmem:[#allocation2 + $0x1c8] sm:$0xff]  ;;  %762 = vst.msk [vmem:[#allocation2 + $0x258] sm:$0x7] %vm6244_vm15, %v756_v57  ;;  %3965 = vrot.lane.b32.xlu0 %v3964_v42, %s4114_s25  ;;  %vm6248_vm5 = vcmask 1044225   ;;  %vm6249_vm15 = vcmask 1043200   ;;  %v1619_v54 = vpack.c.bf16 %v1571_v34, %v1563_v26 }
 0x107   : > { %v1618_v11 = vpack.c.bf16 %v1570_v29, %v1562_v62  ;;  %1071 = vst.msk [vmem:[#allocation2 + $0x1d8] sm:$0x70] %vm6245_vm13, %v3692_v50  ;;  %vm6250_vm13 = vcmask 1043328   ;;  %v1585_v29 = vld [vmem:[#allocation2 + $0x240] sm:$0x7] }
 0x108   : > { %3970 = vrot.lane.b32.xlu1 %v4418_v7, %s4114_s25  ;;  %1085 = vst.msk [vmem:[#allocation2 + $0x1d8] sm:$0x80] %vm6246_vm3, %v5289_v27  ;;  %v3701_v7 = vpop.permute.xlu1 %3700  ;;  %v3696_v9 = vpop.permute.xlu0 %3695  ;;  %vm6135_vm3 = vcmask 649216   ;;  %s4116_s25 = smov 16  }
 0x109   : > { %1671 = vmatprep.subr.bf16.mxu0 %v1618_v11  ;;  %1088 = vst.msk [vmem:[#allocation2 + $0x218] sm:$0x3] %vm6247_vm14, %v5289_v27  ;;  %v3703_v47 = vunpack.i.h.bf16 %v3701_v7  ;;  %v3702_v16 = vunpack.i.l.bf16 %v3701_v7  ;;  %v3698_v32 = vunpack.i.h.bf16 %v3696_v9  ;;  %v3697_v22 = vunpack.i.l.bf16 %v3696_v9 }
 0x10a   : > { %1057 = vst.msk [vmem:[#allocation2 + $0x1d8] sm:$0xe] %vm6248_vm5, %v3687_v33  ;;  %1672 = vmatpush1.bf16.msra.mxu0 %v1617_v13  ;;  %vm6121_vm14 = vcmask 652291   ;;  %vm6120_vm5 = vcmask 653316  }
 0x10b   : > { %1131 = vst.msk [vmem:[#allocation2 + $0x258] sm:$0x7] %vm6249_vm15, %v3688_v56  ;;  %v741_v48 = vsel %vm6142_vm6, %v3702_v16, %v3672_v52  ;;  %v755_v39 = vsel %vm6142_vm6, %v3703_v47, %v3677_v55  ;;  %v341_v21 = vsel %vm6118_vm7, %v3697_v22, %v3632_v30  ;;  %v356_v25 = vsel %vm6118_vm7, %v3698_v32, %v3637_v4  ;;  %v1564_v46 = vld [vmem:[#allocation2 + $0x198] sm:$0xff] }
 0x10c   : > { %746 = vst.msk [vmem:[#allocation2 + $0x208] sm:$0xe0] %vm497_vm11, %v3702_v16  ;;  %747 = vst [vmem:[#allocation2 + $0x210] sm:$0xe0] %v741_v48  ;;  %v3711_v53 = vpop.permute.xlu1 %3710  ;;  %v5320_v1 = vpop.permute.xlu0 %3705  ;;  %vm1637_vm11 = vcmask 1044480   ;;  %vm6138_vm15 = vcmask 654342  }
 0x10d   : > { %760 = vst.msk [vmem:[#allocation2 + $0x248] sm:$0x7] %vm6250_vm13, %v3703_v47  ;;  %761 = vst [vmem:[#allocation2 + $0x250] sm:$0x7] %v755_v39  ;;  %v3713_v36 = vunpack.i.h.bf16 %v3711_v53  ;;  %v3712_v20 = vunpack.i.l.bf16 %v3711_v53  ;;  %v3708_v35 = vunpack.i.h.bf16 %v5320_v1  ;;  %v3707_v30 = vunpack.i.l.bf16 %v5320_v1 }
 0x10e   : > { %345 = vst [vmem:[#allocation2 + $0x200] sm:$0x1c] %v341_v21  ;;  %360 = vst [vmem:[#allocation2 + $0x200] sm:$0xe0] %v356_v25  ;;  %vm6129_vm13 = vcmask 647168   ;;  %v4115_v52 = vmov 65535  }
 0x10f   : > { %v780_v49 = vsel %vm6115_vm0, %v6251_v43, %v3713_v36  ;;  %788 = vst.msk [vmem:[#allocation2 + $0x28] sm:$0x38] %vm6121_vm14, %v3713_v36  ;;  %v767_v19 = vsel %vm6115_vm0, %v6252_v59, %v3712_v20  ;;  %vm1638_vm0 = vcmask 1045504   ;;  %v1639_v6 = vsel %vm1637_vm11, 4294967295, %v4115_v52  ;;  %v5365_v43 = vld [vmem:[%s6026_s1] sm:$0x7] }
 0x110   : > { %775 = vst.msk [vmem:[#allocation2 + $0x28] sm:$0x7] %vm6135_vm3, %v3712_v20  ;;  %786 = vst [vmem:[#allocation2 + $0x20] sm:$0x38] %v780_v49  ;;  %v824_v60 = vpop.permute.xlu1 %823  ;;  %v3716_v18 = vpop.permute.xlu0 %3715  ;;  %v5352_v28 = vsel %vm1638_vm0, %v1639_v6, 0  ;;  %vm6124_vm11 = vcmask 1043072  }
 0x111   : > { %v1572_v4 = vld [vmem:[#allocation2 + $0x1d8] sm:$0xff]  ;;  %1117 = vst.msk [vmem:[#allocation2 + $0x218] sm:$0xe0] %vm876_vm1, %v3708_v35  ;;  %773 = vst [vmem:[#allocation2 + $0x20] sm:$0x7] %v767_v19  ;;  %v825_v44 = vsel %vm6116_vm12, %v6253_v41, %v824_v60  ;;  %v3718_v31 = vunpack.i.h.bf16 %v3716_v18  ;;  %v3717_v8 = vunpack.i.l.bf16 %v3716_v18  ;;  %vm6122_vm1 = vcmask 521219  }
 0x112   : > { %1102 = vst.msk [vmem:[#allocation2 + $0x218] sm:$0x1c] %vm860_vm10, %v3707_v30  ;;  %v1620_v61 = vpack.c.bf16 %v1572_v4, %v1564_v46  ;;  %831 = vst [vmem:[#allocation2 + $0x60] sm:$0x70] %v825_v44  ;;  %vm6123_vm10 = vcmask 1046147   ;;  %vm6125_vm12 = vcmask 518144  }
 0x113   : > { %833 = vst.msk [vmem:[#allocation2 + $0x68] sm:$0x70] %vm6120_vm5, %v824_v60  ;;  %v1578_v51 = vld [vmem:[#allocation2 + $0x208] sm:$0xff]  ;;  %v793_v45 = vsel %vm6118_vm7, %v4716_v38, %v3717_v8  ;;  %v811_v14 = vsel %vm6118_vm7, %v6254_v24, %v3718_v31  ;;  %v1579_v11 = vld [vmem:[#allocation2 + $0x210] sm:$0xff]  ;;  %vm6126_vm0 = vcmask 519169   ;;  %vm1168_vm7 = vcmask 1048198  }
 0x114   : > { %1712 = vmatprep.subr.bf16.mxu1 %v1620_v61  ;;  %v1586_v10 = vld [vmem:[#allocation2 + $0x248] sm:$0x7]  ;;  %819 = vst.msk [vmem:[#allocation2 + $0x68] sm:$0xe] %vm6117_vm8, %v3718_v31  ;;  %817 = vst [vmem:[#allocation2 + $0x60] sm:$0xe] %v811_v14  ;;  %v3726_v42 = vpop.permute.xlu1 %3725  ;;  %v3721_v38 = vpop.permute.xlu0 %3720 }
 0x115   : > { %1713 = vmatpush1.bf16.msra.mxu1 %v1619_v54  ;;  %801 = vst.msk [vmem:[#allocation2 + $0x28] sm:$0xc0] %vm6138_vm15, %v3717_v8  ;;  %v1626_v55 = vpack.c.bf16 %v1586_v10, %v1578_v51  ;;  %v1577_v62 = vld [vmem:[#allocation2 + $0x200] sm:$0xff]  ;;  %799 = vst [vmem:[#allocation2 + $0x60] ss:$-60 sps:$4 sm:$0xc1] %v793_v45   ;;  %v3728_v13 = vunpack.i.h.bf16 %v3726_v42  ;;  %v3727_v63 = vunpack.i.l.bf16 %v3726_v42  ;;  %v3723_v7 = vunpack.i.h.bf16 %v3721_v38 }
 0x116   : > { %806 = vst.msk [vmem:[#allocation2 + $0x68] sm:$0x1] %vm6129_vm13, %v3717_v8  ;;  %vm6128_vm8 = vcmask 1044097   ;;  %v1625_v57 = vpack.c.bf16 %v1585_v29, %v1577_v62  ;;  %v1587_v5 = vld [vmem:[#allocation2 + $0x250] sm:$0x7]  ;;  %v3722_v9 = vunpack.i.l.bf16 %v3721_v38  ;;  %vm6130_vm5 = vcmask 1041024  }
 0x117   : > { %v1645_v47 = vand.u32 %v5352_v28, %v1626_v55  ;;  %v1588_v22 = vld [vmem:[#allocation2 + $0x258] sm:$0x7]  ;;  %1159 = vst.msk [vmem:[#allocation2 + $0x38] sm:$0x38] %vm6122_vm1, %v3728_v13  ;;  %v1151_v48 = vsel %vm6143_vm4, %v3727_v63, %v3728_v13  ;;  %v1627_v25 = vpack.c.bf16 %v1587_v5, %v1579_v11  ;;  %vm1176_vm14 = vcmask 516096  }
 0x118   : > { %v1642_v16 = vand.u32 %v5352_v28, %v1625_v57  ;;  %1156 = vst.msk [vmem:[#allocation2 + $0x28] sm:$0x38] %vm6123_vm10, %v3727_v63  ;;  %v1138_v39 = vsel %vm6127_vm2, %v3722_v9, %v3723_v7  ;;  %1157 = vst [vmem:[#allocation2 + $0x30] sm:$0x38] %v1151_v48  ;;  %v3736_v53 = vpop.permute.xlu1 %3735  ;;  %v3731_v36 = vpop.permute.xlu0 %3730  ;;  %vm6131_vm1 = vcmask 613376   ;;  %vm6144_vm10 = vcmask 523264  }
 0x119   : > { %v1580_v32 = vld [vmem:[#allocation2 + $0x218] sm:$0xff]  ;;  %1146 = vst.msk [vmem:[#allocation2 + $0x38] sm:$0x7] %vm6125_vm12, %v3723_v7  ;;  %1144 = vst [vmem:[#allocation2 + $0x30] sm:$0x7] %v1138_v39  ;;  %1673 = vmatprep.subr.bf16.mxu0 %v1645_v47  ;;  %v3738_v20 = vunpack.i.h.bf16 %v3736_v53  ;;  %v3737_v34 = vunpack.i.l.bf16 %v3736_v53  ;;  %v3733_v46 = vunpack.i.h.bf16 %v3731_v36  ;;  %v3732_v4 = vunpack.i.l.bf16 %v3731_v36  ;;  %v6263_v36 = vld [vmem:[#allocation11_spill] sm:$0xff] }
 0x11a   : > { %1143 = vst.msk [vmem:[#allocation2 + $0x28] sm:$0x7] %vm6124_vm11, %v3722_v9  ;;  %v1628_v21 = vpack.c.bf16 %v1588_v22, %v1580_v32  ;;  %1674 = vmatpush1.bf16.msra.mxu0 %v1642_v16  ;;  %vm6133_vm11 = vcmask 1048199   ;;  %vm6137_vm12 = vcmask 523271   ;;  %v1648_v61 = vand.u32 %v5352_v28, %v1627_v25  ;;  %v6256_v55 = vld [vmem:[#allocation9_spill] sm:$0xff] }
 0x11b   : > { %1190 = vst.msk [vmem:[#allocation2 + $0x78] sm:$0xe] %vm6126_vm0, %v3738_v20  ;;  %v1182_v59 = vsel %vm6142_vm6, %v3737_v34, %v3738_v20  ;;  %v1164_v19 = vsel %vm6143_vm4, %v3732_v4, %v3733_v46  ;;  %vm6132_vm0 = vcmask 1042048   ;;  %vm6136_vm2 = vcmask 517120  }
 0x11c   : > { %v1651_v49 = vand.u32 %v5352_v28, %v1628_v21  ;;  %1187 = vst.msk [vmem:[#allocation2 + $0x68] sm:$0xe] %vm6128_vm8, %v3737_v34  ;;  %1188 = vst [vmem:[#allocation2 + $0x70] sm:$0xe] %v1182_v59  ;;  %v3746_v26 = vpop.permute.xlu1 %3745  ;;  %vm6134_vm8 = vcmask 1047172   ;;  %vm6141_vm13 = vcmask 522244   ;;  %v3741_v60 = vpop.permute.xlu0 %3740  ;;  %v6257_v62 = vunpack.i.h.bf16 %v6256_v55 }
 0x11d   : > { %1172 = vst.msk [vmem:[#allocation2 + $0x38] sm:$0xc0] %vm1171_vm9, %v3733_v46  ;;  %1170 = vst [vmem:[#allocation2 + $0x70] ss:$-60 sps:$4 sm:$0xc1] %v1164_v19   ;;  %3141 = vmatmul.mubr.msk.bf16.vlgmr.msra.gmra.mrb[0].mxu0 %vm6131_vm1, %v5365_v43  ;;  %v3748_v18 = vunpack.i.h.bf16 %v3746_v26  ;;  %v3747_v54 = vunpack.i.l.bf16 %v3746_v26  ;;  %v3743_v52 = vunpack.i.h.bf16 %v3741_v60  ;;  %v3742_v6 = vunpack.i.l.bf16 %v3741_v60  ;;  %v1517_v16 = vld [vmem:[#allocation2 + $0x20] sm:$0xff] }
 0x11e   : > { %1177 = vst.msk [vmem:[#allocation2 + $0x78] sm:$0x1] %vm1176_vm14, %v3733_v46  ;;  %1714 = vmatprep.subr.bf16.mxu1 %v1651_v49  ;;  %v6255_v41 = vmov 0   ;;  %v6258_v38 = vunpack.i.l.bf16 %v6256_v55  ;;  %v1525_v32 = vld [vmem:[#allocation2 + $0x60] sm:$0xff]  ;;  %v6260_v21 = vld [vmem:[#allocation8_spill] sm:$0xff]  ;;  %v6265_v34 = vunpack.i.l.bf16 %v4816_v2 }
 0x11f   : > { %1169 = vst.msk [vmem:[#allocation2 + $0x28] sm:$0xc0] %vm1168_vm7, %v3732_v4  ;;  %1715 = vmatpush1.bf16.msra.mxu1 %v1648_v61  ;;  %1779 = vmatprep.mubr.bf16.mxu0 %v6255_v41  ;;  %v1209_v44 = vsel %vm6144_vm10, %v3747_v54, %v3748_v18  ;;  %v1196_v31 = vsel %vm6142_vm6, %v3742_v6, %v3743_v52  ;;  %v6261_v25 = vunpack.i.h.bf16 %v6260_v21 }
 0x120   : > { %1174 = vst.msk [vmem:[#allocation2 + $0x68] sm:$0x1] %vm6130_vm5, %v3732_v4  ;;  %1215 = vst [vmem:[#allocation2 + $0xb0] ss:$-60 sps:$4 sm:$0x83] %v1209_v44   ;;  %v3756_v8 = vpop.permute.xlu1 %3755  ;;  %vm879_vm5 = vcmask 654341   ;;  %v3751_v51 = vpop.permute.xlu0 %3750 }
 0x121   : > { %1217 = vst.msk [vmem:[#allocation2 + $0x78] sm:$0x80] %vm6137_vm12, %v3748_v18  ;;  %1202 = vst [vmem:[#allocation2 + $0x70] sm:$0x70] %v1196_v31  ;;  %v3758_v10 = vunpack.i.h.bf16 %v3756_v8  ;;  %v3757_v45 = vunpack.i.l.bf16 %v3756_v8  ;;  %v3753_v24 = vunpack.i.h.bf16 %v3751_v51  ;;  %v3752_v14 = vunpack.i.l.bf16 %v3751_v51 }
 0x122   : > { %1222 = vst.msk [vmem:[#allocation2 + $0xb8] sm:$0x3] %vm6136_vm2, %v3748_v18  ;;  %3142 = vmatmul.mubr.msk.bf16.vlgmr.msra.gmra.mrb[0].mxu1 %vm6131_vm1, %v5365_v43  ;;  %vm863_vm1 = vcmask 651266   ;;  %vm6262_vm2 = vcmask 654336  }
 0x123   : > { %1214 = vst.msk [vmem:[#allocation2 + $0x68] sm:$0x80] %vm6133_vm11, %v3747_v54  ;;  %1820 = vmatprep.mubr.bf16.mxu1 %v6255_v41  ;;  %v887_v29 = vsel %vm6143_vm4, %v6257_v62, %v3757_v45  ;;  %v888_v42 = vsel %vm6143_vm4, %v3757_v45, %v3758_v10  ;;  %v871_v57 = vsel %vm6143_vm4, %v6258_v38, %v3752_v14  ;;  %vm6139_vm11 = vcmask 523269   ;;  %vm6264_vm12 = vmmov %vm6262_vm2 }
 0x124   : > { %1219 = vst.msk [vmem:[#allocation2 + $0xa8] sm:$0x3] %vm6132_vm0, %v3747_v54  ;;  %v872_v11 = vsel %vm6143_vm4, %v3752_v14, %v3753_v24  ;;  %893 = vst [vmem:[#allocation2 + $0xe0] sm:$0x7] %v887_v29  ;;  %v3766_v5 = vpop.permute.xlu1 %3765  ;;  %v3761_v13 = vpop.permute.xlu0 %3760  ;;  %vm1018_vm0 = vcmask 515072   ;;  %v1520_v49 = vld [vmem:[#allocation2 + $0x38] sm:$0xff]  ;;  %v1597_v54 = vpack.c.bf16 %v1525_v32, %v1517_v16 }
 0x125   : > { %1204 = vst.msk [vmem:[#allocation2 + $0x78] sm:$0x70] %vm6141_vm13, %v3743_v52  ;;  %878 = vst [vmem:[#allocation2 + $0xa0] sm:$0xe0] %v871_v57  ;;  %v3768_v63 = vunpack.i.h.bf16 %v3766_v5  ;;  %v3767_v7 = vunpack.i.l.bf16 %v3766_v5  ;;  %v3763_v9 = vunpack.i.h.bf16 %v3761_v13  ;;  %v3762_v47 = vunpack.i.l.bf16 %v3761_v13  ;;  %v1519_v59 = vld [vmem:[#allocation2 + $0x30] sm:$0xff] }
 0x126   : > { %1201 = vst.msk [vmem:[#allocation2 + $0x68] sm:$0x70] %vm6134_vm8, %v3742_v6  ;;  %vm6140_vm8 = vcmask 520194   ;;  %v1518_v22 = vld [vmem:[#allocation2 + $0x28] sm:$0xff]  ;;  %vm6270_vm13 = vcmask 1046147  }
 0x127   : > { %894 = vst.msk [vmem:[#allocation2 + $0xe8] sm:$0x7] %vm6135_vm3, %v888_v42  ;;  %vm6259_vm3 = vcmask 647168   ;;  %v856_v53 = vsel %vm6262_vm2, %v6261_v25, %v3767_v7  ;;  %v914_v20 = vsel %vm6264_vm12, %v6263_v36, %v3768_v63  ;;  %v902_v46 = vsel %vm6142_vm6, %v6265_v34, %v3762_v47 }
 0x128   : > { %880 = vst.msk [vmem:[#allocation2 + $0xa8] sm:$0xe0] %vm879_vm5, %v872_v11  ;;  %v903_v4 = vsel %vm6142_vm6, %v3762_v47, %v3763_v9  ;;  %v1527_v19 = vld [vmem:[#allocation2 + $0x70] sm:$0xff]  ;;  %862 = vst [vmem:[#allocation2 + $0xa0] sm:$0x1c] %v856_v53  ;;  %v3776_v61 = vpop.permute.xlu1 %3775  ;;  %v3771_v26 = vpop.permute.xlu0 %3770  ;;  %vm1051_vm12 = vcmask 506880  }
 0x129   : > { %920 = vst.msk [vmem:[#allocation2 + $0xe8] sm:$0xc0] %vm6138_vm15, %v3768_v63  ;;  %919 = vst [vmem:[#allocation2 + $0x120] ss:$-60 sps:$4 sm:$0xc1] %v914_v20   ;;  %v1599_v52 = vpack.c.bf16 %v1527_v19, %v1519_v59  ;;  %v3778_v6 = vunpack.i.h.bf16 %v3776_v61  ;;  %v3777_v44 = vunpack.i.l.bf16 %v3776_v61  ;;  %v3773_v31 = vunpack.i.h.bf16 %v3771_v26 }
 0x12a   : > { %923 = vst.msk [vmem:[#allocation2 + $0x128] sm:$0x1] %vm6259_vm3, %v3768_v63  ;;  %908 = vst [vmem:[#allocation2 + $0xe0] sm:$0x38] %v902_v46  ;;  %vm6266_vm3 = vcmask 652291   ;;  %v3772_v8 = vunpack.i.l.bf16 %v3771_v26  ;;  %vm6267_vm2 = vcmask 521219   ;;  %v6273_v19 = vunpack.i.h.bf16 %v4816_v2 }
 0x12b   : > { %864 = vst.msk [vmem:[#allocation2 + $0xa8] sm:$0x1c] %vm863_vm1, %v3767_v7  ;;  %v1246_v51 = vsel %vm1018_vm0, %v3777_v44, %v3778_v6  ;;  %vm1234_vm15 = vcmask 1045122   ;;  %v6276_v2 = vld [vmem:[#allocation10_spill] sm:$0xff] }
 0x12c   : > { %v1528_v39 = vld [vmem:[#allocation2 + $0x78] sm:$0xff]  ;;  %909 = vst.msk [vmem:[#allocation2 + $0xe8] sm:$0x38] %vm6266_vm3, %v903_v4  ;;  %v1230_v10 = vsel %vm1018_vm0, %v3772_v8, %v3773_v31  ;;  %v3781_v24 = vpop.permute.xlu0 %3780  ;;  %vm6268_vm3 = vcmask 518144   ;;  %v6277_v6 = vunpack.i.h.bf16 %v6276_v2 }
 0x12d   : > { %v1526_v48 = vld [vmem:[#allocation2 + $0x68] sm:$0xff]  ;;  %v1600_v18 = vpack.c.bf16 %v1528_v39, %v1520_v49  ;;  %1254 = vst.msk [vmem:[#allocation2 + $0xb8] sm:$0xe0] %vm6139_vm11, %v1246_v51  ;;  %v3783_v62 = vunpack.i.h.bf16 %v3781_v24  ;;  %v3782_v29 = vunpack.i.l.bf16 %v3781_v24  ;;  %vm1250_vm11 = vcmask 1048197  }
 0x12e   : > { %v1598_v60 = vpack.c.bf16 %v1526_v48, %v1518_v22  ;;  %1238 = vst.msk [vmem:[#allocation2 + $0xb8] sm:$0x1c] %vm6140_vm8, %v1230_v10  ;;  %v3786_v45 = vpop.permute.xlu1 %3785  ;;  %vm6269_vm8 = vcmask 1043072  }
 0x12f   : > { %1788 = vmatprep.subr.bf16.mxu1 %v1600_v18  ;;  %v3788_v14 = vunpack.i.h.bf16 %v3786_v45  ;;  %v3787_v55 = vunpack.i.l.bf16 %v3786_v45  ;;  %v1262_v38 = vsel %vm1051_vm12, %v3782_v29, %v3783_v62  ;;  %v1533_v51 = vld [vmem:[#allocation2 + $0xa0] sm:$0xff] }
 0x130   : > { %1747 = vmatprep.subr.bf16.mxu0 %v1598_v60  ;;  %1789 = vmatpush1.bf16.msra.mxu1 %v1599_v52  ;;  %1268 = vst.msk [vmem:[#allocation2 + $0xf8] sm:$0x7] %vm6268_vm3, %v1262_v38  ;;  %v3791_v11 = vpop.permute.xlu0 %3790  ;;  %vm6275_vm3 = vcmask 648192  }
 0x131   : > { %1748 = vmatpush1.bf16.msra.mxu0 %v1597_v54  ;;  %v1277_v42 = vsel %vm1051_vm12, %v3787_v55, %v3788_v14  ;;  %v3793_v63 = vunpack.i.h.bf16 %v3791_v11  ;;  %v3792_v7 = vunpack.i.l.bf16 %v3791_v11  ;;  %v1541_v10 = vld [vmem:[#allocation2 + $0xe0] sm:$0xff] }
 0x132   : > { %1283 = vst.msk [vmem:[#allocation2 + $0xf8] sm:$0x38] %vm6267_vm2, %v1277_v42  ;;  %v3796_v57 = vpop.permute.xlu1 %3795  ;;  %vm6274_vm2 = vcmask 654343  }
 0x133   : > { %v3798_v5 = vunpack.i.h.bf16 %v3796_v57  ;;  %v3797_v13 = vunpack.i.l.bf16 %v3796_v57  ;;  %v1245_v16 = vsel %vm1018_vm0, %v3793_v63, %v3777_v44  ;;  %v1229_v32 = vsel %vm1018_vm0, %v3792_v7, %v3772_v8  ;;  %1235 = vst.msk [vmem:[#allocation2 + $0xa8] sm:$0x1c] %vm1234_vm15, %v3792_v7 }
 0x134   : > { %1251 = vst.msk [vmem:[#allocation2 + $0xa8] sm:$0xe0] %vm1250_vm11, %v3793_v63  ;;  %1252 = vst [vmem:[#allocation2 + $0xb0] sm:$0xe0] %v1245_v16  ;;  %v3801_v48 = vpop.permute.xlu0 %3800  ;;  %v1605_v63 = vpack.c.bf16 %v1541_v10, %v1533_v51 }
 0x135   : > { %v1261_v9 = vsel %vm1051_vm12, %v3797_v13, %v3782_v29  ;;  %1266 = vst.msk [vmem:[#allocation2 + $0xe8] sm:$0x7] %vm6269_vm8, %v3797_v13  ;;  %v1276_v47 = vsel %vm1051_vm12, %v3798_v5, %v3787_v55  ;;  %1236 = vst [vmem:[#allocation2 + $0xb0] sm:$0x1c] %v1229_v32  ;;  %v3803_v25 = vunpack.i.h.bf16 %v3801_v48  ;;  %v3802_v53 = vunpack.i.l.bf16 %v3801_v48  ;;  %v1536_v8 = vld [vmem:[#allocation2 + $0xb8] sm:$0xff] }
 0x136   : > { %1281 = vst.msk [vmem:[#allocation2 + $0xe8] sm:$0x38] %vm6270_vm13, %v3798_v5  ;;  %1267 = vst [vmem:[#allocation2 + $0xf0] sm:$0x7] %v1261_v9  ;;  %v3806_v22 = vpop.permute.xlu1 %3805  ;;  %vm6271_vm8 = vcmask 1041024   ;;  %vm6272_vm13 = vcmask 653316   ;;  %v6280_v55 = vunpack.i.l.bf16 %v5038_v58 }
 0x137   : > { %1282 = vst [vmem:[#allocation2 + $0xf0] sm:$0x38] %v1276_v47  ;;  %v3808_v39 = vunpack.i.h.bf16 %v3806_v22  ;;  %v3807_v21 = vunpack.i.l.bf16 %v3806_v22  ;;  %1294 = vst.msk [vmem:[#allocation2 + $0xf8] sm:$0xc0] %vm1171_vm9, %v3803_v25  ;;  %v1288_v34 = vsel %vm6144_vm10, %v3802_v53, %v3803_v25 }
 0x138   : > { %1297 = vst.msk [vmem:[#allocation2 + $0x138] sm:$0x1] %vm1176_vm14, %v3803_v25  ;;  %1293 = vst [vmem:[#allocation2 + $0x130] ss:$-60 sps:$4 sm:$0xc1] %v1288_v34   ;;  %v3811_v17 = vpop.permute.xlu0 %3810 }
 0x139   : > { %v942_v36 = vsel %vm6143_vm4, %v3552_v12, %v3807_v21  ;;  %v943_v20 = vsel %vm6143_vm4, %v3807_v21, %v3808_v39  ;;  %1292 = vst.msk [vmem:[#allocation2 + $0xe8] sm:$0xc0] %vm1168_vm7, %v3802_v53  ;;  %v3813_v49 = vunpack.i.h.bf16 %v3811_v17  ;;  %v3812_v59 = vunpack.i.l.bf16 %v3811_v17 }
 0x13a   : > { %1295 = vst.msk [vmem:[#allocation2 + $0x128] sm:$0x1] %vm6271_vm8, %v3802_v53  ;;  %948 = vst [vmem:[#allocation2 + $0x120] sm:$0x70] %v942_v36  ;;  %v3816_v46 = vpop.permute.xlu1 %3815  ;;  %vm6278_vm8 = vcmask 654336  }
 0x13b   : > { %949 = vst.msk [vmem:[#allocation2 + $0x128] sm:$0x70] %vm6272_vm13, %v943_v20  ;;  %v3818_v4 = vunpack.i.h.bf16 %v3816_v46  ;;  %v3817_v12 = vunpack.i.l.bf16 %v3816_v46  ;;  %v957_v60 = vsel %vm6143_vm4, %v5012_v3, %v3812_v59  ;;  %v958_v18 = vsel %vm6143_vm4, %v3812_v59, %v3813_v49  ;;  %v1534_v45 = vld [vmem:[#allocation2 + $0xa8] sm:$0xff] }
 0x13c   : > { %963 = vst [vmem:[#allocation2 + $0x160] ss:$-60 sps:$4 sm:$0x83] %v957_v60   ;;  %964 = vst.msk [vmem:[#allocation2 + $0x128] sm:$0x80] %vm6274_vm2, %v958_v18  ;;  %v3821_v52 = vpop.permute.xlu0 %3820  ;;  %vm6279_vm13 = vcmask 650241  }
 0x13d   : > { %v975_v61 = vsel %vm6142_vm6, %v6273_v19, %v3817_v12  ;;  %v976_v26 = vsel %vm6142_vm6, %v3817_v12, %v3818_v4  ;;  %967 = vst.msk [vmem:[#allocation2 + $0x168] sm:$0x3] %vm6275_vm3, %v958_v18  ;;  %v3823_v31 = vunpack.i.h.bf16 %v3821_v52  ;;  %v3822_v3 = vunpack.i.l.bf16 %v3821_v52  ;;  %v1535_v57 = vld [vmem:[#allocation2 + $0xb0] sm:$0xff] }
 0x13e   : > { %981 = vst [vmem:[#allocation2 + $0x160] sm:$0x1c] %v975_v61  ;;  %982 = vst.msk [vmem:[#allocation2 + $0x168] sm:$0x1c] %vm863_vm1, %v976_v26  ;;  %v927_v54 = vpop.permute.xlu1 %926  ;;  %v1544_v14 = vld [vmem:[#allocation2 + $0xf8] sm:$0xff]  ;;  %vm6281_vm2 = vcmask 522244  }
 0x13f   : > { %v928_v44 = vsel %vm6278_vm8, %v6277_v6, %v927_v54  ;;  %934 = vst.msk [vmem:[#allocation2 + $0x128] sm:$0xe] %vm6279_vm13, %v927_v54  ;;  %v990_v62 = vsel %vm6144_vm10, %v6280_v55, %v3822_v3  ;;  %v991_v29 = vsel %vm6144_vm10, %v3822_v3, %v3823_v31  ;;  %v1608_v38 = vpack.c.bf16 %v1544_v14, %v1536_v8  ;;  %v1543_v11 = vld [vmem:[#allocation2 + $0xf0] sm:$0xff] }
 0x140   : > { %933 = vst [vmem:[#allocation2 + $0x120] sm:$0xe] %v928_v44  ;;  %v1542_v24 = vld [vmem:[#allocation2 + $0xe8] sm:$0xff]  ;;  %996 = vst [vmem:[#allocation2 + $0x160] sm:$0xe0] %v990_v62  ;;  %v3826_v13 = vpop.permute.xlu0 %3825  ;;  %v1607_v7 = vpack.c.bf16 %v1543_v11, %v1535_v57  ;;  %vm6282_vm3 = vcmask 519169  }
 0x141   : > { %v1606_v42 = vpack.c.bf16 %v1542_v24, %v1534_v45  ;;  %997 = vst.msk [vmem:[#allocation2 + $0x168] sm:$0xe0] %vm879_vm5, %v991_v29  ;;  %v3828_v16 = vunpack.i.h.bf16 %v3826_v13  ;;  %v3827_v32 = vunpack.i.l.bf16 %v3826_v13  ;;  %1790 = vmatprep.subr.bf16.mxu1 %v1608_v38  ;;  %vm6283_vm8 = vcmask 520194  }
 0x142   : > { %v3831_v5 = vpop.permute.xlu1 %3830  ;;  %1791 = vmatpush1.bf16.msra.mxu1 %v1607_v7  ;;  %vm6284_vm13 = vcmask 523271   ;;  %vm6285_vm6 = vcmask 517120   ;;  %vm6287_vm4 = vcmask 1047172   ;;  %v6291_v29 = vunpack.i.h.bf16 %v5038_v58 }
 0x143   : > { %v3833_v9 = vunpack.i.h.bf16 %v3831_v5  ;;  %v3832_v47 = vunpack.i.l.bf16 %v3831_v5  ;;  %1749 = vmatprep.subr.bf16.mxu0 %v1606_v42  ;;  %v1305_v48 = vsel %vm1018_vm0, %v3827_v32, %v3828_v16 }
 0x144   : > { %1750 = vmatpush1.bf16.msra.mxu0 %v1605_v63  ;;  %1311 = vst.msk [vmem:[#allocation2 + $0x138] sm:$0xe] %vm6282_vm3, %v1305_v48  ;;  %v3836_v21 = vpop.permute.xlu0 %3835  ;;  %vm6286_vm3 = vcmask 1044097  }
 0x145   : > { %v1320_v22 = vsel %vm1018_vm0, %v3832_v47, %v3833_v9  ;;  %v3838_v36 = vunpack.i.h.bf16 %v3836_v21  ;;  %v3837_v20 = vunpack.i.l.bf16 %v3836_v21 }
 0x146   : > { %1326 = vst.msk [vmem:[#allocation2 + $0x138] sm:$0x70] %vm6281_vm2, %v1320_v22  ;;  %v3841_v39 = vpop.permute.xlu1 %3840  ;;  %vm1366_vm2 = vcmask 392192  }
 0x147   : > { %v3843_v25 = vunpack.i.h.bf16 %v3841_v39  ;;  %v3842_v53 = vunpack.i.l.bf16 %v3841_v39  ;;  %v1335_v46 = vsel %vm1051_vm12, %v3837_v20, %v3838_v36  ;;  %v1557_v58 = vld [vmem:[#allocation2 + $0x160] sm:$0xff] }
 0x148   : > { %1341 = vst.msk [vmem:[#allocation2 + $0x138] sm:$0x80] %vm6284_vm13, %v1335_v46  ;;  %v3846_v4 = vpop.permute.xlu0 %3845  ;;  %vm6292_vm13 = vcmask 652291   ;;  %v1549_v21 = vld [vmem:[#allocation2 + $0x120] sm:$0xff] }
 0x149   : > { %v1353_v34 = vsel %vm1051_vm12, %v3842_v53, %v3843_v25  ;;  %1344 = vst.msk [vmem:[#allocation2 + $0x178] sm:$0x3] %vm6285_vm6, %v1335_v46  ;;  %v3848_v59 = vunpack.i.h.bf16 %v3846_v4  ;;  %v3847_v19 = vunpack.i.l.bf16 %v3846_v4  ;;  %vm6288_vm6 = vcmask 523269  }
 0x14a   : > { %1359 = vst.msk [vmem:[#allocation2 + $0x178] sm:$0x1c] %vm6283_vm8, %v1353_v34  ;;  %v3851_v17 = vpop.permute.xlu1 %3850  ;;  %vm6290_vm8 = vcmask 1042048   ;;  %v1613_v34 = vpack.c.bf16 %v1557_v58, %v1549_v21 }
 0x14b   : > { %v3853_v12 = vunpack.i.h.bf16 %v3851_v17  ;;  %v3852_v49 = vunpack.i.l.bf16 %v3851_v17  ;;  %v1368_v60 = vsel %vm1366_vm2, %v3847_v19, %v3848_v59 }
 0x14c   : > { %1374 = vst.msk [vmem:[#allocation2 + $0x178] sm:$0xe0] %vm6288_vm6, %v1368_v60  ;;  %v3856_v54 = vpop.permute.xlu0 %3855  ;;  %vm6294_vm6 = vcmask 650241  }
 0x14d   : > { %v1304_v61 = vsel %vm1018_vm0, %v3852_v49, %v3827_v32  ;;  %1309 = vst.msk [vmem:[#allocation2 + $0x128] sm:$0xe] %vm6286_vm3, %v3852_v49  ;;  %v1319_v26 = vsel %vm1018_vm0, %v3853_v12, %v3832_v47  ;;  %v3858_v2 = vunpack.i.h.bf16 %v3856_v54  ;;  %v3857_v6 = vunpack.i.l.bf16 %v3856_v54 }
 0x14e   : > { %1324 = vst.msk [vmem:[#allocation2 + $0x128] sm:$0x70] %vm6287_vm4, %v3853_v12  ;;  %1310 = vst [vmem:[#allocation2 + $0x130] sm:$0xe] %v1304_v61  ;;  %v5474_v18 = vpop.permute.xlu1 %3860  ;;  %vm6289_vm4 = vcmask 1048199   ;;  %vm6293_vm3 = vcmask 649216  }
 0x14f   : > { %1325 = vst [vmem:[#allocation2 + $0x130] sm:$0x70] %v1319_v26  ;;  %v3862_v52 = vunpack.i.l.bf16 %v5474_v18  ;;  %v1352_v31 = vsel %vm1051_vm12, %v3858_v2, %v3842_v53  ;;  %1357 = vst.msk [vmem:[#allocation2 + $0x168] sm:$0x1c] %vm1234_vm15, %v3858_v2  ;;  %v1334_v3 = vsel %vm1051_vm12, %v3857_v6, %v3837_v20  ;;  %v1552_v57 = vld [vmem:[#allocation2 + $0x138] sm:$0xff] }
 0x150   : > { %1339 = vst.msk [vmem:[#allocation2 + $0x128] sm:$0x80] %vm6289_vm4, %v3857_v6  ;;  %1358 = vst [vmem:[#allocation2 + $0x170] sm:$0x1c] %v1352_v31  ;;  %v3866_v51 = vpop.permute.xlu0 %3865  ;;  %vm6295_vm4 = vcmask 654342  }
 0x151   : > { %v1367_v44 = vsel %vm1366_vm2, %v3862_v52, %v3847_v19  ;;  %1372 = vst.msk [vmem:[#allocation2 + $0x168] sm:$0xe0] %vm1250_vm11, %v3862_v52  ;;  %1340 = vst [vmem:[#allocation2 + $0x170] ss:$-60 sps:$4 sm:$0x83] %v1334_v3   ;;  %v3868_v24 = vunpack.i.h.bf16 %v3866_v51  ;;  %v3867_v14 = vunpack.i.l.bf16 %v3866_v51 }
 0x152   : > { %1342 = vst.msk [vmem:[#allocation2 + $0x168] sm:$0x3] %vm6290_vm8, %v3857_v6  ;;  %1373 = vst [vmem:[#allocation2 + $0x170] sm:$0xe0] %v1367_v44  ;;  %v3871_v8 = vpop.permute.xlu1 %3870  ;;  %vm6296_vm8 = vcmask 647168  }
 0x153   : > { %v3873_v10 = vunpack.i.h.bf16 %v3871_v8  ;;  %v3872_v45 = vunpack.i.l.bf16 %v3871_v8  ;;  %v1004_v42 = vsel %vm6144_vm10, %v6291_v29, %v3867_v14  ;;  %v1005_v38 = vsel %vm6144_vm10, %v3867_v14, %v3868_v24  ;;  %v1560_v11 = vld [vmem:[#allocation2 + $0x178] sm:$0xff] }
 0x154   : > { %1010 = vst [vmem:[#allocation2 + $0x1a0] sm:$0x7] %v1004_v42  ;;  %1011 = vst.msk [vmem:[#allocation2 + $0x1a8] sm:$0x7] %vm6293_vm3, %v1005_v38  ;;  %v3876_v15 = vpop.permute.xlu0 %3875  ;;  %v1616_v13 = vpack.c.bf16 %v1560_v11, %v1552_v57  ;;  %vm6298_vm3 = vcmask 648192   ;;  %v3863_v24 = vunpack.i.h.bf16 %v5474_v18 }
 0x155   : > { %v1019_v55 = vsel %vm1018_vm0, %v3682_v23, %v3872_v45  ;;  %v1020_v62 = vsel %vm1018_vm0, %v3872_v45, %v3873_v10  ;;  %v3878_v7 = vunpack.i.h.bf16 %v3876_v15  ;;  %v3877_v9 = vunpack.i.l.bf16 %v3876_v15 }
 0x156   : > { %1025 = vst [vmem:[#allocation2 + $0x1a0] sm:$0x38] %v1019_v55  ;;  %1026 = vst.msk [vmem:[#allocation2 + $0x1a8] sm:$0x38] %vm6292_vm13, %v1020_v62  ;;  %v3881_v5 = vpop.permute.xlu1 %3880  ;;  %1792 = vmatprep.subr.bf16.mxu1 %v1616_v13  ;;  %vm6297_vm13 = vcmask 654343  }
 0x157   : > { %v3883_v23 = vunpack.i.h.bf16 %v3881_v5  ;;  %v3882_v63 = vunpack.i.l.bf16 %v3881_v5  ;;  %v1550_v47 = vld [vmem:[#allocation2 + $0x128] sm:$0xff]  ;;  %v1034_v48 = vsel %vm1018_vm0, %v5268_v37, %v3877_v9  ;;  %v1035_v39 = vsel %vm1018_vm0, %v3877_v9, %v3878_v7 }
 0x158   : > { %v1551_v25 = vld [vmem:[#allocation2 + $0x130] sm:$0xff]  ;;  %1040 = vst [vmem:[#allocation2 + $0x1e0] ss:$-60 sps:$4 sm:$0xc1] %v1034_v48   ;;  %1041 = vst.msk [vmem:[#allocation2 + $0x1a8] sm:$0xc0] %vm6295_vm4, %v1035_v39 }
 0x159   : > { %v1558_v16 = vld [vmem:[#allocation2 + $0x168] sm:$0xff]  ;;  %v1052_v32 = vsel %vm1051_vm12, %v3687_v33, %v3882_v63  ;;  %v1053_v22 = vsel %vm1051_vm12, %v3882_v63, %v3883_v23  ;;  %v1559_v53 = vld [vmem:[#allocation2 + $0x170] sm:$0xff]  ;;  %1044 = vst.msk [vmem:[#allocation2 + $0x1e8] sm:$0x1] %vm6296_vm8, %v1035_v39  ;;  %v3886_v33 = vpop.permute.xlu0 %3885  ;;  %vm1381_vm4 = vcmask 384000   ;;  %vm6300_vm8 = vcmask 521219  }
 0x15a   : > { %1058 = vst [vmem:[#allocation2 + $0x1e0] sm:$0xe] %v1052_v32  ;;  %1059 = vst.msk [vmem:[#allocation2 + $0x1e8] sm:$0xe] %vm6294_vm6, %v1053_v22  ;;  %v3891_v36 = vpop.permute.xlu1 %3890  ;;  %v1614_v20 = vpack.c.bf16 %v1558_v16, %v1550_v47  ;;  %v1615_v46 = vpack.c.bf16 %v1559_v53, %v1551_v25  ;;  %v3888_v4 = vunpack.i.h.bf16 %v3886_v33  ;;  %v3887_v12 = vunpack.i.l.bf16 %v3886_v33 }
 0x15b   : > { %v3893_v17 = vunpack.i.h.bf16 %v3891_v36  ;;  %v3892_v37 = vunpack.i.l.bf16 %v3891_v36  ;;  %vm6299_vm6 = vcmask 653316  }
 0x15c   : > { %1751 = vmatprep.subr.bf16.mxu0 %v1614_v20  ;;  %1793 = vmatpush1.bf16.msra.mxu1 %v1615_v46  ;;  %v1066_v19 = vsel %vm6144_vm10, %v3692_v50, %v3887_v12  ;;  %v1067_v61 = vsel %vm6144_vm10, %v3887_v12, %v3888_v4 }
 0x15d   : > { %v1080_v49 = vsel %vm6144_vm10, %v5289_v27, %v3892_v37  ;;  %v1081_v59 = vsel %vm6144_vm10, %v3892_v37, %v3893_v17  ;;  %1752 = vmatpush1.bf16.msra.mxu0 %v1613_v34  ;;  %1072 = vst [vmem:[#allocation2 + $0x1e0] sm:$0x70] %v1066_v19  ;;  %1073 = vst.msk [vmem:[#allocation2 + $0x1e8] sm:$0x70] %vm6299_vm6, %v1067_v61  ;;  %v3896_v27 = vpop.permute.xlu0 %3895  ;;  %vm6301_vm10 = vcmask 518144   ;;  %vm6304_vm6 = vcmask 523271  }
 0x15e   : > { %1086 = vst [vmem:[#allocation2 + $0x220] ss:$-60 sps:$4 sm:$0x83] %v1080_v49   ;;  %1087 = vst.msk [vmem:[#allocation2 + $0x1e8] sm:$0x80] %vm6297_vm13, %v1081_v59  ;;  %v3901_v26 = vpop.permute.xlu1 %3900  ;;  %v3898_v52 = vunpack.i.h.bf16 %v3896_v27  ;;  %v3897_v0 = vunpack.i.l.bf16 %v3896_v27  ;;  %vm1411_vm13 = vcmask 375808  }
 0x15f   : > { %1090 = vst.msk [vmem:[#allocation2 + $0x228] sm:$0x3] %vm6298_vm3, %v1081_v59  ;;  %v3903_v60 = vunpack.i.h.bf16 %v3901_v26  ;;  %v3902_v54 = vunpack.i.l.bf16 %v3901_v26  ;;  %vm6303_vm3 = vcmask 1047172  }
 0x160   : > { %v1383_v2 = vsel %vm1381_vm4, %v3897_v0, %v3898_v52 }
 0x161   : > { %v1397_v50 = vsel %vm1381_vm4, %v3902_v54, %v3903_v60  ;;  %1389 = vst.msk [vmem:[#allocation2 + $0x1b8] sm:$0x7] %vm6301_vm10, %v1383_v2  ;;  %v5520_v44 = vpop.permute.xlu0 %3905  ;;  %vm6302_vm10 = vcmask 519169  }
 0x162   : > { %1403 = vst.msk [vmem:[#allocation2 + $0x1b8] sm:$0x38] %vm6300_vm8, %v1397_v50  ;;  %v5518_v6 = vpop.permute.xlu1 %3910  ;;  %v3908_v8 = vunpack.i.h.bf16 %v5520_v44  ;;  %v3907_v51 = vunpack.i.l.bf16 %v5520_v44  ;;  %vm6305_vm8 = vcmask 517120  }
 0x163   : > { %v3913_v31 = vunpack.i.h.bf16 %v5518_v6  ;;  %v3912_v3 = vunpack.i.l.bf16 %v5518_v6 }
 0x164   : > { %v1413_v45 = vsel %vm1411_vm13, %v3907_v51, %v3908_v8 }
 0x165   : > { %v1431_v10 = vsel %vm1411_vm13, %v3912_v3, %v3913_v31  ;;  %1419 = vst.msk [vmem:[#allocation2 + $0x1b8] sm:$0xc0] %vm1171_vm9, %v1413_v45  ;;  %v3916_v55 = vpop.permute.xlu0 %3915  ;;  %vm6306_vm9 = vcmask 522244   ;;  %v1573_v8 = vld [vmem:[#allocation2 + $0x1e0] sm:$0xff] }
 0x166   : > { %1437 = vst.msk [vmem:[#allocation2 + $0x1f8] sm:$0xe] %vm6302_vm10, %v1431_v10  ;;  %v3921_v14 = vpop.permute.xlu1 %3920  ;;  %v3918_v42 = vunpack.i.h.bf16 %v3916_v55  ;;  %v3917_v38 = vunpack.i.l.bf16 %v3916_v55  ;;  %vm6311_vm10 = vcmask 1042048  }
 0x167   : > { %1422 = vst.msk [vmem:[#allocation2 + $0x1f8] sm:$0x1] %vm1176_vm14, %v1413_v45  ;;  %v3923_v62 = vunpack.i.h.bf16 %v3921_v14  ;;  %v3922_v29 = vunpack.i.l.bf16 %v3921_v14  ;;  %vm6307_vm14 = vcmask 1043072  }
 0x168   : > { %v1444_v11 = vsel %vm1366_vm2, %v3918_v42, %v3863_v24  ;;  %v1445_v5 = vsel %vm1366_vm2, %v3863_v24, %v3917_v38  ;;  %1449 = vst.msk [vmem:[#allocation2 + $0x1e8] sm:$0x70] %vm6303_vm3, %v3918_v42  ;;  %vm6308_vm2 = vcmask 1046147   ;;  %vm6312_vm3 = vcmask 1044097  }
 0x169   : > { %v1459_v57 = vsel %vm1381_vm4, %v3922_v29, %v3923_v62  ;;  %1450 = vst [vmem:[#allocation2 + $0x1f0] sm:$0x70] %v1444_v11  ;;  %1451 = vst.msk [vmem:[#allocation2 + $0x1f8] sm:$0x70] %vm6306_vm9, %v1445_v5  ;;  %v3926_v15 = vpop.permute.xlu0 %3925  ;;  %v1565_v62 = vld [vmem:[#allocation2 + $0x1a0] sm:$0xff]  ;;  %vm1838_vm9 = vcmask 130048  }
 0x16a   : > { %1465 = vst.msk [vmem:[#allocation2 + $0x1f8] sm:$0x80] %vm6304_vm6, %v1459_v57  ;;  %v3931_v18 = vpop.permute.xlu1 %3930  ;;  %v3928_v63 = vunpack.i.h.bf16 %v3926_v15  ;;  %v3927_v7 = vunpack.i.l.bf16 %v3926_v15  ;;  %vm6313_vm6 = vcmask 1041024   ;;  %v1621_v38 = vpack.c.bf16 %v1573_v8, %v1565_v62 }
 0x16b   : > { %1468 = vst.msk [vmem:[#allocation2 + $0x238] sm:$0x3] %vm6305_vm8, %v1459_v57  ;;  %v3933_v13 = vunpack.i.h.bf16 %v3931_v18  ;;  %v3932_v23 = vunpack.i.l.bf16 %v3931_v18  ;;  %vm6315_vm8 = vcmask 520194  }
 0x16c   : > { %v1097_v47 = vsel %vm1018_vm0, %v3707_v30, %v3927_v7  ;;  %v1098_v16 = vsel %vm1018_vm0, %v3927_v7, %v3928_v63  ;;  %v1568_v36 = vld [vmem:[#allocation2 + $0x1b8] sm:$0xff] }
 0x16d   : > { %v1112_v9 = vsel %vm1018_vm0, %v3708_v35, %v3932_v23  ;;  %v1113_v58 = vsel %vm1018_vm0, %v3932_v23, %v3933_v13  ;;  %1103 = vst [vmem:[#allocation2 + $0x220] sm:$0x1c] %v1097_v47  ;;  %1104 = vst.msk [vmem:[#allocation2 + $0x228] sm:$0x1c] %vm863_vm1, %v1098_v16  ;;  %v3936_v22 = vpop.permute.xlu0 %3935  ;;  %vm6310_vm1 = vcmask 1048199  }
 0x16e   : > { %1118 = vst [vmem:[#allocation2 + $0x220] sm:$0xe0] %v1112_v9  ;;  %1119 = vst.msk [vmem:[#allocation2 + $0x228] sm:$0xe0] %vm879_vm5, %v1113_v58  ;;  %v3941_v32 = vpop.permute.xlu1 %3940  ;;  %v3938_v21 = vunpack.i.h.bf16 %v3936_v22  ;;  %v3937_v35 = vunpack.i.l.bf16 %v3936_v22  ;;  %vm6309_vm5 = vcmask 649216  }
 0x16f   : > { %v3943_v48 = vunpack.i.h.bf16 %v3941_v32  ;;  %v3942_v39 = vunpack.i.l.bf16 %v3941_v32 }
 0x170   : > { %v1126_v30 = vsel %vm1051_vm12, %v3688_v56, %v3937_v35  ;;  %v1127_v53 = vsel %vm1051_vm12, %v3937_v35, %v3938_v21 }
 0x171   : > { %v1382_v25 = vsel %vm1381_vm4, %v3942_v39, %v3897_v0  ;;  %1387 = vst.msk [vmem:[#allocation2 + $0x1a8] sm:$0x7] %vm6307_vm14, %v3942_v39  ;;  %v1396_v1 = vsel %vm1381_vm4, %v3943_v48, %v3902_v54  ;;  %v1576_v33 = vld [vmem:[#allocation2 + $0x1f8] sm:$0xff]  ;;  %1132 = vst [vmem:[#allocation2 + $0x260] sm:$0x7] %v1126_v30  ;;  %v3946_v34 = vpop.permute.xlu0 %3945 }
 0x172   : > { %1401 = vst.msk [vmem:[#allocation2 + $0x1a8] sm:$0x38] %vm6308_vm2, %v3943_v48  ;;  %1388 = vst [vmem:[#allocation2 + $0x1b0] sm:$0x7] %v1382_v25  ;;  %v3951_v20 = vpop.permute.xlu1 %3950  ;;  %v1624_v46 = vpack.c.bf16 %v1576_v33, %v1568_v36  ;;  %v3948_v37 = vunpack.i.h.bf16 %v3946_v34  ;;  %v3947_v4 = vunpack.i.l.bf16 %v3946_v34  ;;  %vm1889_vm2 = vcmask 259072  }
 0x173   : > { %1402 = vst [vmem:[#allocation2 + $0x1b0] sm:$0x38] %v1396_v1  ;;  %1133 = vst.msk [vmem:[#allocation2 + $0x268] sm:$0x7] %vm6309_vm5, %v1127_v53  ;;  %v3952_v17 = vunpack.i.l.bf16 %v3951_v20  ;;  %v3953_v49 = vunpack.i.h.bf16 %v3951_v20  ;;  %vm2235_vm5 = vcmask 179200  }
 0x174   : > { %1794 = vmatprep.subr.bf16.mxu1 %v1624_v46  ;;  %v1430_v56 = vsel %vm1411_vm13, %v3948_v37, %v3912_v3  ;;  %1435 = vst.msk [vmem:[#allocation2 + $0x1e8] sm:$0xe] %vm6312_vm3, %v3948_v37  ;;  %v1412_v12 = vsel %vm1411_vm13, %v3947_v4, %v3907_v51  ;;  %vm6321_vm3 = vcmask 769024  }
 0x175   : > { %v1458_v40 = vsel %vm1381_vm4, %v3952_v17, %v3922_v29  ;;  %1463 = vst.msk [vmem:[#allocation2 + $0x1e8] sm:$0x80] %vm6310_vm1, %v3952_v17  ;;  %1436 = vst [vmem:[#allocation2 + $0x1f0] sm:$0xe] %v1430_v56  ;;  %v3956_v19 = vpop.permute.xlu0 %3955  ;;  %v1581_v5 = vld [vmem:[#allocation2 + $0x220] sm:$0xff]  ;;  %vm1940_vm1 = vcmask 1014784  }
 0x176   : > { %1466 = vst.msk [vmem:[#allocation2 + $0x228] sm:$0x3] %vm6311_vm10, %v3952_v17  ;;  %1464 = vst [vmem:[#allocation2 + $0x230] ss:$-60 sps:$4 sm:$0x83] %v1458_v40   ;;  %v3961_v59 = vpop.permute.xlu1 %3960  ;;  %v3958_v27 = vunpack.i.h.bf16 %v3956_v19  ;;  %v3957_v60 = vunpack.i.l.bf16 %v3956_v19  ;;  %vm1981_vm10 = vcmask 891904  }
 0x177   : > { %1417 = vst.msk [vmem:[#allocation2 + $0x1a8] sm:$0xc0] %vm1168_vm7, %v3947_v4  ;;  %1418 = vst [vmem:[#allocation2 + $0x1f0] ss:$-60 sps:$4 sm:$0xc1] %v1412_v12   ;;  %v3963_v61 = vunpack.i.h.bf16 %v3961_v59  ;;  %v3962_v26 = vunpack.i.l.bf16 %v3961_v59  ;;  %vm6314_vm7 = vcmask 523269  }
 0x178   : > { %1420 = vst.msk [vmem:[#allocation2 + $0x1e8] sm:$0x1] %vm6313_vm6, %v3947_v4  ;;  %v1475_v52 = vsel %vm1381_vm4, %v3958_v27, %v3953_v49  ;;  %v1476_v0 = vsel %vm1381_vm4, %v3953_v49, %v3957_v60  ;;  %vm6316_vm4 = vmmov %vm6307_vm14  ;;  %v1589_v11 = vld [vmem:[#allocation2 + $0x260] sm:$0x7]  ;;  %vm1871_vm14 = vcmask 261120   ;;  %vm6322_vm6 = vcmask 646144  }
 0x179   : > { %v1491_v54 = vsel %vm1411_vm13, %v3962_v26, %v3963_v61  ;;  %1480 = vst.msk [vmem:[#allocation2 + $0x228] sm:$0x1c] %vm1234_vm15, %v3958_v27  ;;  %1481 = vst [vmem:[#allocation2 + $0x230] sm:$0x1c] %v1475_v52  ;;  %v3966_v2 = vpop.permute.xlu0 %3965  ;;  %vm6317_vm15 = vcmask 518144   ;;  %v1629_v13 = vpack.c.bf16 %v1589_v11, %v1581_v5 }
 0x17a   : > { %1497 = vst.msk [vmem:[#allocation2 + $0x238] sm:$0xe0] %vm6314_vm7, %v1491_v54  ;;  %v3971_v50 = vpop.permute.xlu1 %3970  ;;  %v3968_v31 = vunpack.i.h.bf16 %v3966_v2  ;;  %v3967_v3 = vunpack.i.l.bf16 %v3966_v2  ;;  %vm6323_vm7 = vcmask 523264  }
 0x17b   : > { %1482 = vst.msk [vmem:[#allocation2 + $0x238] sm:$0x1c] %vm6315_vm8, %v1476_v0  ;;  %v3973_v6 = vunpack.i.h.bf16 %v3971_v50  ;;  %v3972_v44 = vunpack.i.l.bf16 %v3971_v50  ;;  %v1654_v22 = vand.u32 %v5352_v28, %v1629_v13  ;;  %v2215_v13 = vld [vmem:[%s6029_s4 + $0x8] sm:$0xff]  ;;  %vm1903_vm8 = vcmask 261126  }
 0x17c   : > { %v1505_v14 = vsel %vm1411_vm13, %v3967_v3, %v3968_v31 }
 0x17d   : > { %v1490_v45 = vsel %vm1411_vm13, %v3972_v44, %v3962_v26  ;;  %1495 = vst.msk [vmem:[#allocation2 + $0x228] sm:$0xe0] %vm1250_vm11, %v3972_v44  ;;  %v1504_v24 = vsel %vm1411_vm13, %v3973_v6, %v3967_v3  ;;  %vm6318_vm11 = vcmask 613376  }
 0x17e   : > { %v1566_v51 = vld [vmem:[#allocation2 + $0x1a8] sm:$0xff]  ;;  %1509 = vst.msk [vmem:[#allocation2 + $0x268] sm:$0x7] %vm6316_vm4, %v3973_v6  ;;  %v1567_v29 = vld [vmem:[#allocation2 + $0x1b0] sm:$0xff]  ;;  %1496 = vst [vmem:[#allocation2 + $0x230] sm:$0xe0] %v1490_v45 }
 0x17f   : > { %v1574_v10 = vld [vmem:[#allocation2 + $0x1e8] sm:$0xff]  ;;  %v1575_v42 = vld [vmem:[#allocation2 + $0x1f0] sm:$0xff]  ;;  %1510 = vst [vmem:[#allocation2 + $0x270] sm:$0x7] %v1504_v24  ;;  %1511 = vst.msk [vmem:[#allocation2 + $0x278] sm:$0x7] %vm6317_vm15, %v1505_v14 }
 0x180   : > { %v1622_v55 = vpack.c.bf16 %v1574_v10, %v1566_v51  ;;  %v1623_v57 = vpack.c.bf16 %v1575_v42, %v1567_v29  ;;  %vm6319_vm13 = vmmov %vm6318_vm11  ;;  %vm1906_vm4 = vcmask 257024   ;;  %vm6324_vm15 = vcmask 1039360  }
 0x182   : > { %1753 = vmatprep.subr.bf16.mxu0 %v1622_v55  ;;  %1795 = vmatpush1.bf16.msra.mxu1 %v1623_v57  ;;  %v1584_v23 = vld [vmem:[#allocation2 + $0x238] sm:$0xff] }
 0x183   : > { %1754 = vmatpush1.bf16.msra.mxu0 %v1621_v38 }
 0x184   : > { %v1582_v18 = vld [vmem:[#allocation2 + $0x228] sm:$0xff] }
 0x185   : > { %v1590_v15 = vld [vmem:[#allocation2 + $0x268] sm:$0x7]  ;;  %v1583_v9 = vld [vmem:[#allocation2 + $0x230] sm:$0xff] }
 0x186   : > { %v1630_v63 = vpack.c.bf16 %v1590_v15, %v1582_v18  ;;  %v1592_v7 = vld [vmem:[#allocation2 + $0x278] sm:$0x7]  ;;  %v1591_v58 = vld [vmem:[#allocation2 + $0x270] sm:$0x7]  ;;  %v3976_v15 = vld [vmem:[%s6028_s3 + $0x4] ss:$8 sps:$4 sm:$0xff]  }
 0x187   : > { %v1632_v47 = vpack.c.bf16 %v1592_v7, %v1584_v23  ;;  %v1631_v16 = vpack.c.bf16 %v1591_v58, %v1583_v9  ;;  %v2214_v23 = vld [vmem:[%s6029_s4] sm:$0xff]  ;;  %v3980_v7 = vld [vmem:[%s6030_s5 + $0x8] sm:$0xff]   ;;  %v3981_v9 = vld [vmem:[%s6030_s5 + $0x10] sm:$0xff]  }
 0x188   : > { %v1657_v32 = vand.u32 %v5352_v28, %v1630_v63  ;;  %v3979_v63 = vld [vmem:[%s6030_s5] sm:$0xff]   ;;  %v3982_v58 = vld [vmem:[%s6030_s5 + $0x18] sm:$0xff]  }
 0x189   : > { %v1663_v48 = vand.u32 %v5352_v28, %v1632_v47  ;;  %v1660_v39 = vand.u32 %v5352_v28, %v1631_v16  ;;  %v3983_v47 = vld [vmem:[%s6030_s5 + $0x20] sm:$0xff]  }
 0x18a   : > { %1755 = vmatprep.subr.bf16.mxu0 %v1657_v32  ;;  %v3984_v32 = vld [vmem:[%s6030_s5 + $0x28] sm:$0xff]  }
 0x18b   : > { %1756 = vmatpush1.bf16.msra.mxu0 %v1654_v22  ;;  %1796 = vmatprep.subr.bf16.mxu1 %v1663_v48 }
 0x18c   : > { %1797 = vmatpush1.bf16.msra.mxu1 %v1660_v39 }
 0x18d   : > { %2378 = vmatprep.subr.bf16.mxu1 %v6255_v41 }
 0x18e   : > { %3143 = vmatmul.mubr.msk.bf16.vlgmr.msra.gmra.mrb[4].mxu0 %vm6318_vm11, %v5365_v43  ;;  %vm1918_vm11 = vcmask 261124  }
 0x18f   : > { %3144 = vmatmul.mubr.msk.bf16.vlgmr.msra.gmra.mrb[4].mxu1 %vm6319_vm13, %v5365_v43  ;;  %v1878_v43 = vld [vmem:[%s6027_s2] sm:$0x3f]  ;;  %3148 = vmatprep.mubr.msk.bf16.mxu0 %vm2235_vm5, %v3976_v15  ;;  %vm1921_vm13 = vcmask 254976   ;;  %vm1929_vm5 = vcmask 1022976  }
 0x190   : > { %2379 = vmatpush1.bf16.msra.mxu1 %v3979_v63 }
 0x191   : > { %2380 = vmatprep.subr.bf16.mxu1 %v6255_v41 }
 0x194   : > { %2381 = vmatpush1.bf16.msra.mxu1 %v3980_v7 }
 0x195   : > { %2382 = vmatprep.subr.bf16.mxu1 %v6255_v41 }
 0x198   : > { %2383 = vmatpush1.bf16.msra.mxu1 %v3981_v9 }
 0x199   : > { %2384 = vmatprep.subr.bf16.mxu1 %v6255_v41 }
 0x19c   : > { %2385 = vmatpush1.bf16.msra.mxu1 %v3982_v58 }
 0x19d   : > { %2386 = vmatprep.subr.bf16.mxu1 %v6255_v41 }
 0x1a0   : > { %2387 = vmatpush1.bf16.msra.mxu1 %v3983_v47 }
 0x1a1   : > { %2388 = vmatprep.subr.bf16.mxu1 %v6255_v41 }
 0x1a4   : > { %2389 = vmatpush1.bf16.msra.mxu1 %v3984_v32 }
 0x1a5   : > { %2390 = vmatprep.subr.bf16.mxu1 %v6255_v41 }
 0x1f0   : > { %v1699_v21 = vpop.f32.mrb[0].mxu0 }
 0x1f1   : > { %v1701_v35 = vpop.f32.mrb[1].mxu0 }
 0x1f2   : > { %v1703_v25 = vpop.f32.mrb[2].mxu0 }
 0x1f3   : > { %v1704_v1 = vpop.f32.mrb[3].mxu0 }
 0x1f5   : > { %v1740_v30 = vpop.f32.mrb[0].mxu1 }
 0x1f6   : > { %v1742_v53 = vpop.f32.mrb[1].mxu1 }
 0x1f7   : > { %v1744_v36 = vpop.f32.mrb[2].mxu1 }
 0x1f8   : > { %v1745_v28 = vpop.f32.mrb[3].mxu1 }
 0x261   : > { %v1781_v33 = vpop.f32.mrb[4].mxu0 }
 0x262   : > { %v1783_v20 = vpop.f32.mrb[5].mxu0  ;;  %v1822_v34 = vpop.f32.mrb[4].mxu1 }
 0x263   : > { %1850 = vrot.lane.b32.xlu1 %v1822_v34, %s4116_s25  ;;  %v1824_v46 = vpop.f32.mrb[5].mxu1  ;;  %1848 = vrot.lane.b32.xlu0 %v1783_v20, %s4116_s25  ;;  %v1785_v17 = vpop.f32.mrb[6].mxu0 }
 0x264   : > { %v1786_v37 = vpop.f32.mrb[7].mxu0  ;;  %v1826_v4 = vpop.f32.mrb[6].mxu1 }
 0x265   : > { %v1827_v40 = vpop.f32.mrb[7].mxu1 }
 0x267   : > { %1881 = vperm.xlu1 %3974, %v1878_v43   ;;  %1852 = vrot.lane.b32.xlu0 %v1824_v46, %s4116_s25 }
 0x26b   : > { %1834 = vrot.lane.b32.xlu1 %v1740_v30, %s4116_s25  ;;  %1832 = vrot.lane.b32.xlu0 %v1701_v35, %s4116_s25  ;;  %v3986_v30 = vld [vmem:[%s6030_s5 + $0x38] sm:$0xff]  }
 0x26f   : > { %1836 = vrot.lane.b32.xlu0 %v1742_v53, %s4116_s25  ;;  %s4119_s25 = smov 109  }
 0x2d5   : > { %v1851_v56 = vpop.permute.xlu1 %1850  ;;  %v1849_v12 = vpop.permute.xlu0 %1848 }
 0x2d6   : > { %v1854_v49 = vsel %vm1838_vm9, %v1849_v12, %v1851_v56  ;;  %v1859_v59 = vmax.f32 %v1742_v53, %v1849_v12 }
 0x2d7   : > { %v1860_v19 = vmax.f32 %v1781_v33, %v1854_v49 }
 0x2d8   : > { %1865 = vrot.lane.b32.xlu1 %v1859_v59, %s4117_s22 }
 0x2d9   : > { %1867 = vrot.lane.b32.xlu0 %v1860_v19, %s4117_s22  ;;  %v1853_v61 = vpop.permute.xlu0 %1852 }
 0x2da   : > { %v1855_v26 = vsel %vm1838_vm9, %v1851_v56, %v1853_v61 }
 0x2db   : > { %v1861_v27 = vmax.f32 %v1783_v20, %v1855_v26 }
 0x2dd   : > { %1869 = vrot.lane.b32.xlu1 %v1861_v27, %s4117_s22  ;;  %v1833_v60 = vpop.permute.xlu0 %1832  ;;  %s4118_s22 = smov 124  }
 0x2e1   : > { %v1837_v52 = vpop.permute.xlu0 %1836 }
 0x2e6   : > { %v1882_v54 = vpop.permute.xlu1 %1881 }
 0x2ea   : > { %v1835_v0 = vpop.permute.xlu1 %1834 }
 0x2eb   : > { %v1839_v50 = vsel %vm1838_vm9, %v1833_v60, %v1835_v0  ;;  %v1840_v2 = vsel %vm1838_vm9, %v1835_v0, %v1837_v52  ;;  %vm6325_vm9 = vcmask 1031168  }
 0x2ec   : > { %v1843_v6 = vmax.f32 %v1699_v21, %v1839_v50  ;;  %v1844_v44 = vmax.f32 %v1701_v35, %v1840_v2  ;;  %v3985_v21 = vld [vmem:[%s6030_s5 + $0x30] sm:$0xff]  }
 0x2ed   : > { %2391 = vmatpush1.bf16.msra.mxu1 %v3985_v21 }
 0x2ee   : > { %2392 = vmatprep.subr.bf16.mxu1 %v6255_v41 }
 0x2f1   : > { %2393 = vmatpush1.bf16.msra.mxu1 %v3986_v30 }
 0x2f2   : > { %2394 = vmatprep.subr.bf16.mxu1 %v6255_v41 }
 0x34a   : > { %v1866_v31 = vpop.permute.xlu1 %1865 }
 0x34b   : > { %v1868_v3 = vpop.permute.xlu0 %1867 }
 0x34c   : > { %v1872_v8 = vsel %vm1871_vm14, %v1866_v31, %v1868_v3 }
 0x34d   : > { %v1876_v51 = vmax.f32 %v1843_v6, %v1872_v8 }
 0x34f   : > { %v1884_v10 = vadd.f32 %v1882_v54, %v1876_v51  ;;  %v1870_v45 = vpop.permute.xlu1 %1869 }
 0x350   : > { %v1873_v24 = vsel %vm1871_vm14, %v1868_v3, %v1870_v45 }
 0x351   : > { %v5604_v14 = vmax.f32 %v1884_v10, 0.0  ;;  %v1877_v55 = vmax.f32 %v1844_v44, %v1873_v24 }
 0x353   : > { %1888 = vst [vmem:[#allocation3] sm:$0x3f] %v5604_v14  ;;  %v1885_v62 = vadd.f32 %v1882_v54, %v1877_v55  ;;  %1936 = vrot.lane.b32.xlu0 %v5604_v14, %s4118_s22  ;;  %v1893_v42 = vrot.slane %v5604_v14, 2  ;;  %v1908_v57 = vrot.slane %v5604_v14, 4  ;;  %v1923_v5 = vrot.slane %v5604_v14, 6 }
 0x355   : > { %v5608_v29 = vmax.f32 %v1885_v62, 0.0 }
 0x357   : > { %1938 = vrot.lane.b32.xlu1 %v5608_v29, %s4118_s22  ;;  %1977 = vrot.lane.b32.xlu0 %v5604_v14, %s4119_s25  ;;  %1890 = vst.msk [vmem:[#allocation3 + $0x8] sm:$0x3f] %vm1889_vm2, %v5608_v29  ;;  %v1894_v38 = vrot.slane %v5608_v29, 2  ;;  %v1909_v11 = vrot.slane %v5608_v29, 4  ;;  %v1924_v18 = vrot.slane %v5608_v29, 6 }
 0x35b   : > { %1979 = vrot.lane.b32.xlu1 %v5608_v29, %s4119_s25  ;;  %2019 = vrot.lane.b32.xlu0 %v5604_v14, %s4103_s14 }
 0x35f   : > { %2021 = vrot.lane.b32.xlu1 %v5608_v29, %s4103_s14  ;;  %2061 = vrot.lane.b32.xlu0 %v5604_v14, %s4107_s18  ;;  %s4120_s14 = smov 125  }
 0x363   : > { %2063 = vrot.lane.b32.xlu1 %v5608_v29, %s4107_s18  ;;  %2103 = vrot.lane.b32.xlu0 %v5604_v14, %s4108_s19  ;;  %s4126_s18 = smov 61  }
 0x367   : > { %2105 = vrot.lane.b32.xlu1 %v5608_v29, %s4108_s19  ;;  %1895 = vrot.lane.b32.xlu0 %v1893_v42, %s4098_s27 }
 0x36b   : > { %1897 = vrot.lane.b32.xlu1 %v1894_v38, %s4098_s27  ;;  %1910 = vrot.lane.b32.xlu0 %v1908_v57, %s4097_s26  ;;  %s4121_s27 = smov 108  }
 0x36f   : > { %1912 = vrot.lane.b32.xlu1 %v1909_v11, %s4097_s26  ;;  %1925 = vrot.lane.b32.xlu0 %v1923_v5, %s4120_s14  ;;  %s4122_s26 = smov 93  }
 0x373   : > { %1927 = vrot.lane.b32.xlu1 %v1924_v18, %s4120_s14  ;;  %1946 = vrot.lane.b32.xlu0 %v1893_v42, %s4099_s28 }
 0x377   : > { %1948 = vrot.lane.b32.xlu1 %v1894_v38, %s4099_s28  ;;  %1957 = vrot.lane.b32.xlu0 %v1908_v57, %s4100_s29  ;;  %s4123_s28 = smov 92  }
 0x37b   : > { %1959 = vrot.lane.b32.xlu1 %v1909_v11, %s4100_s29  ;;  %1968 = vrot.lane.b32.xlu0 %v1923_v5, %s4101_s30  ;;  %s4124_s29 = smov 77  }
 0x37f   : > { %1970 = vrot.lane.b32.xlu1 %v1924_v18, %s4101_s30  ;;  %1987 = vrot.lane.b32.xlu0 %v1893_v42, %s4121_s27  ;;  %s4125_s30 = smov 76  }
 0x383   : > { %1989 = vrot.lane.b32.xlu1 %v1894_v38, %s4121_s27  ;;  %1999 = vrot.lane.b32.xlu0 %v1908_v57, %s4102_s13 }
 0x387   : > { %2001 = vrot.lane.b32.xlu1 %v1909_v11, %s4102_s13  ;;  %2010 = vrot.lane.b32.xlu0 %v1923_v5, %s4104_s15 }
 0x38b   : > { %2012 = vrot.lane.b32.xlu1 %v1924_v18, %s4104_s15  ;;  %2028 = vrot.lane.b32.xlu0 %v1893_v42, %s4122_s26  ;;  %s6320_s15 = smov 62  }
 0x38f   : > { %2030 = vrot.lane.b32.xlu1 %v1894_v38, %s4122_s26  ;;  %2040 = vrot.lane.b32.xlu0 %v1908_v57, %s4123_s28 }
 0x393   : > { %2042 = vrot.lane.b32.xlu1 %v1909_v11, %s4123_s28  ;;  %2052 = vrot.lane.b32.xlu0 %v1923_v5, %s4105_s16 }
 0x397   : > { %2054 = vrot.lane.b32.xlu1 %v1924_v18, %s4105_s16  ;;  %2070 = vrot.lane.b32.xlu0 %v1893_v42, %s4106_s17  ;;  %s4127_s16 = smov 60  }
 0x39b   : > { %2072 = vrot.lane.b32.xlu1 %v1894_v38, %s4106_s17  ;;  %2081 = vrot.lane.b32.xlu0 %v1908_v57, %s4124_s29 }
 0x39f   : > { %2083 = vrot.lane.b32.xlu1 %v1909_v11, %s4124_s29  ;;  %2093 = vrot.lane.b32.xlu0 %v1923_v5, %s4125_s30 }
 0x3a3   : > { %2095 = vrot.lane.b32.xlu1 %v1924_v18, %s4125_s30  ;;  %2112 = vrot.lane.b32.xlu0 %v1893_v42, %s4109_s20 }
 0x3a7   : > { %2114 = vrot.lane.b32.xlu1 %v1894_v38, %s4109_s20  ;;  %2123 = vrot.lane.b32.xlu0 %v1908_v57, %s6320_s15 }
 0x3ab   : > { %2125 = vrot.lane.b32.xlu1 %v1909_v11, %s6320_s15  ;;  %2134 = vrot.lane.b32.xlu0 %v1923_v5, %s4126_s18 }
 0x3af   : > { %2136 = vrot.lane.b32.xlu1 %v1924_v18, %s4126_s18  ;;  %2144 = vrot.lane.b32.xlu0 %v5604_v14, %s4127_s16  ;;  %s3160_s18 = sshll.u32 %s4095_s21, 4  ;;  %s48_s21 = sadd.s32 1, %s4095_s21  }
 0x3b0   : > { %p45_p0 = scmp.ge.s32.totalorder %s48_s21, 2  }
 0x3b1   :  { %s4128_s21 = smov (%p45_p0), 32   ;;  %s4129_s17 = smov (%p45_p0), 96  }
 0x3b2   :  { %s4130_s25 = smov (%p45_p0), 64  }
 0x3b3   : > { %2146 = vrot.lane.b32.xlu1 %v5608_v29, %s4127_s16  ;;  %2218 = vperm.xlu0 %3975, %v2214_v23   ;;  %s2440_s16 = scalar_lea.vmem [#allocation4], %s3160_s18 }
 0x3b7   : > { %2223 = vperm.xlu1 %3974, %v2215_v13  }
 0x3c5   : > { %v1937_v16 = vpop.permute.xlu0 %1936 }
 0x3c9   : > { %v1939_v22 = vpop.permute.xlu1 %1938  ;;  %v1978_v48 = vpop.permute.xlu0 %1977 }
 0x3ca   : > { %v1941_v39 = vsel %vm1940_vm1, %v1937_v16, %v1939_v22  ;;  %1945 = vst.msk [vmem:[#allocation3 + $0x38] sm:$0x3f] %vm1889_vm2, %v1939_v22  ;;  %vm1934_vm1 = vcmask 261122  }
 0x3cb   : > { %1944 = vst [vmem:[#allocation3 + $0x30] sm:$0x3f] %v1941_v39 }
 0x3cd   : > { %v1980_v35 = vpop.permute.xlu1 %1979  ;;  %v2020_v25 = vpop.permute.xlu0 %2019 }
 0x3ce   : > { %v1982_v1 = vsel %vm1981_vm10, %v1978_v48, %v1980_v35  ;;  %1986 = vst.msk [vmem:[#allocation3 + $0x68] sm:$0x3f] %vm1889_vm2, %v1980_v35  ;;  %vm6326_vm10 = vcmask 916480  }
 0x3cf   : > { %1985 = vst [vmem:[#allocation3 + $0x60] sm:$0x3f] %v1982_v1 }
 0x3d1   : > { %v2022_v53 = vpop.permute.xlu1 %2021  ;;  %v2062_v36 = vpop.permute.xlu0 %2061 }
 0x3d2   : > { %v2023_v28 = vsel %vm6321_vm3, %v2020_v25, %v2022_v53  ;;  %2027 = vst.msk [vmem:[#allocation3 + $0x98] sm:$0x3f] %vm1889_vm2, %v2022_v53  ;;  %vm6327_vm3 = vcmask 908288  }
 0x3d3   : > { %2026 = vst [vmem:[#allocation3 + $0x90] sm:$0x3f] %v2023_v28 }
 0x3d5   : > { %v2064_v33 = vpop.permute.xlu1 %2063  ;;  %v2104_v20 = vpop.permute.xlu0 %2103 }
 0x3d6   : > { %v2065_v34 = vsel %vm6322_vm6, %v2062_v36, %v2064_v33  ;;  %2069 = vst.msk [vmem:[#allocation3 + $0xc8] sm:$0x3f] %vm1889_vm2, %v2064_v33  ;;  %vm6328_vm6 = vcmask 900096  }
 0x3d7   : > { %2068 = vst [vmem:[#allocation3 + $0xc0] sm:$0x3f] %v2065_v34 }
 0x3d9   : > { %v2106_v46 = vpop.permute.xlu1 %2105  ;;  %v1896_v17 = vpop.permute.xlu0 %1895 }
 0x3da   : > { %v2107_v37 = vsel %vm6323_vm7, %v2104_v20, %v2106_v46  ;;  %2111 = vst.msk [vmem:[#allocation3 + $0xf8] sm:$0x3f] %vm1889_vm2, %v2106_v46  ;;  %vm1991_vm7 = vcmask 883712  }
 0x3db   : > { %2110 = vst [vmem:[#allocation3 + $0xf0] sm:$0x3f] %v2107_v37 }
 0x3dd   : > { %v1898_v4 = vpop.permute.xlu1 %1897  ;;  %v1911_v43 = vpop.permute.xlu0 %1910 }
 0x3de   : > { %v1899_v40 = vsel %vm6324_vm15, %v1896_v17, %v1898_v4  ;;  %1904 = vst.msk [vmem:[#allocation3 + $0x8] sm:$0xc0] %vm1903_vm8, %v1898_v4  ;;  %vm6329_vm15 = vcmask 785408  }
 0x3df   : > { %1907 = vst.msk [vmem:[#allocation3 + $0x18] sm:$0xf] %vm1906_vm4, %v1898_v4  ;;  %1902 = vst [vmem:[#allocation3 + $0x10] ss:$-12 sps:$4 sm:$0xcf] %v1899_v40  }
 0x3e1   : > { %v1913_v56 = vpop.permute.xlu1 %1912  ;;  %v1926_v12 = vpop.permute.xlu0 %1925 }
 0x3e2   : > { %v1914_v49 = vsel %vm6325_vm9, %v1911_v43, %v1913_v56  ;;  %1919 = vst.msk [vmem:[#allocation3 + $0x18] sm:$0xf0] %vm1918_vm11, %v1913_v56  ;;  %vm6330_vm9 = vcmask 777216  }
 0x3e3   : > { %1922 = vst.msk [vmem:[#allocation3 + $0x28] sm:$0x3] %vm1921_vm13, %v1913_v56  ;;  %1917 = vst [vmem:[#allocation3 + $0x20] ss:$-12 sps:$4 sm:$0xf3] %v1914_v49  }
 0x3e5   : > { %v1928_v59 = vpop.permute.xlu1 %1927  ;;  %v1947_v19 = vpop.permute.xlu0 %1946  ;;  %v2157_v60 = vld [vmem:[#allocation3 + $0x8] sm:$0xff] }
 0x3e6   : > { %v1930_v61 = vsel %vm1929_vm5, %v1926_v12, %v1928_v59  ;;  %1935 = vst.msk [vmem:[#allocation3 + $0x28] sm:$0xfc] %vm1934_vm1, %v1928_v59  ;;  %v2156_v50 = vld [vmem:[#allocation3] sm:$0xff]  ;;  %vm2032_vm5 = vcmask 760832  }
 0x3e7   : > { %1933 = vst [vmem:[#allocation3 + $0x20] sm:$0xfc] %v1930_v61 }
 0x3e9   : > { %v1949_v26 = vpop.permute.xlu1 %1948  ;;  %v1958_v27 = vpop.permute.xlu0 %1957  ;;  %v2159_v54 = vld [vmem:[#allocation3 + $0x18] sm:$0xff] }
 0x3ea   : > { %v1950_v52 = vsel %vm6326_vm10, %v1947_v19, %v1949_v26  ;;  %1954 = vst.msk [vmem:[#allocation3 + $0x38] sm:$0xc0] %vm1903_vm8, %v1949_v26  ;;  %v2195_v0 = vpack.c.bf16 %v2159_v54, %v2157_v60  ;;  %v2158_v2 = vld [vmem:[#allocation3 + $0x10] sm:$0xff]  ;;  %vm2044_vm10 = vcmask 752640  }
 0x3eb   : > { %1956 = vst.msk [vmem:[#allocation3 + $0x48] sm:$0xf] %vm1906_vm4, %v1949_v26  ;;  %1953 = vst [vmem:[#allocation3 + $0x40] ss:$-12 sps:$4 sm:$0xcf] %v1950_v52   ;;  %v2194_v6 = vpack.c.bf16 %v2158_v2, %v2156_v50 }
 0x3ec   : > { %2246 = vmatprep.subr.bf16.mxu0 %v2195_v0 }
 0x3ed   : > { %v1960_v44 = vpop.permute.xlu1 %1959  ;;  %v1969_v31 = vpop.permute.xlu0 %1968  ;;  %2247 = vmatpush1.bf16.msra.mxu0 %v2194_v6  ;;  %v2161_v10 = vld [vmem:[#allocation3 + $0x28] sm:$0xff] }
 0x3ee   : > { %v1961_v3 = vsel %vm6327_vm3, %v1958_v27, %v1960_v44  ;;  %1965 = vst.msk [vmem:[#allocation3 + $0x48] sm:$0xf0] %vm1918_vm11, %v1960_v44  ;;  %v2160_v55 = vld [vmem:[#allocation3 + $0x20] sm:$0xff]  ;;  %vm6331_vm3 = vcmask 654336  }
 0x3ef   : > { %1967 = vst.msk [vmem:[#allocation3 + $0x58] sm:$0x3] %vm1921_vm13, %v1960_v44  ;;  %1964 = vst [vmem:[#allocation3 + $0x50] ss:$-12 sps:$4 sm:$0xf3] %v1961_v3  }
 0x3f1   : > { %v1971_v8 = vpop.permute.xlu1 %1970  ;;  %v1988_v51 = vpop.permute.xlu0 %1987  ;;  %v2163_v45 = vld [vmem:[#allocation3 + $0x38] sm:$0xff] }
 0x3f2   : > { %v1972_v24 = vsel %vm6328_vm6, %v1969_v31, %v1971_v8  ;;  %1976 = vst.msk [vmem:[#allocation3 + $0x58] sm:$0xfc] %vm1934_vm1, %v1971_v8  ;;  %v2197_v14 = vpack.c.bf16 %v2163_v45, %v2161_v10  ;;  %v2162_v62 = vld [vmem:[#allocation3 + $0x30] sm:$0xff]  ;;  %vm6332_vm6 = vcmask 637952  }
 0x3f3   : > { %1975 = vst [vmem:[#allocation3 + $0x50] sm:$0xfc] %v1972_v24  ;;  %v2196_v29 = vpack.c.bf16 %v2162_v62, %v2160_v55 }
 0x3f4   : > { %2248 = vmatprep.subr.bf16.mxu0 %v2197_v14 }
 0x3f5   : > { %v1990_v42 = vpop.permute.xlu1 %1989  ;;  %v2000_v38 = vpop.permute.xlu0 %1999  ;;  %2249 = vmatpush1.bf16.msra.mxu0 %v2196_v29  ;;  %v2165_v18 = vld [vmem:[#allocation3 + $0x48] sm:$0xff] }
 0x3f6   : > { %v1992_v57 = vsel %vm1991_vm7, %v1988_v51, %v1990_v42  ;;  %1996 = vst.msk [vmem:[#allocation3 + $0x68] sm:$0xc0] %vm1903_vm8, %v1990_v42  ;;  %v2164_v63 = vld [vmem:[#allocation3 + $0x40] sm:$0xff]  ;;  %vm2085_vm7 = vcmask 629760  }
 0x3f7   : > { %1998 = vst.msk [vmem:[#allocation3 + $0x78] sm:$0xf] %vm1906_vm4, %v1990_v42  ;;  %1995 = vst [vmem:[#allocation3 + $0x70] ss:$-12 sps:$4 sm:$0xcf] %v1992_v57  }
 0x3f9   : > { %v2002_v11 = vpop.permute.xlu1 %2001  ;;  %v2011_v5 = vpop.permute.xlu0 %2010  ;;  %v2167_v15 = vld [vmem:[#allocation3 + $0x58] sm:$0xff] }
 0x3fa   : > { %v2003_v13 = vsel %vm6329_vm15, %v2000_v38, %v2002_v11  ;;  %2007 = vst.msk [vmem:[#allocation3 + $0x78] sm:$0xf0] %vm1918_vm11, %v2002_v11  ;;  %v2199_v23 = vpack.c.bf16 %v2167_v15, %v2165_v18  ;;  %v2166_v7 = vld [vmem:[#allocation3 + $0x50] sm:$0xff]  ;;  %vm2097_vm15 = vcmask 621568  }
 0x3fb   : > { %2009 = vst.msk [vmem:[#allocation3 + $0x88] sm:$0x3] %vm1921_vm13, %v2002_v11  ;;  %2006 = vst [vmem:[#allocation3 + $0x80] ss:$-12 sps:$4 sm:$0xf3] %v2003_v13   ;;  %v2198_v9 = vpack.c.bf16 %v2166_v7, %v2164_v63 }
 0x3fc   : > { %2250 = vmatprep.subr.bf16.mxu0 %v2199_v23 }
 0x3fd   : > { %v2013_v58 = vpop.permute.xlu1 %2012  ;;  %v2029_v47 = vpop.permute.xlu0 %2028  ;;  %2251 = vmatpush1.bf16.msra.mxu0 %v2198_v9  ;;  %v2169_v48 = vld [vmem:[#allocation3 + $0x68] sm:$0xff] }
 0x3fe   : > { %v2014_v16 = vsel %vm6330_vm9, %v2011_v5, %v2013_v58  ;;  %2018 = vst.msk [vmem:[#allocation3 + $0x88] sm:$0xfc] %vm1934_vm1, %v2013_v58  ;;  %v2168_v25 = vld [vmem:[#allocation3 + $0x60] sm:$0xff] }
 0x3ff   : > { %2017 = vst [vmem:[#allocation3 + $0x80] sm:$0xfc] %v2014_v16 }
 0x401   : > { %v2031_v32 = vpop.permute.xlu1 %2030  ;;  %v2041_v22 = vpop.permute.xlu0 %2040  ;;  %v2171_v39 = vld [vmem:[#allocation3 + $0x78] sm:$0xff] }
 0x402   : > { %v2033_v21 = vsel %vm2032_vm5, %v2029_v47, %v2031_v32  ;;  %2037 = vst.msk [vmem:[#allocation3 + $0x98] sm:$0xc0] %vm1903_vm8, %v2031_v32  ;;  %v2201_v35 = vpack.c.bf16 %v2171_v39, %v2169_v48  ;;  %v2170_v1 = vld [vmem:[#allocation3 + $0x70] sm:$0xff] }
 0x403   : > { %2039 = vst.msk [vmem:[#allocation3 + $0xa8] sm:$0xf] %vm1906_vm4, %v2031_v32  ;;  %2036 = vst [vmem:[#allocation3 + $0xa0] ss:$-12 sps:$4 sm:$0xcf] %v2033_v21   ;;  %v2200_v30 = vpack.c.bf16 %v2170_v1, %v2168_v25 }
 0x404   : > { %2252 = vmatprep.subr.bf16.mxu0 %v2201_v35  ;;  %v3978_v1 = vld [vmem:[%s6028_s3] ss:$8 sps:$4 sm:$0xff]  }
 0x405   : > { %v2043_v53 = vpop.permute.xlu1 %2042  ;;  %v2053_v36 = vpop.permute.xlu0 %2052  ;;  %2253 = vmatpush1.bf16.msra.mxu0 %v2200_v30  ;;  %v2173_v34 = vld [vmem:[#allocation3 + $0x88] sm:$0xff]  ;;  %v3987_v30 = vld [vmem:[%s6030_s5 + $0x40] sm:$0xff]  }
 0x406   : > { %v2045_v28 = vsel %vm2044_vm10, %v2041_v22, %v2043_v53  ;;  %2049 = vst.msk [vmem:[#allocation3 + $0xa8] sm:$0xf0] %vm1918_vm11, %v2043_v53  ;;  %v2172_v4 = vld [vmem:[#allocation3 + $0x80] sm:$0xff]  ;;  %2395 = vmatpush1.bf16.msra.mxu1 %v3987_v30 }
 0x407   : > { %2051 = vst.msk [vmem:[#allocation3 + $0xb8] sm:$0x3] %vm1921_vm13, %v2043_v53  ;;  %2048 = vst [vmem:[#allocation3 + $0xb0] ss:$-12 sps:$4 sm:$0xf3] %v2045_v28   ;;  %2396 = vmatprep.subr.bf16.mxu1 %v6255_v41  ;;  %v3988_v53 = vld [vmem:[%s6030_s5 + $0x48] sm:$0xff]  }
 0x409   : > { %v2055_v33 = vpop.permute.xlu1 %2054  ;;  %v2071_v20 = vpop.permute.xlu0 %2070  ;;  %v2175_v46 = vld [vmem:[#allocation3 + $0x98] sm:$0xff] }
 0x40a   : > { %v2056_v17 = vsel %vm6331_vm3, %v2053_v36, %v2055_v33  ;;  %2060 = vst.msk [vmem:[#allocation3 + $0xb8] sm:$0xfc] %vm1934_vm1, %v2055_v33  ;;  %v2203_v37 = vpack.c.bf16 %v2175_v46, %v2173_v34  ;;  %v2174_v43 = vld [vmem:[#allocation3 + $0x90] sm:$0xff]  ;;  %2397 = vmatpush1.bf16.msra.mxu1 %v3988_v53 }
 0x40b   : > { %2059 = vst [vmem:[#allocation3 + $0xb0] sm:$0xfc] %v2056_v17  ;;  %v2202_v40 = vpack.c.bf16 %v2174_v43, %v2172_v4 }
 0x40c   : > { %2254 = vmatprep.subr.bf16.mxu0 %v2203_v37 }
 0x40d   : > { %v2073_v56 = vpop.permute.xlu1 %2072  ;;  %v2082_v12 = vpop.permute.xlu0 %2081  ;;  %2255 = vmatpush1.bf16.msra.mxu0 %v2202_v40  ;;  %v2177_v61 = vld [vmem:[#allocation3 + $0xa8] sm:$0xff] }
 0x40e   : > { %v2074_v49 = vsel %vm6332_vm6, %v2071_v20, %v2073_v56  ;;  %2078 = vst.msk [vmem:[#allocation3 + $0xc8] sm:$0xc0] %vm1903_vm8, %v2073_v56  ;;  %v2176_v54 = vld [vmem:[#allocation3 + $0xa0] sm:$0xff]  ;;  %vm4132_vm6 = vmmov (%p45_p0), 0  }
 0x40f   : > { %2080 = vst.msk [vmem:[#allocation3 + $0xd8] sm:$0xf] %vm1906_vm4, %v2073_v56  ;;  %2077 = vst [vmem:[#allocation3 + $0xd0] ss:$-12 sps:$4 sm:$0xcf] %v2074_v49  }
 0x411   : > { %v2084_v59 = vpop.permute.xlu1 %2083  ;;  %v2094_v19 = vpop.permute.xlu0 %2093  ;;  %v2179_v26 = vld [vmem:[#allocation3 + $0xb8] sm:$0xff] }
 0x412   : > { %v2086_v27 = vsel %vm2085_vm7, %v2082_v12, %v2084_v59  ;;  %2090 = vst.msk [vmem:[#allocation3 + $0xd8] sm:$0xf0] %vm1918_vm11, %v2084_v59  ;;  %v2205_v60 = vpack.c.bf16 %v2179_v26, %v2177_v61  ;;  %v2178_v52 = vld [vmem:[#allocation3 + $0xb0] sm:$0xff]  ;;  %vm2967_vm7 = vcmask (%p45_p0), 982016  }
 0x413   : > { %2092 = vst.msk [vmem:[#allocation3 + $0xe8] sm:$0x3] %vm1921_vm13, %v2084_v59  ;;  %2089 = vst [vmem:[#allocation3 + $0xe0] ss:$-12 sps:$4 sm:$0xf3] %v2086_v27   ;;  %v2204_v0 = vpack.c.bf16 %v2178_v52, %v2176_v54 }
 0x414   : > { %2256 = vmatprep.subr.bf16.mxu0 %v2205_v60 }
 0x415   : > { %v2096_v50 = vpop.permute.xlu1 %2095  ;;  %v2113_v2 = vpop.permute.xlu0 %2112  ;;  %2257 = vmatpush1.bf16.msra.mxu0 %v2204_v0  ;;  %v2181_v3 = vld [vmem:[#allocation3 + $0xc8] sm:$0xff] }
 0x416   : > { %v2098_v6 = vsel %vm2097_vm15, %v2094_v19, %v2096_v50  ;;  %2102 = vst.msk [vmem:[#allocation3 + $0xe8] sm:$0xfc] %vm1934_vm1, %v2096_v50  ;;  %v2180_v45 = vld [vmem:[#allocation3 + $0xc0] sm:$0xff]  ;;  %vm3072_vm15 = vcmask (%p45_p0), 1041408  }
 0x417   : > { %2101 = vst [vmem:[#allocation3 + $0xe0] sm:$0xfc] %v2098_v6 }
 0x419   : > { %v2115_v44 = vpop.permute.xlu1 %2114  ;;  %v2124_v31 = vpop.permute.xlu0 %2123  ;;  %v2183_v8 = vld [vmem:[#allocation3 + $0xd8] sm:$0xff] }
 0x41a   : > { %v2116_v51 = vsel %vm1018_vm0, %v2113_v2, %v2115_v44  ;;  %2120 = vst.msk [vmem:[#allocation3 + $0xf8] sm:$0xc0] %vm1903_vm8, %v2115_v44  ;;  %v2207_v10 = vpack.c.bf16 %v2183_v8, %v2181_v3  ;;  %v2182_v24 = vld [vmem:[#allocation3 + $0xd0] sm:$0xff]  ;;  %vm2138_vm0 = vcmask 498688   ;;  %vm2148_vm8 = vcmask 490496  }
 0x41b   : > { %2122 = vst.msk [vmem:[#allocation3 + $0x108] sm:$0xf] %vm1906_vm4, %v2115_v44  ;;  %2119 = vst [vmem:[#allocation3 + $0x100] ss:$-12 sps:$4 sm:$0xcf] %v2116_v51   ;;  %v2206_v14 = vpack.c.bf16 %v2182_v24, %v2180_v45  ;;  %vm6333_vm4 = vcmask (%p45_p0), 523264  }
 0x41c   : > { %2258 = vmatprep.subr.bf16.mxu0 %v2207_v10  ;;  %vm6337_vm9 = vmmov (%p45_p0), %vm6333_vm4 }
 0x41d   : > { %v2126_v55 = vpop.permute.xlu1 %2125  ;;  %2259 = vmatpush1.bf16.msra.mxu0 %v2206_v14  ;;  %v2135_v29 = vpop.permute.xlu0 %2134  ;;  %v2185_v38 = vld [vmem:[#allocation3 + $0xe8] sm:$0xff]  ;;  %vm6338_vm5 = vmmov (%p45_p0), %vm6333_vm4 }
 0x41e   : > { %v2127_v62 = vsel %vm1051_vm12, %v2124_v31, %v2126_v55  ;;  %2131 = vst.msk [vmem:[#allocation3 + $0x108] sm:$0xf0] %vm1918_vm11, %v2126_v55  ;;  %v2184_v18 = vld [vmem:[#allocation3 + $0xe0] sm:$0xff]  ;;  %vm2239_vm12 = vcmask 1042432   ;;  %vm6334_vm11 = vmmov (%p45_p0), %vm6333_vm4 }
 0x41f   : > { %2133 = vst.msk [vmem:[#allocation3 + $0x118] sm:$0x3] %vm1921_vm13, %v2126_v55  ;;  %2130 = vst [vmem:[#allocation3 + $0x110] ss:$-12 sps:$4 sm:$0xf3] %v2127_v62   ;;  %vm6335_vm13 = vcmask (%p45_p0), 785408  }
 0x421   : > { %v2137_v42 = vpop.permute.xlu1 %2136  ;;  %v2187_v57 = vld [vmem:[#allocation3 + $0xf8] sm:$0xff]  ;;  %v2145_v23 = vpop.permute.xlu0 %2144 }
 0x422   : > { %v2139_v11 = vsel %vm2138_vm0, %v2135_v29, %v2137_v42  ;;  %2143 = vst.msk [vmem:[#allocation3 + $0x118] sm:$0xfc] %vm1934_vm1, %v2137_v42  ;;  %v2209_v5 = vpack.c.bf16 %v2187_v57, %v2185_v38  ;;  %v2186_v15 = vld [vmem:[#allocation3 + $0xf0] sm:$0xff]  ;;  %vm6336_vm1 = vmmov (%p45_p0), %vm6335_vm13  ;;  %vm3068_vm0 = vcmask (%p45_p0), 687104  }
 0x423   : > { %2142 = vst [vmem:[#allocation3 + $0x110] sm:$0xfc] %v2139_v11  ;;  %v2208_v13 = vpack.c.bf16 %v2186_v15, %v2184_v18  ;;  %v4019_v18 = vld [vmem:[%s6031_s6 + $0x40] sm:$0xff] (%p45_p0)   ;;  %vm6339_vm10 = vmmov (%p45_p0), %vm6336_vm1 }
 0x424   : > { %2260 = vmatprep.subr.bf16.mxu0 %v2209_v5  ;;  %v4020_v15 = vld [vmem:[%s6031_s6] sm:$0xff] (%p45_p0)   ;;  %vm6340_vm3 = vmmov (%p45_p0), %vm6336_vm1 }
 0x425   : > { %v2147_v63 = vpop.permute.xlu1 %2146  ;;  %2261 = vmatpush1.bf16.msra.mxu0 %v2208_v13  ;;  %v2189_v9 = vld [vmem:[#allocation3 + $0x108] sm:$0xff] }
 0x426   : > { %v2149_v7 = vsel %vm2148_vm8, %v2145_v23, %v2147_v63  ;;  %2153 = vst.msk [vmem:[#allocation3 + $0x128] sm:$0x3f] %vm1889_vm2, %v2147_v63  ;;  %v2188_v16 = vld [vmem:[#allocation3 + $0x100] sm:$0xff]  ;;  %vm2450_vm2 = vcmask (%p45_p0), 1041409  }
 0x427   : > { %2152 = vst [vmem:[#allocation3 + $0x120] sm:$0x3f] %v2149_v7 }
 0x429   : > { %v2191_v58 = vld [vmem:[#allocation3 + $0x118] sm:$0xff] }
 0x42a   : > { %v2211_v47 = vpack.c.bf16 %v2191_v58, %v2189_v9  ;;  %v2190_v32 = vld [vmem:[#allocation3 + $0x110] sm:$0xff]  ;;  %v4021_v9 = vld [vmem:[%s6031_s6 + $0x48] sm:$0xff] (%p45_p0)  }
 0x42b   : > { %v2210_v22 = vpack.c.bf16 %v2190_v32, %v2188_v16 }
 0x42c   : > { %2262 = vmatprep.subr.bf16.mxu0 %v2211_v47 }
 0x42d   : > { %2263 = vmatpush1.bf16.msra.mxu0 %v2210_v22  ;;  %v2193_v48 = vld [vmem:[#allocation3 + $0x128] sm:$0x3f] }
 0x42e   : > { %v2213_v39 = vpack.c.bf16 %v2193_v48, %v2193_v48  ;;  %v2192_v21 = vld [vmem:[#allocation3 + $0x120] sm:$0x3f] }
 0x42f   : > { %v2212_v35 = vpack.c.bf16 %v2192_v21, %v2192_v21 }
 0x430   : > { %3147 = vmatprep.subr.msk.bf16.mxu0 %vm2239_vm12, %v2213_v39 }
 0x431   : > { %v2241_v25 = vsel %vm2239_vm12, %v2212_v35, 0  ;;  %v4022_v35 = vld [vmem:[%s6031_s6 + $0xc0] sm:$0xff] (%p45_p0)  }
 0x432   : > { %2265 = vmatpush1.bf16.msra.mxu0 %v2241_v25  ;;  %v2219_v36 = vpop.permute.xlu0 %2218  ;;  %3235 = vmatprep.subr.bf16.mxu1 (%p45_p0), %v4022_v35 }
 0x433   :  { %3213 = vmatprep.subr.bf16.mxu0 (%p45_p0), %v4019_v18  ;;  %v4045_v18 = vld [vmem:[%s6031_s6 + $0x78] sm:$0xff] (%p45_p0)  }
 0x435   : > { %2279 = vmatmul.mubr.bf16.vlgmr.msra.gmra.mrb[8].mxu0 %v3978_v1 }
 0x436   : > { %v2224_v34 = vpop.permute.xlu1 %2223  ;;  %3214 = vmatpush3.bf16.msra.mxu0 (%p45_p0), %v4020_v15  ;;  %v4046_v15 = vld [vmem:[%s6031_s6 + $0xf0] sm:$0xff] (%p45_p0)  }
 0x437   :  { %3215 = vmatprep.subr.bf16.mxu0 (%p45_p0), %v4021_v9  ;;  %v4131_v9 = vmov (%p45_p0), 0.0  }
 0x508   : > { %v2280_v28 = vpop.f32.mrb[8].mxu0 }
 0x509   : > { %v2281_v33 = vadd.f32 %v2280_v28, %v2219_v36  ;;  %v2282_v20 = vpop.f32.mrb[9].mxu0 }
 0x50a   : > { %v2283_v46 = vadd.f32 %v2282_v20, %v2219_v36  ;;  %v2284_v17 = vpop.f32.mrb[10].mxu0 }
 0x50b   : > { %v2285_v37 = vadd.f32 %v2284_v17, %v2224_v34  ;;  %v2286_v4 = vpop.f32.mrb[11].mxu0  ;;  %v2289_v40 = vmax.f32 %v2281_v33, 0.0 }
 0x50c   : > { %v2287_v43 = vadd.f32 %v2286_v4, %v2224_v34  ;;  %v2290_v12 = vmax.f32 %v2283_v46, 0.0  ;;  %v4023_v34 = vld [vmem:[%s6031_s6 + $0x8] sm:$0xff] (%p45_p0)   ;;  %v4024_v46 = vld [vmem:[%s6031_s6 + $0x80] sm:$0xff] (%p45_p0)  }
 0x50d   : > { %v2291_v56 = vmax.f32 %v2285_v37, 0.0  ;;  %3216 = vmatpush3.bf16.msra.mxu0 (%p45_p0), %v4023_v34 }
 0x50e   : > { %v2292_v49 = vmax.f32 %v2287_v43, 0.0 }
 0x50f   : > { %v2293_v41 = vpack.c.bf16 %v2291_v56, %v2289_v40 }
 0x510   : > { %v2294_v59 = vpack.c.bf16 %v2292_v49, %v2290_v12  ;;  %v4025_v12 = vld [vmem:[%s6031_s6 + $0x50] sm:$0xff] (%p45_p0)  }
 0x511   :  { %3217 = vmatprep.subr.bf16.mxu0 (%p45_p0), %v4025_v12 }
 0x512   : > { %3159 = vmatprep.mubr.msk.bf16.mxu1 %vm1871_vm14, %v2294_v59  ;;  %v4026_v59 = vld [vmem:[%s6031_s6 + $0xc8] sm:$0xff] (%p45_p0)  }
 0x513   : > { %2411 = vmatmul.mubr.bf16.vlgmr.msra.gmra.mrb[8].mxu1 %v2293_v41 }
 0x514   :  { %3236 = vmatpush3.bf16.msra.mxu1 (%p45_p0), %v4024_v46 }
 0x515   :  { %3237 = vmatprep.subr.bf16.mxu1 (%p45_p0), %v4026_v59 }
 0x5e6   : > { %v2412_v19 = vpop.f32.mrb[8].mxu1 }
 0x5e7   : > { %2421 = vrot.lane.b32.xlu1 %v2412_v19, %s4102_s13  ;;  %v2414_v61 = vpop.f32.mrb[9].mxu1 }
 0x5e8   : > { %v2415_v26 = vpop.f32.mrb[10].mxu1 }
 0x5e9   : > { %2423 = vrot.lane.b32.xlu0 %v2415_v26, %s4102_s13  ;;  %v2417_v27 = vpop.f32.mrb[11].mxu1 }
 0x659   : > { %v2422_v60 = vpop.permute.xlu1 %2421 }
 0x65a   : > { %v2427_v54 = vmax.f32 %v2412_v19, %v2422_v60 }
 0x65b   : > { %v2424_v52 = vpop.permute.xlu0 %2423 }
 0x65c   : > { %v2428_v0 = vmax.f32 %v2415_v26, %v2424_v52  ;;  %2431 = vrot.lane.b32.xlu1 %v2427_v54, %s4108_s19  ;;  %v4027_v26 = vld [vmem:[%s6031_s6 + $0x10] sm:$0xff] (%p45_p0)  }
 0x65d   :  { %3218 = vmatpush3.bf16.msra.mxu0 (%p45_p0), %v4027_v26 }
 0x65e   : > { %2433 = vrot.lane.b32.xlu0 %v2428_v0, %s4108_s19 }
 0x6cd   :  { %47 = sbr.rel (!%p45_p0) target bundleno = 1 (0x1), region = 77 }
 0x6ce   : > { %v2432_v50 = vpop.permute.xlu1 %2431 }
 0x6cf   : > { %v2437_v2 = vmax.f32 %v2427_v54, %v2432_v50  ;;  %v4028_v54 = vld [vmem:[%s6031_s6 + $0x88] sm:$0xff] (%p45_p0)   ;;  %v4029_v50 = vld [vmem:[%s6031_s6 + $0x58] sm:$0xff] (%p45_p0)  }
 0x6d0   : > { %v2434_v6 = vpop.permute.xlu0 %2433  ;;  %3238 = vmatpush3.bf16.msra.mxu1 (%p45_p0), %v4028_v54  ;;  %3219 = vmatprep.subr.bf16.mxu0 (%p45_p0), %v4029_v50  ;;  %v4054_v50 = vld [vmem:[%s6033_s8 + $0x18] sm:$0xff] (%p45_p0)  }
 0x6d1   : > { %2441 = vst.msk [vmem:[%s2440_s16] sm:$0xff] %vm1871_vm14, %v2437_v2  ;;  %v2438_v44 = vmax.f32 %v2428_v0, %v2434_v6  ;;  %v4030_v6 = vld [vmem:[%s6031_s6 + $0xd0] sm:$0xff] (%p45_p0)  }
 0x6d2   :  { %3239 = vmatprep.subr.bf16.mxu1 (%p45_p0), %v4030_v6  ;;  %v4056_v6 = vld [vmem:[%s6033_s8 + $0x28] sm:$0xff] (%p45_p0)  }
 0x6d3   : > { %2442 = vst.msk [vmem:[%s2440_s16 + $0x8] sm:$0xff] %vm1871_vm14, %v2438_v44 }
 0x6da   :  { %v5769_v31 = vld [vmem:[#allocation4] sm:$0xff]  ;;  %v5771_v3 = vld [vmem:[#allocation4 + $0x10] sm:$0xff]  ;;  %v5773_v8 = vld [vmem:[#allocation4 + $0x8] sm:$0xff] }
 0x6db   :  { %v2453_v51 = vrot.slane %v5769_v31, 1  ;;  %v2474_v10 = vrot.slane %v5769_v31, 5  ;;  %v2475_v45 = vrot.slane %v5771_v3, 4  ;;  %v2464_v24 = vrot.slane %v5769_v31, 3  ;;  %v5779_v14 = vld [vmem:[#allocation4 + $0x18] sm:$0xff] }
 0x6dc   :  { %v2465_v55 = vrot.slane %v5771_v3, 2  ;;  %v2486_v62 = vrot.slane %v5769_v31, 7  ;;  %v2487_v29 = vrot.slane %v5771_v3, 6  ;;  %v2458_v42 = vrot.slane %v5769_v31, 2 }
 0x6dd   :  { %v2454_v38 = vsel %vm2450_vm2, %v5771_v3, %v2453_v51  ;;  %v2476_v57 = vsel %vm2450_vm2, %v2475_v45, %v2474_v10  ;;  %v2459_v11 = vrot.slane %v5771_v3, 1  ;;  %v2480_v5 = vrot.slane %v5769_v31, 6  ;;  %v4033_v10 = vld [vmem:[%s6031_s6 + $0x60] sm:$0xff]   ;;  %v4034_v45 = vld [vmem:[%s6031_s6 + $0xd8] sm:$0xff]  }
 0x6de   :  { %v3989_v13 = vpack.i.bf16 %v2454_v38, %v2476_v57  ;;  %v2466_v23 = vsel %vm2450_vm2, %v2465_v55, %v2464_v24  ;;  %v2488_v63 = vsel %vm2450_vm2, %v2487_v29, %v2486_v62  ;;  %v2481_v7 = vrot.slane %v5771_v3, 5  ;;  %v4035_v24 = vld [vmem:[%s6031_s6 + $0x20] sm:$0xff]   ;;  %v4037_v55 = vld [vmem:[%s6031_s6 + $0x68] sm:$0xff]   ;;  %v4041_v38 = vld [vmem:[%s6031_s6 + $0x70] sm:$0xff]  }
 0x6df   :  { %v3999_v58 = vpack.i.bf16 %v2466_v23, %v2488_v63  ;;  %v2460_v47 = vsel %vm2450_vm2, %v2459_v11, %v2458_v42  ;;  %v2497_v16 = vrot.slane %v5773_v8, 1  ;;  %v2518_v32 = vrot.slane %v5773_v8, 5  ;;  %v4038_v62 = vld [vmem:[%s6031_s6 + $0xe0] sm:$0xff]   ;;  %v4039_v29 = vld [vmem:[%s6031_s6 + $0x28] sm:$0xff]   ;;  %v4043_v11 = vld [vmem:[%s6031_s6 + $0x30] sm:$0xff]  }
 0x6e0   :  { %3990 = vrot.lane.b32.xlu0 %v3989_v13, %s4128_s21  ;;  %v2482_v22 = vsel %vm2450_vm2, %v2481_v7, %v2480_v5  ;;  %v2519_v48 = vrot.slane %v5779_v14, 4  ;;  %v2502_v39 = vrot.slane %v5773_v8, 2  ;;  %v2503_v21 = vrot.slane %v5779_v14, 1  ;;  %v4040_v42 = vld [vmem:[%s6031_s6 + $0xa0] sm:$0xff]   ;;  %v4042_v57 = vld [vmem:[%s6031_s6 + $0xe8] sm:$0xff]   ;;  %v4047_v13 = vld [vmem:[%s6031_s6 + $0x38] sm:$0xff]  }
 0x6e1   :  { %4000 = vrot.lane.b32.xlu1 %v3999_v58, %s4129_s17  ;;  %v3994_v25 = vpack.i.bf16 %v2460_v47, %v2482_v22  ;;  %v2498_v1 = vsel %vm2450_vm2, %v5779_v14, %v2497_v16  ;;  %v2524_v30 = vrot.slane %v5773_v8, 6  ;;  %v2525_v53 = vrot.slane %v5779_v14, 5  ;;  %v4044_v5 = vld [vmem:[%s6031_s6 + $0xa8] sm:$0xff]   ;;  %v4048_v23 = vld [vmem:[%s6031_s6 + $0xb0] sm:$0xff]   ;;  %v4049_v63 = vld [vmem:[%s6031_s6 + $0xf8] sm:$0xff]  }
 0x6e2   :  { %v2520_v36 = vsel %vm2450_vm2, %v2519_v48, %v2518_v32  ;;  %v2504_v28 = vsel %vm2450_vm2, %v2503_v21, %v2502_v39  ;;  %v2508_v33 = vrot.slane %v5773_v8, 3  ;;  %v2509_v20 = vrot.slane %v5779_v14, 2  ;;  %v4050_v7 = vld [vmem:[%s6031_s6 + $0xb8] sm:$0xff]  }
 0x6e3   :  { %v4004_v17 = vpack.i.bf16 %v2498_v1, %v2520_v36  ;;  %v2526_v37 = vsel %vm2450_vm2, %v2525_v53, %v2524_v30  ;;  %v2530_v4 = vrot.slane %v5773_v8, 7  ;;  %v2531_v43 = vrot.slane %v5779_v14, 6 }
 0x6e4   :  { %3995 = vrot.lane.b32.xlu0 %v3994_v25, %s4130_s25  ;;  %v4009_v40 = vpack.i.bf16 %v2504_v28, %v2526_v37  ;;  %v2510_v56 = vsel %vm2450_vm2, %v2509_v20, %v2508_v33  ;;  %v2449_v49 = vrot.slane %v5771_v3, 7  ;;  %v2494_v19 = vrot.slane %v5779_v14, 7 }
 0x6e5   :  { %4005 = vrot.lane.b32.xlu1 %v4004_v17, %s4128_s21  ;;  %v2532_v41 = vsel %vm2450_vm2, %v2531_v43, %v2530_v4  ;;  %v2470_v60 = vrot.slane %v5769_v31, 4  ;;  %v2471_v0 = vrot.slane %v5771_v3, 3  ;;  %v2514_v2 = vrot.slane %v5773_v8, 4  ;;  %v4031_v3 = vld [vmem:[%s6031_s6 + $0x18] sm:$0xff]  }
 0x6e6   :  { %v4014_v61 = vpack.i.bf16 %v2510_v56, %v2532_v41  ;;  %v5847_v27 = vsel %vm2450_vm2, %v2449_v49, %v5769_v31  ;;  %v5855_v52 = vsel %vm2450_vm2, %v2494_v19, %v5773_v8  ;;  %v2515_v31 = vrot.slane %v5779_v14, 3  ;;  %v4032_v8 = vld [vmem:[%s6031_s6 + $0x90] sm:$0xff]   ;;  %3220 = vmatpush3.bf16.msra.mxu0 %v4031_v3  ;;  %v4036_v14 = vld [vmem:[%s6031_s6 + $0x98] sm:$0xff]   ;;  %v4051_v56 = vld [vmem:[%s6033_s8] sm:$0xff]  }
 0x6e7   :  { %v2472_v44 = vsel %vm2450_vm2, %v2471_v0, %v2470_v60  ;;  %3240 = vmatpush3.bf16.msra.mxu1 %v4032_v8  ;;  %3221 = vmatprep.subr.bf16.mxu0 %v4033_v10  ;;  %v4053_v0 = vld [vmem:[%s6033_s8 + $0x10] sm:$0xff]   ;;  %v4059_v8 = vld [vmem:[%s6035_s10] sm:$0xff]  }
 0x6e8   :  { %4010 = vrot.lane.b32.xlu0 %v4009_v40, %s4130_s25  ;;  %v5875_v51 = vsel %vm2450_vm2, %v2515_v31, %v2514_v2  ;;  %3241 = vmatprep.subr.bf16.mxu1 %v4034_v45  ;;  %v4055_v2 = vld [vmem:[%s6033_s8 + $0x20] sm:$0xff]   ;;  %v4058_v31 = vld [vmem:[%s6033_s8 + $0x38] ss:$0 sps:$4 sm:$0xff]   ;;  %v4061_v10 = vld [vmem:[%s6035_s10 + $0x10] sm:$0xff]  }
 0x6e9   :  { %4015 = vrot.lane.b32.xlu1 %v4014_v61, %s4129_s17  ;;  %v4062_v45 = vld [vmem:[%s6035_s10 + $0x18] sm:$0xff]  }
 0x6ea   :  { %3222 = vmatpush3.bf16.msra.mxu0 %v4035_v24 }
 0x6eb   :  { %3242 = vmatpush3.bf16.msra.mxu1 %v4036_v14  ;;  %3223 = vmatprep.subr.bf16.mxu0 %v4037_v55 }
 0x6ec   :  { %3243 = vmatprep.subr.bf16.mxu1 %v4038_v62 }
 0x6ee   :  { %3224 = vmatpush3.bf16.msra.mxu0 %v4039_v29  ;;  %v3161_v29 = vld [vmem:[%s6032_s7] ss:$0 sm:$0xff] }
 0x6ef   :  { %3244 = vmatpush3.bf16.msra.mxu1 %v4040_v42  ;;  %3225 = vmatprep.subr.bf16.mxu0 %v4041_v38 }
 0x6f0   :  { %3245 = vmatprep.subr.bf16.mxu1 %v4042_v57 }
 0x6f2   :  { %3226 = vmatpush3.bf16.msra.mxu0 %v4043_v11 }
 0x6f3   :  { %3246 = vmatpush3.bf16.msra.mxu1 %v4044_v5  ;;  %3227 = vmatprep.subr.bf16.mxu0 %v4045_v18 }
 0x6f4   :  { %3247 = vmatprep.subr.bf16.mxu1 %v4046_v15 }
 0x6f6   :  { %3228 = vmatpush3.bf16.msra.mxu0 %v4047_v13 }
 0x6f7   :  { %3248 = vmatpush3.bf16.msra.mxu1 %v4048_v23  ;;  %3273 = vmatprep.subr.bf16.mxu0 %v4131_v9 }
 0x6f8   :  { %3249 = vmatprep.subr.bf16.mxu1 %v4049_v63 }
 0x6fb   :  { %3250 = vmatpush3.bf16.msra.mxu1 %v4050_v7  ;;  %v4063_v7 = vld [vmem:[%s6035_s10 + $0x20] sm:$0xff]  }
 0x6fc   :  { %3293 = vmatprep.subr.bf16.mxu1 %v4131_v9 }
 0x752   :  { %v3991_v58 = vpop.permute.xlu0 %3990 }
 0x753   :  { %v4001_v47 = vpop.permute.xlu1 %4000  ;;  %v3993_v16 = vunpack.i.h.bf16 %v3991_v58  ;;  %v3992_v32 = vunpack.i.l.bf16 %v3991_v58  ;;  %v4064_v58 = vld [vmem:[%s6035_s10 + $0x28] ss:$0 sps:$4 sm:$0x33]  }
 0x754   :  { %v4003_v48 = vunpack.i.h.bf16 %v4001_v47  ;;  %v4002_v39 = vunpack.i.l.bf16 %v4001_v47  ;;  %v3074_v47 = vsel %vm3072_vm15, %v4064_v58, 0 }
 0x755   :  { %v2537_v1 = vsel %vm1871_vm14, %v5847_v27, %v3993_v16  ;;  %v2542_v36 = vsel %vm1871_vm14, %v2472_v44, %v3992_v32  ;;  %v4057_v44 = vld [vmem:[%s6033_s8 + $0x30] sm:$0xff]   ;;  %v3194_v16 = vld [vmem:[%s6034_s9] ss:$0 sm:$0xff] }
 0x756   :  { %v3996_v22 = vpop.permute.xlu0 %3995 }
 0x757   :  { %v3998_v21 = vunpack.i.h.bf16 %v3996_v22  ;;  %v3997_v35 = vunpack.i.l.bf16 %v3996_v22  ;;  %v4006_v25 = vpop.permute.xlu1 %4005 }
 0x758   :  { %v4008_v30 = vunpack.i.h.bf16 %v4006_v25  ;;  %v4007_v53 = vunpack.i.l.bf16 %v4006_v25 }
 0x759   :  { %v2539_v28 = vsel %vm6333_vm4, %v2537_v1, %v3998_v21  ;;  %v2543_v33 = vsel %vm6334_vm11, %v2542_v36, %v3997_v35 }
 0x75a   :  { %v4011_v20 = vpop.permute.xlu0 %4010  ;;  %v2544_v34 = vsel %vm6335_vm13, %v2543_v33, %v4002_v39  ;;  %v2541_v46 = vsel %vm6336_vm1, %v2539_v28, %v4003_v48  ;;  %v2545_v12 = vsel %vm1871_vm14, %v5855_v52, %v4008_v30  ;;  %v2548_v59 = vsel %vm1871_vm14, %v5875_v51, %v4007_v53  ;;  %v4052_v52 = vld [vmem:[%s6033_s8 + $0x8] sm:$0xff]  }
 0x75b   :  { %v4013_v17 = vunpack.i.h.bf16 %v4011_v20  ;;  %v4012_v37 = vunpack.i.l.bf16 %v4011_v20  ;;  %v4016_v4 = vpop.permute.xlu1 %4015  ;;  %v2552_v43 = vpack.c.bf16 %v2544_v34, %v2544_v34  ;;  %v2551_v40 = vpack.c.bf16 %v2541_v46, %v2541_v46  ;;  %v4060_v51 = vld [vmem:[%s6035_s10 + $0x8] sm:$0xff]   ;;  %s4133_s10 = smov [#allocation5]  }
 0x75c   :  { %v4018_v49 = vunpack.i.h.bf16 %v4016_v4  ;;  %v4017_v41 = vunpack.i.l.bf16 %v4016_v4  ;;  %vm2971_vm14 = vcmask 1043456   ;;  %s3123_s1 = sshll.u32 %s4133_s10, 4  ;;  %s3124_s1 = int_to_ptr.vmem [resolvable:$true] %s3123_s1 }
 0x75d   :  { %v2546_v19 = vsel %vm6337_vm9, %v2545_v12, %v4013_v17  ;;  %2850 = vmatprep.mubr.bf16.mxu0 %v2552_v43  ;;  %v2549_v61 = vsel %vm6338_vm5, %v2548_v59, %v4012_v37  ;;  %v2973_v3 = vsel %vm2971_vm14, %v4058_v31, 0  ;;  %s4065_s9 = scalar_lea.vmem %s3124_s1, 32  ;;  %p4070_p2 = scmp.lt.s32.totalorder %s3124_s1, %s3124_s1 }
 0x75e   :  { %v2547_v26 = vsel %vm6339_vm10, %v2546_v19, %v4018_v49  ;;  %2851 = vmatmul.mubr.bf16.vlgmr.msra.gmra.mrb[0].mxu0 %v2551_v40  ;;  %v2550_v27 = vsel %vm6340_vm3, %v2549_v61, %v4017_v41  ;;  %p4066_p1 = scmp.ne.s32.totalorder %s3124_s1, %s4065_s9  ;;  %p4071_p3 = scmp.lt.s32.totalorder %s4065_s9, %s4065_s9 }
 0x75f   :  { %v2553_v60 = vpack.c.bf16 %v2547_v26, %v2547_v26  ;;  %v2554_v54 = vpack.c.bf16 %v2550_v27, %v2550_v27  ;;  %3274 = vmatpush3.bf16.msra.mxu0 %v4051_v56  ;;  %3289 = vmatprep.mubr.msk.bf16.mxu0 %vm4132_vm6, %v4131_v9 }
 0x760   :  { %3275 = vmatprep.subr.bf16.mxu0 %v4131_v9  ;;  %p4072_p4 = por %p4071_p3, %p4070_p2 }
 0x761   :  { %2890 = vmatprep.mubr.bf16.mxu1 %v2554_v54 }
 0x762   :  { %2891 = vmatmul.mubr.bf16.vlgmr.msra.gmra.mrb[0].mxu1 %v2553_v60  ;;  %p4073_p5 = pnand %p4072_p4, %p4066_p1 }
 0x763   :  { %3276 = vmatpush3.bf16.msra.mxu0 %v4052_v52  ;;  %3305 = vmatprep.mubr.msk.bf16.mxu1 %vm4132_vm6, %v4131_v9 }
 0x764   :  { %3277 = vmatprep.subr.bf16.mxu0 %v4131_v9  ;;  %3294 = vmatpush3.bf16.msra.mxu1 %v4059_v8 }
 0x765   :  { %3295 = vmatprep.subr.bf16.mxu1 %v4131_v9 }
 0x767   :  { %3278 = vmatpush3.bf16.msra.mxu0 %v4053_v0 }
 0x768   :  { %3279 = vmatprep.subr.bf16.mxu0 %v4131_v9  ;;  %3296 = vmatpush3.bf16.msra.mxu1 %v4060_v51 }
 0x769   :  { %3297 = vmatprep.subr.bf16.mxu1 %v4131_v9 }
 0x76b   :  { %3280 = vmatpush3.bf16.msra.mxu0 %v4054_v50 }
 0x76c   :  { %3281 = vmatprep.subr.bf16.mxu0 %v4131_v9  ;;  %3298 = vmatpush3.bf16.msra.mxu1 %v4061_v10 }
 0x76d   :  { %3299 = vmatprep.subr.bf16.mxu1 %v4131_v9 }
 0x76f   :  { %3282 = vmatpush3.bf16.msra.mxu0 %v4055_v2 }
 0x770   :  { %3283 = vmatprep.subr.bf16.mxu0 %v4131_v9  ;;  %3300 = vmatpush3.bf16.msra.mxu1 %v4062_v45 }
 0x771   :  { %3301 = vmatprep.subr.bf16.mxu1 %v4131_v9 }
 0x773   :  { %3284 = vmatpush3.bf16.msra.mxu0 %v4056_v6 }
 0x774   :  { %3285 = vmatprep.subr.bf16.mxu0 %v4131_v9  ;;  %3302 = vmatpush3.bf16.msra.mxu1 %v4063_v7 }
 0x775   :  { %3303 = vmatprep.subr.bf16.mxu1 %v4131_v9 }
 0x777   :  { %3286 = vmatpush3.bf16.msra.mxu0 %v4057_v44 }
 0x778   :  { %3287 = vmatprep.subr.bf16.mxu0 %v4131_v9  ;;  %3304 = vmatpush3.bf16.msra.mxu1 %v3074_v47  ;;  %v3204_v9 = vld [vmem:[%s6036_s11] ss:$0 sm:$0xff] }
 0x77b   :  { %3288 = vmatpush3.bf16.msra.mxu0 %v2973_v3 }
 0x831   :  { %v3229_v24 = vpop.f32.mrb[0].mxu0 }
 0x832   :  { %v3230_v14 = vpop.f32.mrb[1].mxu0 }
 0x833   :  { %v3231_v55 = vadd.f32 %v3230_v14, %v3229_v24  ;;  %v3232_v62 = vpop.f32.mrb[2].mxu0 }
 0x834   :  { %v3233_v42 = vpop.f32.mrb[3].mxu0 }
 0x835   :  { %v3251_v38 = vpop.f32.mrb[0].mxu1  ;;  %v2853_v11 = vadd.f32 %v3231_v55, %v3161_v29 }
 0x836   :  { %v3252_v57 = vpop.f32.mrb[1].mxu1 }
 0x837   :  { %v3253_v5 = vadd.f32 %v3252_v57, %v3251_v38  ;;  %v3254_v18 = vpop.f32.mrb[2].mxu1 }
 0x838   :  { %v3255_v15 = vpop.f32.mrb[3].mxu1 }
 0x839   :  { %v2893_v13 = vadd.f32 %v3253_v5, %v2853_v11 }
 0x83b   :  { %v2898_v23 = vmax.f32 %v2893_v13, 0.0 }
 0x83d   :  { %v2899_v63 = vpack.c.bf16 %v2898_v23, %v2898_v23 }
 0x83f   :  { %3290 = vmatmul.mubr.msk.bf16.vlgmr.msra.gmra.mrb[4].mxu0 %vm2967_vm7, %v2899_v63 }
 0x912   :  { %v3009_v32 = vpop.f32.mrb[4].mxu0 }
 0x913   :  { %v3010_v22 = vadd.f32 %v3194_v16, %v3009_v32  ;;  %v3291_v48 = vpop.f32.mrb[5].mxu0 }
 0x914   :  { %v3012_v39 = vpop.f32.mrb[6].mxu0 }
 0x915   :  { %v3015_v21 = vmax.f32 %v3010_v22, 0.0  ;;  %v3292_v35 = vpop.f32.mrb[7].mxu0 }
 0x917   :  { %v3016_v25 = vpack.c.bf16 %v3015_v21, %v3015_v21 }
 0x919   :  { %3306 = vmatmul.mubr.msk.bf16.vlgmr.msra.gmra.mrb[4].mxu1 %vm3068_vm0, %v3016_v25 }
 0x9ec   :  { %v3110_v1 = vpop.f32.mrb[4].mxu1 }
 0x9ed   :  { %v3111_v30 = vadd.f32 %v3204_v9, %v3110_v1  ;;  %v3307_v53 = vpop.f32.mrb[5].mxu1 }
 0x9ee   :  { %v3113_v36 = vpop.f32.mrb[6].mxu1 }
 0x9ef   :  { %3116 = vst [vmem:[#allocation5] sm:$0x3] %v3111_v30  ;;  %v3308_v28 = vpop.f32.mrb[7].mxu1 }
 0x9f0   :  { %4076 = shalt.err (!%p4073_p5)
}
 0x9f1   :  { %s4077_s11 = scalar_lea.hbm %s6037_s12, 32 }
 0x9f2   :  { %p4078_p6 = scmp.ne.s32.totalorder %s6037_s12, %s4077_s11  ;;  %p4081_p7 = scmp.lt.u32.totalorder %s4077_s11, %s6037_s12 }
 0x9f4   :  { %p4083_p8 = pnand %p4081_p7, %p4078_p6 }
 0x9f6   :  { %4086 = shalt.err (!%p4083_p8)
}
 0x9f7   :  { %3126 = dma.vmem_to_hbm [thread:$0]  %s3124_s1, 32, %s6037_s12, [#allocation6]  }
 0x9f8   :  { %4091 = dma.done.wait [#allocation6], 32  }
 0x9f9   :  { %4092 = vsyncadd [#allocation6], 4294967264 }
 0x9fa   :  { %3130 = vsyncpa [#allocation6], 1 }

</bundles_post_ra>
